<compile_context>
chip_gen: v7x
topology: tpu7x:2x2x1
jax: 0.10.0
libtpu: 0.0.40
codegen_flags: <defaults>
</compile_context>

<pallas_src>
import math
import numpy as np
import jax
import jax.numpy as jnp
from jax.experimental import pallas as pl
from jax.experimental.pallas import tpu as pltpu

KS = 3  # conv kernel size (module default)


# ---------------------------------------------------------------------------
# Pallas kernel 1: fused "convlayer1 -> AdaptiveAvgPool2d((1,1))".
# pool = mean(conv3x3(x_win, W1)) is linear in x, so it equals
#   (1/ws^2) * sum_{dy,dx,ci} S[dy,dx,ci] * W1[dy,dx,ci,:]
# where S[dy,dx,:] is the partial spatial sum of the window over the positions
# that are valid for tap (dy,dx) under zero padding.  One grid step handles all
# win_num windows of a batch (tiny tiles -> fewer, fatter steps).
# ---------------------------------------------------------------------------
def _win_pool_kernel(xw_ref, w_ref, pool_ref):
    """xw_ref: (win, ws, ws, C) bf16; w_ref: (win, 9*C, C) f32; pool_ref: (win, C) f32."""
    win, ws, _, C = xw_ref.shape
    inv = 1.0 / float(ws * ws)
    rows = []
    for w in range(win):                          # static unroll, win is small
        xwin = xw_ref[w].astype(jnp.float32)      # (ws, ws, C)
        parts = []
        for dy in range(KS):
            r0, r1 = max(0, dy - 1), min(ws, ws - 1 + dy)
            for dx in range(KS):
                c0, c1 = max(0, dx - 1), min(ws, ws - 1 + dx)
                part = jnp.sum(xwin[r0:r1, c0:c1, :], axis=(0, 1), keepdims=True)
                parts.append(part.reshape(1, C))
        s = jnp.concatenate(parts, axis=1)        # (1, 9*C) in (dy, dx, ci) order
        rows.append(jnp.dot(s, w_ref[w], preferred_element_type=jnp.float32))
    pool_ref[...] = (inv * jnp.concatenate(rows, axis=0)).astype(pool_ref.dtype)


def win_pool_pallas(xw, w1flat):
    """xw: (B, win, ws, ws, C) bf16;  w1flat: (win, 9*C, C) f32  ->  (B, win, C) f32."""
    B, win, ws, _, C = xw.shape
    return pl.pallas_call(
        _win_pool_kernel,
        grid=(B,),
        in_specs=[
            pl.BlockSpec((None, win, ws, ws, C), lambda b: (b, 0, 0, 0, 0)),
            pl.BlockSpec((win, KS * KS * C, C), lambda b: (0, 0, 0)),
        ],
        out_specs=pl.BlockSpec((None, win, C), lambda b: (b, 0, 0)),
        out_shape=jax.ShapeDtypeStruct((B, win, C), jnp.float32),
        compiler_params=pltpu.CompilerParams(dimension_semantics=("parallel",)),
    )(xw, w1flat)


# ---------------------------------------------------------------------------
# Pallas kernel 2: single folded 3x3 conv per batch (convlayer2 of all
# (win_num+1) kernel sets + the 1x1 fusion, pre-folded into one (9C, C) weight
# in the wrapper) as one im2col matmul + bias add.
# ---------------------------------------------------------------------------
def _img_conv_kernel(xp_ref, k_ref, b_ref, o_ref):
    """xp_ref: (H+2, W+2, C) bf16 (pre zero-padded); k_ref: (9*C, C) bf16 combined
    kernel; b_ref: (1, C) f32 fusion bias; o_ref: (H*W, C) f32."""
    Hp, Wp, C = xp_ref.shape
    H, W = Hp - (KS - 1), Wp - (KS - 1)
    # Load once (bf16 over the DMA), do the shape plumbing on unpacked f32.
    xp = xp_ref[...].astype(jnp.float32)
    cols = []
    for dy in range(KS):
        for dx in range(KS):
            cols.append(xp[dy:dy + H, dx:dx + W, :].reshape(H * W, C))
    patches = jnp.concatenate(cols, axis=1)       # (H*W, 9*C) im2col, built once
    acc = jnp.dot(patches.astype(jnp.bfloat16), k_ref[...],
                  preferred_element_type=jnp.float32)   # single MXU push
    o_ref[...] = (acc + b_ref[...]).astype(o_ref.dtype)


def img_conv_pallas(x_pad, kc_flat, bf):
    """x_pad: (B, H+2, W+2, C) bf16; kc_flat: (B, 9*C, C) bf16; bf: (1, C) f32."""
    B, Hp, Wp, C = x_pad.shape
    H, W = Hp - (KS - 1), Wp - (KS - 1)
    # TODO(synk): at production sizes, row-tile H with a 1-row halo and split the
    # grid so each chip gets >=2 "parallel" blocks (v7x: 2 TCs, 64 MiB VMEM;
    # v5e: 16 MiB default scoped VMEM).  Whole-image blocks are fine at toy sizes.
    # TODO(synk): C=4 here is lane-sparse (<<128 lanes); for small production C,
    # pad C or pack it with H*W along the lane axis for dense vst.
    return pl.pallas_call(
        _img_conv_kernel,
        grid=(B,),
        in_specs=[
            pl.BlockSpec((None, Hp, Wp, C), lambda b: (b, 0, 0, 0)),
            pl.BlockSpec((None, KS * KS * C, C), lambda b: (b, 0, 0)),
            pl.BlockSpec((1, C), lambda b: (0, 0)),
        ],
        out_specs=pl.BlockSpec((None, H * W, C), lambda b: (b, 0, 0)),
        out_shape=jax.ShapeDtypeStruct((B, H * W, C), jnp.float32),
        compiler_params=pltpu.CompilerParams(dimension_semantics=("parallel",)),
    )(x_pad, kc_flat, bf)


# ---------------------------------------------------------------------------
# Plain-JAX reference conv (validation only)
# ---------------------------------------------------------------------------
def conv3x3_nhwc(x, w):
    return jax.lax.conv_general_dilated(
        x, w, window_strides=(1, 1), padding=((1, 1), (1, 1)),
        dimension_numbers=('NHWC', 'HWIO', 'NHWC'),
        precision=jax.lax.Precision.HIGHEST)


# ---------------------------------------------------------------------------
# Deterministic parameter init (shapes follow the PyTorch module __init__)
# ---------------------------------------------------------------------------
def init_params(key, dim, win_num):
    ks = KS
    keys = jax.random.split(key, 11)
    n = lambda k, s: jax.random.normal(k, s, jnp.float32) * 0.1
    return {
        'conv1_w': n(keys[0], (win_num * dim, dim, ks, ks)),   # ConvLayer1 params
        'dc_w':    n(keys[1], (win_num, dim)),                 # downchannel (grouped 1x1)
        'dc_b':    n(keys[2], (win_num,)),
        'l1_w':    n(keys[3], (win_num * 4, win_num)),         # linear1 (1x1 conv)
        'l1_b':    n(keys[4], (win_num * 4,)),
        'l2_w':    n(keys[5], (win_num, win_num * 4)),         # linear2 (1x1 conv)
        'l2_b':    n(keys[6], (win_num,)),
        'gk_w':    n(keys[7], (dim, win_num * dim)),           # gk_generation (1x1 conv)
        'gk_b':    n(keys[8], (dim,)),
        'fus_w':   n(keys[9], (dim, (win_num + 1) * dim)),     # fusion (1x1 conv)
        'fus_b':   n(keys[10], (dim,)),
    }


# ---------------------------------------------------------------------------
# Full forward: hot convs in Pallas, tiny MLP / kernel-folding einsums in XLA.
# use_pallas=False follows the literal PyTorch structure (reference path).
# ---------------------------------------------------------------------------
def kernel_attention_forward(x, params, input_resolution, win_num=4,
                             use_pallas=True):
    B, L, C = x.shape
    H = W = input_resolution
    ws = int(H // math.sqrt(win_num))
    nwh = H // ws
    ks = KS

    # --- window partition: (B, L, C) -> (B, win_num, ws, ws, C)  (NHWC windows)
    xw = x.reshape(B, nwh, ws, nwh, ws, C).transpose(0, 1, 3, 2, 4, 5)
    xw = xw.reshape(B, win_num, ws, ws, C)

    # conv1 weights, torch layout (w*C+o, i, ky, kx)
    kb = params['conv1_w'].reshape(win_num, C, C, ks, ks)          # (w, o, i, ky, kx)
    w1 = jnp.transpose(kb, (0, 3, 4, 2, 1))                        # (w, ky, kx, i, o)

    if use_pallas:
        w1flat = w1.reshape(win_num, ks * ks * C, C)
        pool = win_pool_pallas(xw.astype(jnp.bfloat16), w1flat)    # (B, win, C)
    else:
        conv1 = jax.vmap(conv3x3_nhwc, in_axes=(1, 0), out_axes=1)(xw, w1)
        pool = jnp.mean(conv1, axis=(2, 3))

    # --- WinKernel_Reweight MLP (tiny; plain JAX glue)
    s = jnp.einsum('bwc,wc->bw', pool, params['dc_w']) + params['dc_b']
    h = jnp.einsum('bw,jw->bj', s, params['l1_w']) + params['l1_b']
    h = jax.nn.gelu(h, approximate=False)
    scale = jax.nn.sigmoid(
        jnp.einsum('bj,wj->bw', h, params['l2_w']) + params['l2_b'])   # (B, win)

    wf = params['fus_w'].reshape(C, win_num + 1, C)        # (d, kset, o)
    gkw = params['gk_w'].reshape(C, win_num, C)            # (j, w, m)
    bf = params['fus_b'].reshape(1, C)
    x_img = x.reshape(B, H, W, C)
    hp = jax.lax.Precision.HIGHEST

    if use_pallas:
        # Fold reweight + global-kernel generation + 1x1 fusion into ONE
        # combined 3x3 kernel per batch:  Kc[b, ky, kx, ic, d].
        loc = jnp.einsum('dwo,bw,woiyx->byxid', wf[:, :win_num, :], scale, kb,
                         precision=hp)
        gk1 = jnp.einsum('do,jwm,bw,womyx->byxjd', wf[:, win_num, :], gkw,
                         scale, kb, precision=hp)
        gkb = jnp.einsum('do,j->jd', wf[:, win_num, :], params['gk_b'])
        kc = loc + gk1 + gkb[None, None, None]                        # (B,3,3,C,C)
        kc_flat = kc.reshape(B, ks * ks * C, C).astype(jnp.bfloat16)
        x_pad = jnp.pad(x_img, ((0, 0), (1, 1), (1, 1), (0, 0))).astype(jnp.bfloat16)
        out = img_conv_pallas(x_pad, kc_flat, bf)                     # (B, H*W, C)
    else:
        # literal path: per-kernel-set 3x3 convs + 1x1 fusion (mirrors PyTorch)
        k_rw = scale[:, :, None, None, None, None] * kb[None]         # (B,w,o,i,ky,kx)
        k2 = jnp.transpose(k_rw, (0, 2, 1, 3, 4, 5)).reshape(B, C, win_num * C, ks, ks)
        gk = jnp.einsum('jm,bomyx->bojyx', params['gk_w'], k2, precision=hp)
        gk = gk + params['gk_b'][None, None, :, None, None]
        kcat = jnp.concatenate([k_rw, gk[:, None]], axis=1)            # (B,K,o,i,ky,kx)
        kernels_all = jnp.transpose(kcat, (0, 1, 4, 5, 3, 2))          # (B,K,ky,kx,i,o)

        def conv_bk(xb, kbk):
            return jax.vmap(lambda kk: conv3x3_nhwc(xb[None], kk)[0])(kbk)
        y5 = jax.vmap(conv_bk)(x_img, kernels_all)                     # (B,K,H,W,C)
        wf_r = wf.transpose(1, 2, 0)                                   # (k, o, d)
        out = jnp.einsum('bkhwc,kcd->bhwd', y5, wf_r, precision=hp)
        out = (out + bf.reshape(1, 1, 1, C)).reshape(B, H * W, C)
    return out


if __name__ == "__main__":
    B, C, H = 2, 4, 16          # dim=4, input_resolution=16 -> window_size=8
    win_num = 4
    key = jax.random.PRNGKey(0)
    kx_, kp_ = jax.random.split(key)
    x = jax.random.normal(kx_, (B, H * H, C), jnp.float32) * 0.5
    params = init_params(kp_, C, win_num)

    fwd_pallas = jax.jit(lambda xx, pp: kernel_attention_forward(
        xx, pp, H, win_num, use_pallas=True))
    fwd_ref = jax.jit(lambda xx, pp: kernel_attention_forward(
        xx, pp, H, win_num, use_pallas=False))

    out = jax.block_until_ready(fwd_pallas(x, params))
    assert out.shape == (B, H * H, C)

    ref = jax.block_until_ready(fwd_ref(x, params))
    # Tolerance loosened vs v1 because the Pallas path feeds bf16 operands to the
    # MXU (f32 accumulation); expected deviation is well below 1%.
    np.testing.assert_allclose(np.asarray(out), np.asarray(ref),
                               rtol=2e-2, atol=2e-2)
    print("KERNEL_OK")
</pallas_src>

<mosaic_0001>
module attributes {stable_mosaic.version = 11 : i64} {
  func.func @_win_pool_kernel(%arg0: i32, %arg1: memref<1x4x8x8x4xbf16, #tpu.memory_space<vmem>>, %arg2: memref<4x36x4xf32, #tpu.memory_space<vmem>>, %arg3: memref<1x4x4xf32, #tpu.memory_space<vmem>>) attributes {dimension_semantics = [#tpu.dimension_semantics<parallel>], iteration_bounds = array<i64: 2>, scalar_prefetch = 0 : i64, scratch_operands = 0 : i64, tpu.core_type = #tpu.core_type<tc>, window_params = [{transform_indices = @transform_0, window_bounds = array<i64: 1, 4, 8, 8, 4>}, {pipeline_mode = #tpu.pipeline_mode<synchronous>, transform_indices = @transform_1, window_bounds = array<i64: 4, 36, 4>}, {transform_indices = @transform_2, window_bounds = array<i64: 1, 4, 4>}]} {
    %c0 = arith.constant 0 : index
    %c0_0 = arith.constant 0 : index
    %c0_1 = arith.constant 0 : index
    %c0_2 = arith.constant 0 : index
    %c0_3 = arith.constant 0 : index
    %0 = vector.load %arg1[%c0, %c0_0, %c0_1, %c0_2, %c0_3] : memref<1x4x8x8x4xbf16, #tpu.memory_space<vmem>>, vector<1x1x8x8x4xbf16>
    %1 = vector.shape_cast %0 : vector<1x1x8x8x4xbf16> to vector<8x8x4xbf16>
    %2 = arith.extf %1 : vector<8x8x4xbf16> to vector<8x8x4xf32>
    %3 = vector.extract_strided_slice %2 {offsets = [0, 0, 0], sizes = [7, 7, 4], strides = [1, 1, 1]} : vector<8x8x4xf32> to vector<7x7x4xf32>
    %cst = arith.constant dense<0.000000e+00> : vector<4xf32>
    %4 = vector.multi_reduction <add>, %3, %cst [0, 1] : vector<7x7x4xf32> to vector<4xf32>
    %5 = vector.shape_cast %4 : vector<4xf32> to vector<1x1x4xf32>
    %6 = vector.shape_cast %5 : vector<1x1x4xf32> to vector<1x4xf32>
    %7 = vector.extract_strided_slice %2 {offsets = [0, 0, 0], sizes = [7, 8, 4], strides = [1, 1, 1]} : vector<8x8x4xf32> to vector<7x8x4xf32>
    %cst_4 = arith.constant dense<0.000000e+00> : vector<4xf32>
    %8 = vector.multi_reduction <add>, %7, %cst_4 [0, 1] : vector<7x8x4xf32> to vector<4xf32>
    %9 = vector.shape_cast %8 : vector<4xf32> to vector<1x1x4xf32>
    %10 = vector.shape_cast %9 : vector<1x1x4xf32> to vector<1x4xf32>
    %11 = vector.extract_strided_slice %2 {offsets = [0, 1, 0], sizes = [7, 7, 4], strides = [1, 1, 1]} : vector<8x8x4xf32> to vector<7x7x4xf32>
    %cst_5 = arith.constant dense<0.000000e+00> : vector<4xf32>
    %12 = vector.multi_reduction <add>, %11, %cst_5 [0, 1] : vector<7x7x4xf32> to vector<4xf32>
    %13 = vector.shape_cast %12 : vector<4xf32> to vector<1x1x4xf32>
    %14 = vector.shape_cast %13 : vector<1x1x4xf32> to vector<1x4xf32>
    %15 = vector.extract_strided_slice %2 {offsets = [0, 0, 0], sizes = [8, 7, 4], strides = [1, 1, 1]} : vector<8x8x4xf32> to vector<8x7x4xf32>
    %cst_6 = arith.constant dense<0.000000e+00> : vector<4xf32>
    %16 = vector.multi_reduction <add>, %15, %cst_6 [0, 1] : vector<8x7x4xf32> to vector<4xf32>
    %17 = vector.shape_cast %16 : vector<4xf32> to vector<1x1x4xf32>
    %18 = vector.shape_cast %17 : vector<1x1x4xf32> to vector<1x4xf32>
    %cst_7 = arith.constant dense<0.000000e+00> : vector<4xf32>
    %19 = vector.multi_reduction <add>, %2, %cst_7 [0, 1] : vector<8x8x4xf32> to vector<4xf32>
    %20 = vector.shape_cast %19 : vector<4xf32> to vector<1x1x4xf32>
    %21 = vector.shape_cast %20 : vector<1x1x4xf32> to vector<1x4xf32>
    %22 = vector.extract_strided_slice %2 {offsets = [0, 1, 0], sizes = [8, 7, 4], strides = [1, 1, 1]} : vector<8x8x4xf32> to vector<8x7x4xf32>
    %cst_8 = arith.constant dense<0.000000e+00> : vector<4xf32>
    %23 = vector.multi_reduction <add>, %22, %cst_8 [0, 1] : vector<8x7x4xf32> to vector<4xf32>
    %24 = vector.shape_cast %23 : vector<4xf32> to vector<1x1x4xf32>
    %25 = vector.shape_cast %24 : vector<1x1x4xf32> to vector<1x4xf32>
    %26 = vector.extract_strided_slice %2 {offsets = [1, 0, 0], sizes = [7, 7, 4], strides = [1, 1, 1]} : vector<8x8x4xf32> to vector<7x7x4xf32>
    %cst_9 = arith.constant dense<0.000000e+00> : vector<4xf32>
    %27 = vector.multi_reduction <add>, %26, %cst_9 [0, 1] : vector<7x7x4xf32> to vector<4xf32>
    %28 = vector.shape_cast %27 : vector<4xf32> to vector<1x1x4xf32>
    %29 = vector.shape_cast %28 : vector<1x1x4xf32> to vector<1x4xf32>
    %30 = vector.extract_strided_slice %2 {offsets = [1, 0, 0], sizes = [7, 8, 4], strides = [1, 1, 1]} : vector<8x8x4xf32> to vector<7x8x4xf32>
    %cst_10 = arith.constant dense<0.000000e+00> : vector<4xf32>
    %31 = vector.multi_reduction <add>, %30, %cst_10 [0, 1] : vector<7x8x4xf32> to vector<4xf32>
    %32 = vector.shape_cast %31 : vector<4xf32> to vector<1x1x4xf32>
    %33 = vector.shape_cast %32 : vector<1x1x4xf32> to vector<1x4xf32>
    %34 = vector.extract_strided_slice %2 {offsets = [1, 1, 0], sizes = [7, 7, 4], strides = [1, 1, 1]} : vector<8x8x4xf32> to vector<7x7x4xf32>
    %cst_11 = arith.constant dense<0.000000e+00> : vector<4xf32>
    %35 = vector.multi_reduction <add>, %34, %cst_11 [0, 1] : vector<7x7x4xf32> to vector<4xf32>
    %36 = vector.shape_cast %35 : vector<4xf32> to vector<1x1x4xf32>
    %37 = vector.shape_cast %36 : vector<1x1x4xf32> to vector<1x4xf32>
    %38 = tpu.concatenate %6, %10, %14, %18, %21, %25, %29, %33, %37 in 1 : vector<1x4xf32>, vector<1x4xf32>, vector<1x4xf32>, vector<1x4xf32>, vector<1x4xf32>, vector<1x4xf32>, vector<1x4xf32>, vector<1x4xf32>, vector<1x4xf32> -> vector<1x36xf32>
    %c0_12 = arith.constant 0 : index
    %c0_13 = arith.constant 0 : index
    %c0_14 = arith.constant 0 : index
    %39 = vector.load %arg2[%c0_12, %c0_13, %c0_14] : memref<4x36x4xf32, #tpu.memory_space<vmem>>, vector<1x36x4xf32>
    %40 = vector.shape_cast %39 : vector<1x36x4xf32> to vector<36x4xf32>
    %cst_15 = arith.constant dense<0.000000e+00> : vector<1x4xf32>
    %41 = tpu.matmul %38, %40, %cst_15 {dimension_numbers = #tpu.dot_dimension_numbers<[1], [0], [0], [1], [0, 0, 1, 1], [], []>} : vector<1x36xf32>, vector<36x4xf32>, vector<1x4xf32> -> vector<1x4xf32>
    %c0_16 = arith.constant 0 : index
    %c1 = arith.constant 1 : index
    %c0_17 = arith.constant 0 : index
    %c0_18 = arith.constant 0 : index
    %c0_19 = arith.constant 0 : index
    %42 = vector.load %arg1[%c0_16, %c1, %c0_17, %c0_18, %c0_19] : memref<1x4x8x8x4xbf16, #tpu.memory_space<vmem>>, vector<1x1x8x8x4xbf16>
    %43 = vector.shape_cast %42 : vector<1x1x8x8x4xbf16> to vector<8x8x4xbf16>
    %44 = arith.extf %43 : vector<8x8x4xbf16> to vector<8x8x4xf32>
    %45 = vector.extract_strided_slice %44 {offsets = [0, 0, 0], sizes = [7, 7, 4], strides = [1, 1, 1]} : vector<8x8x4xf32> to vector<7x7x4xf32>
    %cst_20 = arith.constant dense<0.000000e+00> : vector<4xf32>
    %46 = vector.multi_reduction <add>, %45, %cst_20 [0, 1] : vector<7x7x4xf32> to vector<4xf32>
    %47 = vector.shape_cast %46 : vector<4xf32> to vector<1x1x4xf32>
    %48 = vector.shape_cast %47 : vector<1x1x4xf32> to vector<1x4xf32>
    %49 = vector.extract_strided_slice %44 {offsets = [0, 0, 0], sizes = [7, 8, 4], strides = [1, 1, 1]} : vector<8x8x4xf32> to vector<7x8x4xf32>
    %cst_21 = arith.constant dense<0.000000e+00> : vector<4xf32>
    %50 = vector.multi_reduction <add>, %49, %cst_21 [0, 1] : vector<7x8x4xf32> to vector<4xf32>
    %51 = vector.shape_cast %50 : vector<4xf32> to vector<1x1x4xf32>
    %52 = vector.shape_cast %51 : vector<1x1x4xf32> to vector<1x4xf32>
    %53 = vector.extract_strided_slice %44 {offsets = [0, 1, 0], sizes = [7, 7, 4], strides = [1, 1, 1]} : vector<8x8x4xf32> to vector<7x7x4xf32>
    %cst_22 = arith.constant dense<0.000000e+00> : vector<4xf32>
    %54 = vector.multi_reduction <add>, %53, %cst_22 [0, 1] : vector<7x7x4xf32> to vector<4xf32>
    %55 = vector.shape_cast %54 : vector<4xf32> to vector<1x1x4xf32>
    %56 = vector.shape_cast %55 : vector<1x1x4xf32> to vector<1x4xf32>
    %57 = vector.extract_strided_slice %44 {offsets = [0, 0, 0], sizes = [8, 7, 4], strides = [1, 1, 1]} : vector<8x8x4xf32> to vector<8x7x4xf32>
    %cst_23 = arith.constant dense<0.000000e+00> : vector<4xf32>
    %58 = vector.multi_reduction <add>, %57, %cst_23 [0, 1] : vector<8x7x4xf32> to vector<4xf32>
    %59 = vector.shape_cast %58 : vector<4xf32> to vector<1x1x4xf32>
    %60 = vector.shape_cast %59 : vector<1x1x4xf32> to vector<1x4xf32>
    %cst_24 = arith.constant dense<0.000000e+00> : vector<4xf32>
    %61 = vector.multi_reduction <add>, %44, %cst_24 [0, 1] : vector<8x8x4xf32> to vector<4xf32>
    %62 = vector.shape_cast %61 : vector<4xf32> to vector<1x1x4xf32>
    %63 = vector.shape_cast %62 : vector<1x1x4xf32> to vector<1x4xf32>
    %64 = vector.extract_strided_slice %44 {offsets = [0, 1, 0], sizes = [8, 7, 4], strides = [1, 1, 1]} : vector<8x8x4xf32> to vector<8x7x4xf32>
    %cst_25 = arith.constant dense<0.000000e+00> : vector<4xf32>
    %65 = vector.multi_reduction <add>, %64, %cst_25 [0, 1] : vector<8x7x4xf32> to vector<4xf32>
    %66 = vector.shape_cast %65 : vector<4xf32> to vector<1x1x4xf32>
    %67 = vector.shape_cast %66 : vector<1x1x4xf32> to vector<1x4xf32>
    %68 = vector.extract_strided_slice %44 {offsets = [1, 0, 0], sizes = [7, 7, 4], strides = [1, 1, 1]} : vector<8x8x4xf32> to vector<7x7x4xf32>
    %cst_26 = arith.constant dense<0.000000e+00> : vector<4xf32>
    %69 = vector.multi_reduction <add>, %68, %cst_26 [0, 1] : vector<7x7x4xf32> to vector<4xf32>
    %70 = vector.shape_cast %69 : vector<4xf32> to vector<1x1x4xf32>
    %71 = vector.shape_cast %70 : vector<1x1x4xf32> to vector<1x4xf32>
    %72 = vector.extract_strided_slice %44 {offsets = [1, 0, 0], sizes = [7, 8, 4], strides = [1, 1, 1]} : vector<8x8x4xf32> to vector<7x8x4xf32>
    %cst_27 = arith.constant dense<0.000000e+00> : vector<4xf32>
    %73 = vector.multi_reduction <add>, %72, %cst_27 [0, 1] : vector<7x8x4xf32> to vector<4xf32>
    %74 = vector.shape_cast %73 : vector<4xf32> to vector<1x1x4xf32>
    %75 = vector.shape_cast %74 : vector<1x1x4xf32> to vector<1x4xf32>
    %76 = vector.extract_strided_slice %44 {offsets = [1, 1, 0], sizes = [7, 7, 4], strides = [1, 1, 1]} : vector<8x8x4xf32> to vector<7x7x4xf32>
    %cst_28 = arith.constant dense<0.000000e+00> : vector<4xf32>
    %77 = vector.multi_reduction <add>, %76, %cst_28 [0, 1] : vector<7x7x4xf32> to vector<4xf32>
    %78 = vector.shape_cast %77 : vector<4xf32> to vector<1x1x4xf32>
    %79 = vector.shape_cast %78 : vector<1x1x4xf32> to vector<1x4xf32>
    %80 = tpu.concatenate %48, %52, %56, %60, %63, %67, %71, %75, %79 in 1 : vector<1x4xf32>, vector<1x4xf32>, vector<1x4xf32>, vector<1x4xf32>, vector<1x4xf32>, vector<1x4xf32>, vector<1x4xf32>, vector<1x4xf32>, vector<1x4xf32> -> vector<1x36xf32>
    %c1_29 = arith.constant 1 : index
    %c0_30 = arith.constant 0 : index
    %c0_31 = arith.constant 0 : index
    %81 = vector.load %arg2[%c1_29, %c0_30, %c0_31] : memref<4x36x4xf32, #tpu.memory_space<vmem>>, vector<1x36x4xf32>
    %82 = vector.shape_cast %81 : vector<1x36x4xf32> to vector<36x4xf32>
    %cst_32 = arith.constant dense<0.000000e+00> : vector<1x4xf32>
    %83 = tpu.matmul %80, %82, %cst_32 {dimension_numbers = #tpu.dot_dimension_numbers<[1], [0], [0], [1], [0, 0, 1, 1], [], []>} : vector<1x36xf32>, vector<36x4xf32>, vector<1x4xf32> -> vector<1x4xf32>
    %c0_33 = arith.constant 0 : index
    %c2 = arith.constant 2 : index
    %c0_34 = arith.constant 0 : index
    %c0_35 = arith.constant 0 : index
    %c0_36 = arith.constant 0 : index
    %84 = vector.load %arg1[%c0_33, %c2, %c0_34, %c0_35, %c0_36] : memref<1x4x8x8x4xbf16, #tpu.memory_space<vmem>>, vector<1x1x8x8x4xbf16>
    %85 = vector.shape_cast %84 : vector<1x1x8x8x4xbf16> to vector<8x8x4xbf16>
    %86 = arith.extf %85 : vector<8x8x4xbf16> to vector<8x8x4xf32>
    %87 = vector.extract_strided_slice %86 {offsets = [0, 0, 0], sizes = [7, 7, 4], strides = [1, 1, 1]} : vector<8x8x4xf32> to vector<7x7x4xf32>
    %cst_37 = arith.constant dense<0.000000e+00> : vector<4xf32>
    %88 = vector.multi_reduction <add>, %87, %cst_37 [0, 1] : vector<7x7x4xf32> to vector<4xf32>
    %89 = vector.shape_cast %88 : vector<4xf32> to vector<1x1x4xf32>
    %90 = vector.shape_cast %89 : vector<1x1x4xf32> to vector<1x4xf32>
    %91 = vector.extract_strided_slice %86 {offsets = [0, 0, 0], sizes = [7, 8, 4], strides = [1, 1, 1]} : vector<8x8x4xf32> to vector<7x8x4xf32>
    %cst_38 = arith.constant dense<0.000000e+00> : vector<4xf32>
    %92 = vector.multi_reduction <add>, %91, %cst_38 [0, 1] : vector<7x8x4xf32> to vector<4xf32>
    %93 = vector.shape_cast %92 : vector<4xf32> to vector<1x1x4xf32>
    %94 = vector.shape_cast %93 : vector<1x1x4xf32> to vector<1x4xf32>
    %95 = vector.extract_strided_slice %86 {offsets = [0, 1, 0], sizes = [7, 7, 4], strides = [1, 1, 1]} : vector<8x8x4xf32> to vector<7x7x4xf32>
    %cst_39 = arith.constant dense<0.000000e+00> : vector<4xf32>
    %96 = vector.multi_reduction <add>, %95, %cst_39 [0, 1] : vector<7x7x4xf32> to vector<4xf32>
    %97 = vector.shape_cast %96 : vector<4xf32> to vector<1x1x4xf32>
    %98 = vector.shape_cast %97 : vector<1x1x4xf32> to vector<1x4xf32>
    %99 = vector.extract_strided_slice %86 {offsets = [0, 0, 0], sizes = [8, 7, 4], strides = [1, 1, 1]} : vector<8x8x4xf32> to vector<8x7x4xf32>
    %cst_40 = arith.constant dense<0.000000e+00> : vector<4xf32>
    %100 = vector.multi_reduction <add>, %99, %cst_40 [0, 1] : vector<8x7x4xf32> to vector<4xf32>
    %101 = vector.shape_cast %100 : vector<4xf32> to vector<1x1x4xf32>
    %102 = vector.shape_cast %101 : vector<1x1x4xf32> to vector<1x4xf32>
    %cst_41 = arith.constant dense<0.000000e+00> : vector<4xf32>
    %103 = vector.multi_reduction <add>, %86, %cst_41 [0, 1] : vector<8x8x4xf32> to vector<4xf32>
    %104 = vector.shape_cast %103 : vector<4xf32> to vector<1x1x4xf32>
    %105 = vector.shape_cast %104 : vector<1x1x4xf32> to vector<1x4xf32>
    %106 = vector.extract_strided_slice %86 {offsets = [0, 1, 0], sizes = [8, 7, 4], strides = [1, 1, 1]} : vector<8x8x4xf32> to vector<8x7x4xf32>
    %cst_42 = arith.constant dense<0.000000e+00> : vector<4xf32>
    %107 = vector.multi_reduction <add>, %106, %cst_42 [0, 1] : vector<8x7x4xf32> to vector<4xf32>
    %108 = vector.shape_cast %107 : vector<4xf32> to vector<1x1x4xf32>
    %109 = vector.shape_cast %108 : vector<1x1x4xf32> to vector<1x4xf32>
    %110 = vector.extract_strided_slice %86 {offsets = [1, 0, 0], sizes = [7, 7, 4], strides = [1, 1, 1]} : vector<8x8x4xf32> to vector<7x7x4xf32>
    %cst_43 = arith.constant dense<0.000000e+00> : vector<4xf32>
    %111 = vector.multi_reduction <add>, %110, %cst_43 [0, 1] : vector<7x7x4xf32> to vector<4xf32>
    %112 = vector.shape_cast %111 : vector<4xf32> to vector<1x1x4xf32>
    %113 = vector.shape_cast %112 : vector<1x1x4xf32> to vector<1x4xf32>
    %114 = vector.extract_strided_slice %86 {offsets = [1, 0, 0], sizes = [7, 8, 4], strides = [1, 1, 1]} : vector<8x8x4xf32> to vector<7x8x4xf32>
    %cst_44 = arith.constant dense<0.000000e+00> : vector<4xf32>
    %115 = vector.multi_reduction <add>, %114, %cst_44 [0, 1] : vector<7x8x4xf32> to vector<4xf32>
    %116 = vector.shape_cast %115 : vector<4xf32> to vector<1x1x4xf32>
    %117 = vector.shape_cast %116 : vector<1x1x4xf32> to vector<1x4xf32>
    %118 = vector.extract_strided_slice %86 {offsets = [1, 1, 0], sizes = [7, 7, 4], strides = [1, 1, 1]} : vector<8x8x4xf32> to vector<7x7x4xf32>
    %cst_45 = arith.constant dense<0.000000e+00> : vector<4xf32>
    %119 = vector.multi_reduction <add>, %118, %cst_45 [0, 1] : vector<7x7x4xf32> to vector<4xf32>
    %120 = vector.shape_cast %119 : vector<4xf32> to vector<1x1x4xf32>
    %121 = vector.shape_cast %120 : vector<1x1x4xf32> to vector<1x4xf32>
    %122 = tpu.concatenate %90, %94, %98, %102, %105, %109, %113, %117, %121 in 1 : vector<1x4xf32>, vector<1x4xf32>, vector<1x4xf32>, vector<1x4xf32>, vector<1x4xf32>, vector<1x4xf32>, vector<1x4xf32>, vector<1x4xf32>, vector<1x4xf32> -> vector<1x36xf32>
    %c2_46 = arith.constant 2 : index
    %c0_47 = arith.constant 0 : index
    %c0_48 = arith.constant 0 : index
    %123 = vector.load %arg2[%c2_46, %c0_47, %c0_48] : memref<4x36x4xf32, #tpu.memory_space<vmem>>, vector<1x36x4xf32>
    %124 = vector.shape_cast %123 : vector<1x36x4xf32> to vector<36x4xf32>
    %cst_49 = arith.constant dense<0.000000e+00> : vector<1x4xf32>
    %125 = tpu.matmul %122, %124, %cst_49 {dimension_numbers = #tpu.dot_dimension_numbers<[1], [0], [0], [1], [0, 0, 1, 1], [], []>} : vector<1x36xf32>, vector<36x4xf32>, vector<1x4xf32> -> vector<1x4xf32>
    %c0_50 = arith.constant 0 : index
    %c3 = arith.constant 3 : index
    %c0_51 = arith.constant 0 : index
    %c0_52 = arith.constant 0 : index
    %c0_53 = arith.constant 0 : index
    %126 = vector.load %arg1[%c0_50, %c3, %c0_51, %c0_52, %c0_53] : memref<1x4x8x8x4xbf16, #tpu.memory_space<vmem>>, vector<1x1x8x8x4xbf16>
    %127 = vector.shape_cast %126 : vector<1x1x8x8x4xbf16> to vector<8x8x4xbf16>
    %128 = arith.extf %127 : vector<8x8x4xbf16> to vector<8x8x4xf32>
    %129 = vector.extract_strided_slice %128 {offsets = [0, 0, 0], sizes = [7, 7, 4], strides = [1, 1, 1]} : vector<8x8x4xf32> to vector<7x7x4xf32>
    %cst_54 = arith.constant dense<0.000000e+00> : vector<4xf32>
    %130 = vector.multi_reduction <add>, %129, %cst_54 [0, 1] : vector<7x7x4xf32> to vector<4xf32>
    %131 = vector.shape_cast %130 : vector<4xf32> to vector<1x1x4xf32>
    %132 = vector.shape_cast %131 : vector<1x1x4xf32> to vector<1x4xf32>
    %133 = vector.extract_strided_slice %128 {offsets = [0, 0, 0], sizes = [7, 8, 4], strides = [1, 1, 1]} : vector<8x8x4xf32> to vector<7x8x4xf32>
    %cst_55 = arith.constant dense<0.000000e+00> : vector<4xf32>
    %134 = vector.multi_reduction <add>, %133, %cst_55 [0, 1] : vector<7x8x4xf32> to vector<4xf32>
    %135 = vector.shape_cast %134 : vector<4xf32> to vector<1x1x4xf32>
    %136 = vector.shape_cast %135 : vector<1x1x4xf32> to vector<1x4xf32>
    %137 = vector.extract_strided_slice %128 {offsets = [0, 1, 0], sizes = [7, 7, 4], strides = [1, 1, 1]} : vector<8x8x4xf32> to vector<7x7x4xf32>
    %cst_56 = arith.constant dense<0.000000e+00> : vector<4xf32>
    %138 = vector.multi_reduction <add>, %137, %cst_56 [0, 1] : vector<7x7x4xf32> to vector<4xf32>
    %139 = vector.shape_cast %138 : vector<4xf32> to vector<1x1x4xf32>
    %140 = vector.shape_cast %139 : vector<1x1x4xf32> to vector<1x4xf32>
    %141 = vector.extract_strided_slice %128 {offsets = [0, 0, 0], sizes = [8, 7, 4], strides = [1, 1, 1]} : vector<8x8x4xf32> to vector<8x7x4xf32>
    %cst_57 = arith.constant dense<0.000000e+00> : vector<4xf32>
    %142 = vector.multi_reduction <add>, %141, %cst_57 [0, 1] : vector<8x7x4xf32> to vector<4xf32>
    %143 = vector.shape_cast %142 : vector<4xf32> to vector<1x1x4xf32>
    %144 = vector.shape_cast %143 : vector<1x1x4xf32> to vector<1x4xf32>
    %cst_58 = arith.constant dense<0.000000e+00> : vector<4xf32>
    %145 = vector.multi_reduction <add>, %128, %cst_58 [0, 1] : vector<8x8x4xf32> to vector<4xf32>
    %146 = vector.shape_cast %145 : vector<4xf32> to vector<1x1x4xf32>
    %147 = vector.shape_cast %146 : vector<1x1x4xf32> to vector<1x4xf32>
    %148 = vector.extract_strided_slice %128 {offsets = [0, 1, 0], sizes = [8, 7, 4], strides = [1, 1, 1]} : vector<8x8x4xf32> to vector<8x7x4xf32>
    %cst_59 = arith.constant dense<0.000000e+00> : vector<4xf32>
    %149 = vector.multi_reduction <add>, %148, %cst_59 [0, 1] : vector<8x7x4xf32> to vector<4xf32>
    %150 = vector.shape_cast %149 : vector<4xf32> to vector<1x1x4xf32>
    %151 = vector.shape_cast %150 : vector<1x1x4xf32> to vector<1x4xf32>
    %152 = vector.extract_strided_slice %128 {offsets = [1, 0, 0], sizes = [7, 7, 4], strides = [1, 1, 1]} : vector<8x8x4xf32> to vector<7x7x4xf32>
    %cst_60 = arith.constant dense<0.000000e+00> : vector<4xf32>
    %153 = vector.multi_reduction <add>, %152, %cst_60 [0, 1] : vector<7x7x4xf32> to vector<4xf32>
    %154 = vector.shape_cast %153 : vector<4xf32> to vector<1x1x4xf32>
    %155 = vector.shape_cast %154 : vector<1x1x4xf32> to vector<1x4xf32>
    %156 = vector.extract_strided_slice %128 {offsets = [1, 0, 0], sizes = [7, 8, 4], strides = [1, 1, 1]} : vector<8x8x4xf32> to vector<7x8x4xf32>
    %cst_61 = arith.constant dense<0.000000e+00> : vector<4xf32>
    %157 = vector.multi_reduction <add>, %156, %cst_61 [0, 1] : vector<7x8x4xf32> to vector<4xf32>
    %158 = vector.shape_cast %157 : vector<4xf32> to vector<1x1x4xf32>
    %159 = vector.shape_cast %158 : vector<1x1x4xf32> to vector<1x4xf32>
    %160 = vector.extract_strided_slice %128 {offsets = [1, 1, 0], sizes = [7, 7, 4], strides = [1, 1, 1]} : vector<8x8x4xf32> to vector<7x7x4xf32>
    %cst_62 = arith.constant dense<0.000000e+00> : vector<4xf32>
    %161 = vector.multi_reduction <add>, %160, %cst_62 [0, 1] : vector<7x7x4xf32> to vector<4xf32>
    %162 = vector.shape_cast %161 : vector<4xf32> to vector<1x1x4xf32>
    %163 = vector.shape_cast %162 : vector<1x1x4xf32> to vector<1x4xf32>
    %164 = tpu.concatenate %132, %136, %140, %144, %147, %151, %155, %159, %163 in 1 : vector<1x4xf32>, vector<1x4xf32>, vector<1x4xf32>, vector<1x4xf32>, vector<1x4xf32>, vector<1x4xf32>, vector<1x4xf32>, vector<1x4xf32>, vector<1x4xf32> -> vector<1x36xf32>
    %c3_63 = arith.constant 3 : index
    %c0_64 = arith.constant 0 : index
    %c0_65 = arith.constant 0 : index
    %165 = vector.load %arg2[%c3_63, %c0_64, %c0_65] : memref<4x36x4xf32, #tpu.memory_space<vmem>>, vector<1x36x4xf32>
    %166 = vector.shape_cast %165 : vector<1x36x4xf32> to vector<36x4xf32>
    %cst_66 = arith.constant dense<0.000000e+00> : vector<1x4xf32>
    %167 = tpu.matmul %164, %166, %cst_66 {dimension_numbers = #tpu.dot_dimension_numbers<[1], [0], [0], [1], [0, 0, 1, 1], [], []>} : vector<1x36xf32>, vector<36x4xf32>, vector<1x4xf32> -> vector<1x4xf32>
    %168 = tpu.concatenate %41, %83, %125, %167 in 0 : vector<1x4xf32>, vector<1x4xf32>, vector<1x4xf32>, vector<1x4xf32> -> vector<4x4xf32>
    %cst_67 = arith.constant 1.562500e-02 : f32
    %169 = vector.broadcast %cst_67 : f32 to vector<4x4xf32>
    %170 = arith.mulf %169, %168 : vector<4x4xf32>
    %c0_68 = arith.constant 0 : index
    %c0_69 = arith.constant 0 : index
    %c0_70 = arith.constant 0 : index
    %171 = vector.load %arg3[%c0_68, %c0_69, %c0_70] : memref<1x4x4xf32, #tpu.memory_space<vmem>>, vector<1x4x4xf32>
    %172 = vector.shape_cast %171 : vector<1x4x4xf32> to vector<4x4xf32>
    %173 = vector.shape_cast %170 : vector<4x4xf32> to vector<1x4x4xf32>
    tpu.vector_store %arg3[%c0_68, %c0_69, %c0_70], %173 {strides = array<i32>} : memref<1x4x4xf32, #tpu.memory_space<vmem>>, vector<1x4x4xf32>,
    return
  }
  func.func @transform_0(%arg0: i32) -> (i32, i32, i32, i32, i32) {
    %c0_i32 = arith.constant 0 : i32
    %c0_i32_0 = arith.constant 0 : i32
    %c0_i32_1 = arith.constant 0 : i32
    %c0_i32_2 = arith.constant 0 : i32
    %c0_i32_3 = arith.constant 0 : i32
    return %arg0, %c0_i32, %c0_i32_0, %c0_i32_1, %c0_i32_2 : i32, i32, i32, i32, i32
  }
  func.func @transform_1(%arg0: i32) -> (i32, i32, i32) {
    %c0_i32 = arith.constant 0 : i32
    %c0_i32_0 = arith.constant 0 : i32
    %c0_i32_1 = arith.constant 0 : i32
    %c0_i32_2 = arith.constant 0 : i32
    return %c0_i32, %c0_i32_0, %c0_i32_1 : i32, i32, i32
  }
  func.func @transform_2(%arg0: i32) -> (i32, i32, i32) {
    %c0_i32 = arith.constant 0 : i32
    %c0_i32_0 = arith.constant 0 : i32
    %c0_i32_1 = arith.constant 0 : i32
    return %arg0, %c0_i32, %c0_i32_0 : i32, i32, i32
  }
}

module attributes {stable_mosaic.version = 11 : i64} {
  func.func @_img_conv_kernel(%arg0: i32, %arg1: memref<1x18x18x4xbf16, #tpu.memory_space<vmem>>, %arg2: memref<1x36x4xbf16, #tpu.memory_space<vmem>>, %arg3: memref<1x4xf32, #tpu.memory_space<vmem>>, %arg4: memref<1x256x4xf32, #tpu.memory_space<vmem>>) attributes {dimension_semantics = [#tpu.dimension_semantics<parallel>], iteration_bounds = array<i64: 2>, scalar_prefetch = 0 : i64, scratch_operands = 0 : i64, tpu.core_type = #tpu.core_type<tc>, window_params = [{transform_indices = @transform_0, window_bounds = array<i64: 1, 18, 18, 4>}, {transform_indices = @transform_1, window_bounds = array<i64: 1, 36, 4>}, {pipeline_mode = #tpu.pipeline_mode<synchronous>, transform_indices = @transform_2, window_bounds = array<i64: 1, 4>}, {transform_indices = @transform_3, window_bounds = array<i64: 1, 256, 4>}]} {
    %c0 = arith.constant 0 : index
    %c0_0 = arith.constant 0 : index
    %c0_1 = arith.constant 0 : index
    %c0_2 = arith.constant 0 : index
    %0 = vector.load %arg1[%c0, %c0_0, %c0_1, %c0_2] : memref<1x18x18x4xbf16, #tpu.memory_space<vmem>>, vector<1x18x18x4xbf16>
    %1 = vector.shape_cast %0 : vector<1x18x18x4xbf16> to vector<18x18x4xbf16>
    %2 = arith.extf %1 : vector<18x18x4xbf16> to vector<18x18x4xf32>
    %3 = vector.extract_strided_slice %2 {offsets = [0, 0, 0], sizes = [16, 16, 4], strides = [1, 1, 1]} : vector<18x18x4xf32> to vector<16x16x4xf32>
    %4 = vector.shape_cast %3 : vector<16x16x4xf32> to vector<256x4xf32>
    %5 = vector.extract_strided_slice %2 {offsets = [0, 1, 0], sizes = [16, 16, 4], strides = [1, 1, 1]} : vector<18x18x4xf32> to vector<16x16x4xf32>
    %6 = vector.shape_cast %5 : vector<16x16x4xf32> to vector<256x4xf32>
    %7 = vector.extract_strided_slice %2 {offsets = [0, 2, 0], sizes = [16, 16, 4], strides = [1, 1, 1]} : vector<18x18x4xf32> to vector<16x16x4xf32>
    %8 = vector.shape_cast %7 : vector<16x16x4xf32> to vector<256x4xf32>
    %9 = vector.extract_strided_slice %2 {offsets = [1, 0, 0], sizes = [16, 16, 4], strides = [1, 1, 1]} : vector<18x18x4xf32> to vector<16x16x4xf32>
    %10 = vector.shape_cast %9 : vector<16x16x4xf32> to vector<256x4xf32>
    %11 = vector.extract_strided_slice %2 {offsets = [1, 1, 0], sizes = [16, 16, 4], strides = [1, 1, 1]} : vector<18x18x4xf32> to vector<16x16x4xf32>
    %12 = vector.shape_cast %11 : vector<16x16x4xf32> to vector<256x4xf32>
    %13 = vector.extract_strided_slice %2 {offsets = [1, 2, 0], sizes = [16, 16, 4], strides = [1, 1, 1]} : vector<18x18x4xf32> to vector<16x16x4xf32>
    %14 = vector.shape_cast %13 : vector<16x16x4xf32> to vector<256x4xf32>
    %15 = vector.extract_strided_slice %2 {offsets = [2, 0, 0], sizes = [16, 16, 4], strides = [1, 1, 1]} : vector<18x18x4xf32> to vector<16x16x4xf32>
    %16 = vector.shape_cast %15 : vector<16x16x4xf32> to vector<256x4xf32>
    %17 = vector.extract_strided_slice %2 {offsets = [2, 1, 0], sizes = [16, 16, 4], strides = [1, 1, 1]} : vector<18x18x4xf32> to vector<16x16x4xf32>
    %18 = vector.shape_cast %17 : vector<16x16x4xf32> to vector<256x4xf32>
    %19 = vector.extract_strided_slice %2 {offsets = [2, 2, 0], sizes = [16, 16, 4], strides = [1, 1, 1]} : vector<18x18x4xf32> to vector<16x16x4xf32>
    %20 = vector.shape_cast %19 : vector<16x16x4xf32> to vector<256x4xf32>
    %21 = tpu.concatenate %4, %6, %8, %10, %12, %14, %16, %18, %20 in 1 : vector<256x4xf32>, vector<256x4xf32>, vector<256x4xf32>, vector<256x4xf32>, vector<256x4xf32>, vector<256x4xf32>, vector<256x4xf32>, vector<256x4xf32>, vector<256x4xf32> -> vector<256x36xf32>
    %22 = arith.truncf %21 : vector<256x36xf32> to vector<256x36xbf16>
    %c0_3 = arith.constant 0 : index
    %c0_4 = arith.constant 0 : index
    %c0_5 = arith.constant 0 : index
    %23 = vector.load %arg2[%c0_3, %c0_4, %c0_5] : memref<1x36x4xbf16, #tpu.memory_space<vmem>>, vector<1x36x4xbf16>
    %24 = vector.shape_cast %23 : vector<1x36x4xbf16> to vector<36x4xbf16>
    %cst = arith.constant dense<0.000000e+00> : vector<256x4xf32>
    %25 = tpu.matmul %22, %24, %cst {dimension_numbers = #tpu.dot_dimension_numbers<[1], [0], [0], [1], [0, 0, 1, 1], [], []>} : vector<256x36xbf16>, vector<36x4xbf16>, vector<256x4xf32> -> vector<256x4xf32>
    %c0_6 = arith.constant 0 : index
    %c0_7 = arith.constant 0 : index
    %26 = vector.load %arg3[%c0_6, %c0_7] : memref<1x4xf32, #tpu.memory_space<vmem>>, vector<1x4xf32>
    %27 = vector.broadcast %26 : vector<1x4xf32> to vector<256x4xf32>
    %28 = arith.addf %25, %27 : vector<256x4xf32>
    %c0_8 = arith.constant 0 : index
    %c0_9 = arith.constant 0 : index
    %c0_10 = arith.constant 0 : index
    %29 = vector.load %arg4[%c0_8, %c0_9, %c0_10] : memref<1x256x4xf32, #tpu.memory_space<vmem>>, vector<1x256x4xf32>
    %30 = vector.shape_cast %29 : vector<1x256x4xf32> to vector<256x4xf32>
    %31 = vector.shape_cast %28 : vector<256x4xf32> to vector<1x256x4xf32>
    tpu.vector_store %arg4[%c0_8, %c0_9, %c0_10], %31 {strides = array<i32>} : memref<1x256x4xf32, #tpu.memory_space<vmem>>, vector<1x256x4xf32>,
    return
  }
  func.func @transform_0(%arg0: i32) -> (i32, i32, i32, i32) {
    %c0_i32 = arith.constant 0 : i32
    %c0_i32_0 = arith.constant 0 : i32
    %c0_i32_1 = arith.constant 0 : i32
    %c0_i32_2 = arith.constant 0 : i32
    return %arg0, %c0_i32, %c0_i32_0, %c0_i32_1 : i32, i32, i32, i32
  }
  func.func @transform_1(%arg0: i32) -> (i32, i32, i32) {
    %c0_i32 = arith.constant 0 : i32
    %c0_i32_0 = arith.constant 0 : i32
    %c0_i32_1 = arith.constant 0 : i32
    return %arg0, %c0_i32, %c0_i32_0 : i32, i32, i32
  }
  func.func @transform_2(%arg0: i32) -> (i32, i32) {
    %c0_i32 = arith.constant 0 : i32
    %c0_i32_0 = arith.constant 0 : i32
    %c0_i32_1 = arith.constant 0 : i32
    return %c0_i32, %c0_i32_0 : i32, i32
  }
  func.func @transform_3(%arg0: i32) -> (i32, i32, i32) {
    %c0_i32 = arith.constant 0 : i32
    %c0_i32_0 = arith.constant 0 : i32
    %c0_i32_1 = arith.constant 0 : i32
    return %arg0, %c0_i32, %c0_i32_0 : i32, i32, i32
  }
}

</mosaic_0001>

<bundles_post_ra>
// kernel: _lambda_.2
= control target key start
LH: loop header
LB: loop body
LE: loop exit
PB: predicated region body
PF: predicated region fallthrough
CT: control target
= control target key end

     0   :  { %s1632_s9 = smov 0   ;;  %s2359_s0 = inlined_call_operand.vmem [shape: bf16[2,4,8,8,4], index: 0, kind: input, shape index: {}]   ;;  %s2360_s1 = inlined_call_operand.vmem [shape: f32[4,36,4], index: 1, kind: input, shape index: {}]   ;;  %s2361_s2 = inlined_call_operand.vmem [shape: f32[2,4,4], index: 2, kind: output, shape index: {}]  }
   0x1 LB: > { %s1342_s10 = sadd.s32 4294967295, %s1604_s9   ;;  %p1346_p0 = scmp.ge.s32.totalorder %s1604_s9, 1  ;;  %s1604_s9 = sphi %s1632_s9, %s12_s9  }
   0x2   : > { %p112_p1 = scmp.lt.s32.totalorder %s1604_s9, 3 }
   0x4   : > { %p113_p2 = pnand %p1346_p0, %p112_p1 }
   0x6   : > { %116 = sbr.rel (%p113_p2) target bundleno = 490 (0x1ea), region = 28 }
   0xd   : > { %p133_p3 = scmp.lt.s32.totalorder %s1342_s10, 1  ;;  %vm178_vm0 = vcmask 31744   ;;  %vm158_vm1 = vcmask 30720   ;;  %s1606_s15 = smov 4   ;;  %vm1615_vm2 = vmmov 0   ;;  %vm357_vm3 = vcmask 1043456  }
   0xe   : > { %s1607_s16 = smov 24   ;;  %s1608_s17 = smov 28   ;;  %vm334_vm4 = vcmask 64512   ;;  %vm336_vm5 = vcmask 97280   ;;  %vm340_vm6 = vcmask 162816   ;;  %vm338_vm7 = vcmask 130048  }
   0xf   : > { %s2379_s10 = smov (!%p133_p3, %s1342_s10), 1  ;;  %s1609_s18 = smov 12   ;;  %vm342_vm8 = vcmask 195584   ;;  %vm344_vm9 = vcmask 228352   ;;  %vm346_vm10 = vcmask 261120   ;;  %vm353_vm11 = vcmask 293888  }
  0x10   : > { %s1399_s11 = sshll.u32 %s2379_s10, 7  ;;  %s1610_s19 = smov 16   ;;  %vm1280_vm12 = vcmask 1040384   ;;  %vm1282_vm13 = vcmask 1041408   ;;  %vm1284_vm14 = vcmask 1042432   ;;  %vm1287_vm15 = vcmask 27648  }
  0x11   : > { %s1646_s14 = scalar_lea.vmem %s2359_s0, %s1399_s11  ;;  %s1611_s20 = smov 8  }
  0x12   : > { %v1467_v0 = vld [vmem:[%s1646_s14 + $0x20] sm:$0xff]   ;;  %v1468_v1 = vld [vmem:[%s1646_s14 + $0x28] sm:$0xff]   ;;  %v1469_v2 = vld [vmem:[%s1646_s14 + $0x30] sm:$0xff]   ;;  %s1612_s21 = smov 32   ;;  %s1613_s22 = smov 20  }
  0x13   : > { %v1651_v3 = vunpack.c.l.bf16 %v1467_v0  ;;  %v1653_v4 = vunpack.c.h.bf16 %v1467_v0  ;;  %v1655_v5 = vunpack.c.l.bf16 %v1468_v1  ;;  %v1657_v6 = vunpack.c.h.bf16 %v1468_v1  ;;  %v1470_v7 = vld [vmem:[%s1646_s14 + $0x38] sm:$0xff]   ;;  %v1401_v8 = vld [vmem:[%s1646_s14] sm:$0xff]   ;;  %v1464_v13 = vld [vmem:[%s1646_s14 + $0x8] sm:$0xff]   ;;  %s1349_s11 = sshll.u32 %s2379_s10, 2 }
  0x14   : > { %v1661_v9 = vunpack.c.l.bf16 %v1469_v2  ;;  %v1663_v10 = vunpack.c.h.bf16 %v1469_v2  ;;  %v1665_v11 = vunpack.c.l.bf16 %v1470_v7  ;;  %v1667_v12 = vunpack.c.l.bf16 %v1401_v8  ;;  %v1465_v14 = vld [vmem:[%s1646_s14 + $0x10] sm:$0xff]   ;;  %v1466_v19 = vld [vmem:[%s1646_s14 + $0x18] sm:$0xff]  }
  0x15   : > { %v467_v15 = vsel %vm178_vm0, %v1651_v3, 0.0  ;;  %v1675_v16 = vsel %vm178_vm0, %v1653_v4, 0.0  ;;  %v1679_v17 = vsel %vm178_vm0, %v1655_v5, 0.0  ;;  %v1683_v18 = vsel %vm178_vm0, %v1657_v6, 0.0 }
  0x16   : > { %v469_v20 = vadd.f32 %v1675_v16, %v467_v15  ;;  %v1689_v21 = vsel %vm178_vm0, %v1661_v9, 0.0  ;;  %v1693_v22 = vsel %vm178_vm0, %v1663_v10, 0.0  ;;  %v1697_v23 = vsel %vm178_vm0, %v1665_v11, 0.0 }
  0x17   : > { %v1699_v24 = vunpack.c.h.bf16 %v1401_v8  ;;  %v1701_v25 = vunpack.c.l.bf16 %v1464_v13  ;;  %v1703_v26 = vunpack.c.h.bf16 %v1464_v13  ;;  %v1705_v27 = vunpack.c.l.bf16 %v1465_v14 }
  0x18   : > { %v471_v28 = vadd.f32 %v1679_v17, %v469_v20  ;;  %v1708_v29 = vunpack.c.h.bf16 %v1465_v14  ;;  %v1710_v30 = vunpack.c.l.bf16 %v1466_v19  ;;  %v179_v31 = vsel %vm178_vm0, %v1667_v12, 0.0 }
  0x19   : > { %v180_v32 = vsel %vm178_vm0, %v1699_v24, 0.0  ;;  %v182_v33 = vsel %vm178_vm0, %v1701_v25, 0.0  ;;  %v184_v34 = vsel %vm178_vm0, %v1703_v26, 0.0  ;;  %v1722_v35 = vsel %vm178_vm0, %v1705_v27, 0.0 }
  0x1a   : > { %v473_v36 = vadd.f32 %v1683_v18, %v471_v28  ;;  %v181_v37 = vadd.f32 %v180_v32, %v179_v31  ;;  %v1727_v38 = vsel %vm178_vm0, %v1708_v29, 0.0  ;;  %v1731_v39 = vsel %vm178_vm0, %v1710_v30, 0.0 }
  0x1b   : > { %v1733_v40 = vunpack.c.h.bf16 %v1466_v19  ;;  %v160_v41 = vsel %vm158_vm1, %v1699_v24, 0.0  ;;  %v162_v42 = vsel %vm158_vm1, %v1701_v25, 0.0  ;;  %v164_v43 = vsel %vm158_vm1, %v1703_v26, 0.0 }
  0x1c   : > { %v475_v44 = vadd.f32 %v1689_v21, %v473_v36  ;;  %v183_v45 = vadd.f32 %v182_v33, %v181_v37  ;;  %v166_v46 = vsel %vm158_vm1, %v1705_v27, 0.0  ;;  %v168_v47 = vsel %vm158_vm1, %v1708_v29, 0.0 }
  0x1d   : > { %v170_v48 = vsel %vm158_vm1, %v1710_v30, 0.0  ;;  %v1750_v49 = vsel %vm158_vm1, %v1733_v40, 0.0  ;;  %v265_v50 = vadd.f32 %v162_v42, %v160_v41  ;;  %v159_v51 = vsel %vm158_vm1, %v1667_v12, 0.0 }
  0x1e   : > { %v477_v52 = vadd.f32 %v1693_v22, %v475_v44  ;;  %v185_v53 = vadd.f32 %v184_v34, %v183_v45  ;;  %v161_v54 = vadd.f32 %v160_v41, %v159_v51  ;;  %v1755_v55 = vunpack.c.h.bf16 %v1470_v7 }
  0x1f   : > { %v266_v56 = vadd.f32 %v265_v50, %v164_v43  ;;  %v448_v57 = vsel %vm158_vm1, %v1651_v3, 0.0  ;;  %v449_v58 = vsel %vm158_vm1, %v1653_v4, 0.0  ;;  %v451_v59 = vsel %vm158_vm1, %v1655_v5, 0.0 }
  0x20   : > { %v1764_v60 = vadd.f32 %v1697_v23, %v477_v52  ;;  %v187_v61 = vadd.f32 %v1722_v35, %v185_v53  ;;  %v163_v62 = vadd.f32 %v162_v42, %v161_v54  ;;  %v450_v63 = vadd.f32 %v449_v58, %v448_v57 }
  0x21   : > { %v267_v0 = vadd.f32 %v266_v56, %v166_v46  ;;  %v453_v1 = vsel %vm158_vm1, %v1657_v6, 0.0  ;;  %v455_v2 = vsel %vm158_vm1, %v1661_v9, 0.0  ;;  %v457_v7 = vsel %vm158_vm1, %v1663_v10, 0.0 }
  0x22   : > { %v480_v8 = vrot.slane %v1764_v60, 4  ;;  %v189_v13 = vadd.f32 %v1727_v38, %v187_v61  ;;  %v165_v14 = vadd.f32 %v164_v43, %v163_v62  ;;  %v452_v15 = vadd.f32 %v451_v59, %v450_v63 }
  0x23   : > { %v268_v19 = vadd.f32 %v267_v0, %v168_v47  ;;  %v459_v20 = vsel %vm158_vm1, %v1665_v11, 0.0  ;;  %v1779_v28 = vsel %vm158_vm1, %v1755_v55, 0.0  ;;  %v553_v31 = vadd.f32 %v451_v59, %v449_v58  ;;  %v1471_v59 = vld [vmem:[%s1646_s14 + $0x40] sm:$0xff]  }
  0x24   : > { %v481_v36 = vadd.f32 %v480_v8, %v1764_v60  ;;  %v1783_v37 = vadd.f32 %v1731_v39, %v189_v13  ;;  %v167_v41 = vadd.f32 %v166_v46, %v165_v14  ;;  %v454_v42 = vadd.f32 %v453_v1, %v452_v15 }
  0x25   : > { %v269_v44 = vadd.f32 %v268_v19, %v170_v48  ;;  %v554_v43 = vadd.f32 %v553_v31, %v453_v1  ;;  %v1787_v45 = vsel %vm178_vm0, %v1733_v40, 0.0  ;;  %v277_v50 = vadd.f32 %v182_v33, %v180_v32 }
  0x26   : > { %v482_v51 = vrot.slane %v481_v36, 2  ;;  %v192_v52 = vrot.slane %v1783_v37, 4  ;;  %v169_v53 = vadd.f32 %v168_v47, %v167_v41  ;;  %v456_v54 = vadd.f32 %v455_v2, %v454_v42 }
  0x27   : > { %v270_v56 = vadd.f32 %v269_v44, %v1750_v49  ;;  %v555_v57 = vadd.f32 %v554_v43, %v455_v2  ;;  %v278_v58 = vadd.f32 %v277_v50, %v184_v34  ;;  %v1793_v46 = vsel %vm178_vm0, %v1755_v55, 0.0  ;;  %v1472_v34 = vld [vmem:[%s1646_s14 + $0x48] sm:$0xff]   ;;  %v1818_v50 = vld [vmem:[%s1646_s14 + $0x58] sm:$0xff]  }
  0x28   : > { %v483_v61 = vadd.f32 %v482_v51, %v481_v36  ;;  %v193_v62 = vadd.f32 %v192_v52, %v1783_v37  ;;  %v1797_v32 = vadd.f32 %v170_v48, %v169_v53  ;;  %v458_v33 = vadd.f32 %v457_v7, %v456_v54 }
  0x29   : > { %v271_v63 = vrot.slane %v270_v56, 4  ;;  %v556_v0 = vadd.f32 %v555_v57, %v457_v7  ;;  %v279_v47 = vadd.f32 %v278_v58, %v1722_v35  ;;  %v565_v1 = vadd.f32 %v1679_v17, %v1675_v16  ;;  %v1473_v7 = vld [vmem:[%s1646_s14 + $0x50] sm:$0xff]  }
  0x2a   : > { %2368 = vst [vmem:[#allocation2_spill] sm:$0xff] %v1797_v32  ;;  %v484_v2 = vrot.slane %v483_v61, 1  ;;  %v194_v8 = vrot.slane %v193_v62, 2  ;;  %v1803_v13 = vadd.f32 %v459_v20, %v458_v33  ;;  %v1805_v14 = vunpack.c.l.bf16 %v1471_v59 }
  0x2b   : > { %v272_v15 = vadd.f32 %v271_v63, %v270_v56  ;;  %v557_v19 = vadd.f32 %v556_v0, %v459_v20  ;;  %v280_v48 = vadd.f32 %v279_v47, %v1727_v38  ;;  %v566_v31 = vadd.f32 %v565_v1, %v1683_v18  ;;  %v1475_v1 = vld [vmem:[%s1646_s14 + $0x60] sm:$0xff]  }
  0x2c   : > { %v485_v36 = vadd.f32 %v484_v2, %v483_v61  ;;  %v195_v35 = vadd.f32 %v194_v8, %v193_v62  ;;  %v1810_v41 = vunpack.c.h.bf16 %v1471_v59  ;;  %v1812_v16 = vunpack.c.l.bf16 %v1472_v34 }
  0x2d   : > { %v273_v17 = vrot.slane %v272_v15, 2  ;;  %v558_v42 = vadd.f32 %v557_v19, %v1779_v28  ;;  %v281_v44 = vadd.f32 %v280_v48, %v1731_v39  ;;  %v567_v43 = vadd.f32 %v566_v31, %v1689_v21 }
  0x2e   : > { %590 = vrot.lane.b32.xlu1 %v485_v36, %s1606_s15  ;;  %v196_v18 = vrot.slane %v195_v35, 1  ;;  %v1821_v38 = vunpack.c.h.bf16 %v1472_v34  ;;  %v1823_v20 = vunpack.c.l.bf16 %v1473_v7  ;;  %v1825_v51 = vunpack.c.h.bf16 %v1473_v7 }
  0x2f   : > { %v274_v52 = vadd.f32 %v273_v17, %v272_v15  ;;  %v559_v53 = vrot.slane %v558_v42, 4  ;;  %v282_v54 = vadd.f32 %v281_v44, %v1787_v45  ;;  %v568_v39 = vadd.f32 %v567_v43, %v1693_v22  ;;  %v1476_v15 = vld [vmem:[%s1646_s14 + $0x68] sm:$0xff]   ;;  %v1477_v44 = vld [vmem:[%s1646_s14 + $0x70] sm:$0xff]  }
  0x30   : > { %v197_v21 = vadd.f32 %v196_v18, %v195_v35  ;;  %v1830_v56 = vunpack.c.l.bf16 %v1818_v50  ;;  %v747_v57 = vsel %vm178_vm0, %v1805_v14, 0.0  ;;  %v1836_v58 = vsel %vm178_vm0, %v1810_v41, 0.0 }
  0x31   : > { %v275_v59 = vrot.slane %v274_v52, 1  ;;  %v560_v61 = vadd.f32 %v559_v53, %v558_v42  ;;  %v283_v62 = vrot.slane %v282_v54, 4  ;;  %v569_v33 = vadd.f32 %v568_v39, %v1697_v23 }
  0x32   : > { %302 = vrot.lane.b32.xlu0 %v197_v21, %s1606_s15  ;;  %v749_v22 = vadd.f32 %v1836_v58, %v747_v57  ;;  %v1843_v63 = vsel %vm178_vm0, %v1812_v16, 0.0  ;;  %v1847_v0 = vsel %vm178_vm0, %v1821_v38, 0.0  ;;  %v1851_v47 = vsel %vm178_vm0, %v1823_v20, 0.0 }
  0x33   : > { %v276_v34 = vadd.f32 %v275_v59, %v274_v52  ;;  %v561_v23 = vrot.slane %v560_v61, 2  ;;  %v284_v2 = vadd.f32 %v283_v62, %v282_v54  ;;  %v570_v8 = vadd.f32 %v569_v33, %v1793_v46  ;;  %v1877_v54 = vld [vmem:[%s1646_s14 + $0x78] sm:$0xff]   ;;  %s141_s14 = scalar_lea.vmem %s2361_s2, %s1349_s11 }
  0x34   : > { %v751_v19 = vadd.f32 %v1843_v63, %v749_v22  ;;  %v1859_v48 = vsel %vm178_vm0, %v1825_v51, 0.0  ;;  %v1863_v31 = vsel %vm178_vm0, %v1830_v56, 0.0  ;;  %v239_v7 = vadd.f32 %v1750_v49, %v1797_v32 }
  0x35   : > { %2369 = vst [vmem:[#allocation3_spill] sm:$0xff] %v1859_v48  ;;  %2370 = vst [vmem:[#allocation4_spill] sm:$0xff] %v1863_v31  ;;  %322 = vrot.lane.b32.xlu1 %v276_v34, %s1607_s16  ;;  %v562_v36 = vadd.f32 %v561_v23, %v560_v61  ;;  %v285_v35 = vrot.slane %v284_v2, 2  ;;  %v571_v17 = vrot.slane %v570_v8, 4  ;;  %v1868_v42 = vunpack.c.l.bf16 %v1475_v1 }
  0x36   : > { %v753_v43 = vadd.f32 %v1847_v0, %v751_v19  ;;  %v240_v18 = vrot.slane %v239_v7, 4  ;;  %v1872_v52 = vunpack.c.h.bf16 %v1475_v1  ;;  %v1874_v53 = vunpack.c.l.bf16 %v1476_v15 }
  0x37   : > { %v563_v39 = vrot.slane %v562_v36, 1  ;;  %v286_v49 = vadd.f32 %v285_v35, %v284_v2  ;;  %v572_v21 = vadd.f32 %v571_v17, %v570_v8  ;;  %v1879_v57 = vunpack.c.h.bf16 %v1476_v15 }
  0x38   : > { %v755_v59 = vadd.f32 %v1851_v47, %v753_v43  ;;  %v241_v61 = vadd.f32 %v240_v18, %v239_v7  ;;  %v1882_v62 = vunpack.c.l.bf16 %v1477_v44  ;;  %v1884_v33 = vunpack.c.h.bf16 %v1477_v44 }
  0x39   : > { %v564_v22 = vadd.f32 %v563_v39, %v562_v36  ;;  %v287_v34 = vrot.slane %v286_v49, 1  ;;  %v573_v1 = vrot.slane %v572_v21, 2  ;;  %v1887_v23 = vunpack.c.l.bf16 %v1877_v54 }
  0x3a   : > { %v757_v19 = vadd.f32 %v1859_v48, %v755_v59  ;;  %v242_v32 = vrot.slane %v241_v61, 2  ;;  %v1027_v2 = vsel %vm178_vm0, %v1868_v42, 0.0  ;;  %v1894_v8 = vsel %vm178_vm0, %v1872_v52, 0.0 }
  0x3b   : > { %2371 = vst [vmem:[#allocation5_spill] sm:$0xff] %v1894_v8  ;;  %610 = vrot.lane.b32.xlu0 %v564_v22, %s1607_s16  ;;  %v288_v15 = vadd.f32 %v287_v34, %v286_v49  ;;  %v574_v7 = vadd.f32 %v573_v1, %v572_v21  ;;  %v1029_v36 = vadd.f32 %v1894_v8, %v1027_v2  ;;  %v1900_v35 = vsel %vm178_vm0, %v1874_v53, 0.0 }
  0x3c   : > { %2372 = vst [vmem:[#allocation6_spill] sm:$0xff] %v1900_v35  ;;  %v1903_v17 = vadd.f32 %v1863_v31, %v757_v19  ;;  %v243_v44 = vadd.f32 %v242_v32, %v241_v61  ;;  %v1907_v43 = vsel %vm178_vm0, %v1879_v57, 0.0  ;;  %v1911_v18 = vsel %vm178_vm0, %v1882_v62, 0.0 }
  0x3d   : > { %326 = vrot.lane.b32.xlu1 %v288_v15, %s1608_s17  ;;  %v575_v39 = vrot.slane %v574_v7, 1  ;;  %v1031_v49 = vadd.f32 %v1900_v35, %v1029_v36  ;;  %v1917_v21 = vsel %vm178_vm0, %v1884_v33, 0.0  ;;  %v1921_v32 = vsel %vm178_vm0, %v1887_v23, 0.0 }
  0x3e   : > { %v760_v59 = vrot.slane %v1903_v17, 4  ;;  %v244_v61 = vrot.slane %v243_v44, 1  ;;  %v247_v22 = vadd.f32 %v1787_v45, %v1783_v37  ;;  %v205_v34 = vrot.slane %v1667_v12, 1 }
  0x3f   : > { %v576_v1 = vadd.f32 %v575_v39, %v574_v7  ;;  %v1033_v19 = vadd.f32 %v1907_v43, %v1031_v49  ;;  %v206_v2 = vrot.slane %v1699_v24, 1  ;;  %v207_v15 = vrot.slane %v1701_v25, 1 }
  0x40   : > { %v761_v36 = vadd.f32 %v760_v59, %v1903_v17  ;;  %v245_v35 = vadd.f32 %v244_v61, %v243_v44  ;;  %v248_v8 = vrot.slane %v247_v22, 4  ;;  %v208_v31 = vrot.slane %v1703_v26, 1 }
  0x41   : > { %614 = vrot.lane.b32.xlu0 %v576_v1, %s1608_s17  ;;  %v1035_v48 = vadd.f32 %v1911_v18, %v1033_v19  ;;  %v209_v37 = vrot.slane %v1705_v27, 1  ;;  %v210_v12 = vrot.slane %v1708_v29, 1  ;;  %v211_v45 = vrot.slane %v1710_v30, 1 }
  0x42   : > { %v762_v7 = vrot.slane %v761_v36, 2  ;;  %310 = vrot.lane.b32.xlu1 %v245_v35, %s1609_s18  ;;  %v249_v24 = vadd.f32 %v248_v8, %v247_v22  ;;  %v219_v25 = vsel %vm158_vm1, %v205_v34, 0.0  ;;  %v220_v44 = vsel %vm158_vm1, %v206_v2, 0.0 }
  0x43   : > { %v1037_v26 = vadd.f32 %v1917_v21, %v1035_v48  ;;  %v221_v39 = vadd.f32 %v220_v44, %v219_v25  ;;  %v222_v49 = vsel %vm158_vm1, %v207_v15, 0.0  ;;  %v224_v27 = vsel %vm158_vm1, %v208_v31, 0.0 }
  0x44   : > { %v763_v59 = vadd.f32 %v762_v7, %v761_v36  ;;  %v250_v29 = vrot.slane %v249_v24, 2  ;;  %v226_v30 = vsel %vm158_vm1, %v209_v37, 0.0  ;;  %v228_v61 = vsel %vm158_vm1, %v210_v12, 0.0 }
  0x45   : > { %v1946_v35 = vadd.f32 %v1921_v32, %v1037_v26  ;;  %v223_v8 = vadd.f32 %v222_v49, %v221_v39  ;;  %v230_v22 = vsel %vm158_vm1, %v211_v45, 0.0  ;;  %v255_v34 = vrot.slane %v1733_v40, 1 }
  0x46   : > { %v764_v48 = vrot.slane %v763_v59, 1  ;;  %v251_v1 = vadd.f32 %v250_v29, %v249_v24  ;;  %v289_v19 = vadd.f32 %v222_v49, %v220_v44  ;;  %v493_v2 = vrot.slane %v1651_v3, 1 }
  0x47   : > { %v1040_v31 = vrot.slane %v1946_v35, 4  ;;  %v225_v15 = vadd.f32 %v224_v27, %v223_v8  ;;  %v1953_v36 = vsel %vm158_vm1, %v255_v34, 0.0  ;;  %v494_v37 = vrot.slane %v1653_v4, 1 }
  0x48   : > { %v765_v12 = vadd.f32 %v764_v48, %v763_v59  ;;  %v252_v7 = vrot.slane %v251_v1, 1  ;;  %v290_v25 = vadd.f32 %v289_v19, %v224_v27  ;;  %v495_v45 = vrot.slane %v1655_v5, 1 }
  0x49   : > { %v1041_v40 = vadd.f32 %v1040_v31, %v1946_v35  ;;  %v227_v26 = vadd.f32 %v226_v30, %v225_v15  ;;  %v496_v24 = vrot.slane %v1657_v6, 1  ;;  %v497_v3 = vrot.slane %v1661_v9, 1 }
  0x4a   : > { %870 = vrot.lane.b32.xlu0 %v765_v12, %s1606_s15  ;;  %v253_v44 = vadd.f32 %v252_v7, %v251_v1  ;;  %v291_v39 = vadd.f32 %v290_v25, %v226_v30  ;;  %v498_v49 = vrot.slane %v1663_v10, 1  ;;  %v499_v4 = vrot.slane %v1665_v11, 1 }
  0x4b   : > { %v1042_v59 = vrot.slane %v1041_v40, 2  ;;  %v229_v29 = vadd.f32 %v228_v61, %v227_v26  ;;  %v507_v27 = vsel %vm158_vm1, %v493_v2, 0.0  ;;  %v508_v5 = vsel %vm158_vm1, %v494_v37, 0.0 }
  0x4c   : > { %314 = vrot.lane.b32.xlu1 %v253_v44, %s1610_s19  ;;  %v292_v6 = vadd.f32 %v291_v39, %v228_v61  ;;  %v509_v8 = vadd.f32 %v508_v5, %v507_v27  ;;  %v510_v9 = vsel %vm158_vm1, %v495_v45, 0.0  ;;  %v512_v34 = vsel %vm158_vm1, %v496_v24, 0.0 }
  0x4d   : > { %v1043_v30 = vadd.f32 %v1042_v59, %v1041_v40  ;;  %v1968_v48 = vadd.f32 %v230_v22, %v229_v29  ;;  %v514_v10 = vsel %vm158_vm1, %v497_v3, 0.0  ;;  %v516_v11 = vsel %vm158_vm1, %v498_v49, 0.0 }
  0x4e   : > { %v293_v1 = vadd.f32 %v292_v6, %v230_v22  ;;  %v511_v19 = vadd.f32 %v510_v9, %v509_v8  ;;  %v518_v2 = vsel %vm158_vm1, %v499_v4, 0.0  ;;  %v543_v31 = vrot.slane %v1755_v55, 1 }
  0x4f   : > { %v1044_v15 = vrot.slane %v1043_v30, 1  ;;  %v232_v61 = vrot.slane %v1968_v48, 4  ;;  %v577_v37 = vadd.f32 %v510_v9, %v508_v5  ;;  %v527_v12 = vadd.f32 %v1779_v28, %v1803_v13 }
  0x50   : > { %v294_v7 = vadd.f32 %v293_v1, %v1953_v36  ;;  %v513_v25 = vadd.f32 %v512_v34, %v511_v19  ;;  %v1979_v45 = vsel %vm158_vm1, %v543_v31, 0.0  ;;  %v773_v22 = vrot.slane %v1805_v14, 1 }
  0x51   : > { %v1045_v40 = vadd.f32 %v1044_v15, %v1043_v30  ;;  %v233_v26 = vadd.f32 %v232_v61, %v1968_v48  ;;  %v578_v24 = vadd.f32 %v577_v37, %v512_v34  ;;  %v528_v55 = vrot.slane %v527_v12, 4 }
  0x52   : > { %v295_v3 = vrot.slane %v294_v7, 4  ;;  %v515_v44 = vadd.f32 %v514_v10, %v513_v25  ;;  %v774_v39 = vrot.slane %v1810_v41, 1  ;;  %v775_v49 = vrot.slane %v1812_v16, 1 }
  0x53   : > { %1150 = vrot.lane.b32.xlu0 %v1045_v40, %s1606_s15  ;;  %v234_v28 = vrot.slane %v233_v26, 2  ;;  %v579_v4 = vadd.f32 %v578_v24, %v514_v10  ;;  %v529_v59 = vadd.f32 %v528_v55, %v527_v12  ;;  %v776_v29 = vrot.slane %v1821_v38, 1 }
  0x54   : > { %v296_v27 = vadd.f32 %v295_v3, %v294_v7  ;;  %v517_v5 = vadd.f32 %v516_v11, %v515_v44  ;;  %v777_v6 = vrot.slane %v1823_v20, 1  ;;  %v778_v8 = vrot.slane %v1825_v51, 1 }
  0x55   : > { %v235_v9 = vadd.f32 %v234_v28, %v233_v26  ;;  %v580_v34 = vadd.f32 %v579_v4, %v516_v11  ;;  %v530_v30 = vrot.slane %v529_v59, 2  ;;  %v779_v1 = vrot.slane %v1830_v56, 1 }
  0x56   : > { %v297_v19 = vrot.slane %v296_v27, 2  ;;  %v519_v31 = vadd.f32 %v518_v2, %v517_v5  ;;  %v787_v15 = vsel %vm158_vm1, %v773_v22, 0.0  ;;  %v1992_v10 = vsel %vm158_vm1, %v774_v39, 0.0 }
  0x57   : > { %v236_v61 = vrot.slane %v235_v9, 1  ;;  %v581_v37 = vadd.f32 %v580_v34, %v518_v2  ;;  %v531_v12 = vadd.f32 %v530_v30, %v529_v59  ;;  %v789_v7 = vadd.f32 %v1992_v10, %v787_v15 }
  0x58   : > { %v298_v25 = vadd.f32 %v297_v19, %v296_v27  ;;  %v520_v40 = vrot.slane %v519_v31, 4  ;;  %v1996_v26 = vsel %vm158_vm1, %v775_v49, 0.0  ;;  %v1999_v11 = vsel %vm158_vm1, %v776_v29, 0.0 }
  0x59   : > { %v237_v24 = vadd.f32 %v236_v61, %v235_v9  ;;  %v582_v55 = vadd.f32 %v581_v37, %v1979_v45  ;;  %v532_v22 = vrot.slane %v531_v12, 1  ;;  %v791_v3 = vadd.f32 %v1996_v26, %v789_v7 }
  0x5a   : > { %v299_v44 = vrot.slane %v298_v25, 1  ;;  %v521_v39 = vadd.f32 %v520_v40, %v519_v31  ;;  %v2004_v2 = vsel %vm158_vm1, %v777_v6, 0.0  ;;  %v2007_v28 = vsel %vm158_vm1, %v778_v8, 0.0 }
  0x5b   : > { %306 = vrot.lane.b32.xlu0 %v237_v24, %s1611_s20  ;;  %v583_v49 = vrot.slane %v582_v55, 4  ;;  %v533_v4 = vadd.f32 %v532_v22, %v531_v12  ;;  %v793_v59 = vadd.f32 %v1999_v11, %v791_v3  ;;  %v2012_v29 = vsel %vm158_vm1, %v779_v1, 0.0 }
  0x5c   : > { %v300_v27 = vadd.f32 %v299_v44, %v298_v25  ;;  %v522_v5 = vrot.slane %v521_v39, 2  ;;  %v535_v9 = vadd.f32 %v1793_v46, %v1764_v60  ;;  %v2017_v6 = vunpack.c.h.bf16 %v1818_v50 }
  0x5d   : > { %v584_v8 = vadd.f32 %v583_v49, %v582_v55  ;;  %v795_v34 = vadd.f32 %v2004_v2, %v793_v59  ;;  %v728_v30 = vsel %vm158_vm1, %v1805_v14, 0.0  ;;  %v2024_v19 = vsel %vm158_vm1, %v1810_v41, 0.0 }
  0x5e   : > { %330 = vrot.lane.b32.xlu1 %v300_v27, %s1612_s21  ;;  %v523_v1 = vadd.f32 %v522_v5, %v521_v39  ;;  %v536_v15 = vrot.slane %v535_v9, 4  ;;  %v730_v60 = vadd.f32 %v2024_v19, %v728_v30  ;;  %v2030_v46 = vsel %vm158_vm1, %v1812_v16, 0.0 }
  0x5f   : > { %v585_v50 = vrot.slane %v584_v8, 2  ;;  %v797_v61 = vadd.f32 %v2007_v28, %v795_v34  ;;  %v2035_v14 = vsel %vm158_vm1, %v1821_v38, 0.0  ;;  %v2039_v41 = vsel %vm158_vm1, %v1823_v20, 0.0 }
  0x60   : > { %v524_v37 = vrot.slane %v523_v1, 1  ;;  %v537_v12 = vadd.f32 %v536_v15, %v535_v9  ;;  %v732_v7 = vadd.f32 %v2030_v46, %v730_v60  ;;  %v2044_v25 = vsel %vm158_vm1, %v1825_v51, 0.0 }
  0x61   : > { %v586_v16 = vadd.f32 %v585_v50, %v584_v8  ;;  %v2047_v40 = vadd.f32 %v2012_v29, %v797_v61  ;;  %v2051_v38 = vsel %vm158_vm1, %v1830_v56, 0.0  ;;  %v2055_v20 = vsel %vm158_vm1, %v2017_v6, 0.0 }
  0x62   : > { %v525_v24 = vadd.f32 %v524_v37, %v523_v1  ;;  %v538_v55 = vrot.slane %v537_v12, 2  ;;  %v734_v22 = vadd.f32 %v2035_v14, %v732_v7  ;;  %v546_v3 = vadd.f32 %v1979_v45, %v519_v31 }
  0x63   : > { %v587_v51 = vrot.slane %v586_v16, 1  ;;  %v800_v44 = vrot.slane %v2047_v40, 4  ;;  %v258_v39 = vadd.f32 %v1953_v36, %v1968_v48  ;;  %v1053_v49 = vrot.slane %v1868_v42, 1 }
  0x64   : > { %594 = vrot.lane.b32.xlu0 %v525_v24, %s1611_s20  ;;  %v539_v56 = vadd.f32 %v538_v55, %v537_v12  ;;  %v736_v59 = vadd.f32 %v2039_v41, %v734_v22  ;;  %v547_v27 = vrot.slane %v546_v3, 4  ;;  %v1054_v5 = vrot.slane %v1872_v52, 1 }
  0x65   : > { %v588_v9 = vadd.f32 %v587_v51, %v586_v16  ;;  %v801_v8 = vadd.f32 %v800_v44, %v2047_v40  ;;  %v259_v45 = vrot.slane %v258_v39, 4  ;;  %v1055_v31 = vrot.slane %v1874_v53, 1 }
  0x66   : > { %v540_v34 = vrot.slane %v539_v56, 1  ;;  %v738_v30 = vadd.f32 %v2044_v25, %v736_v59  ;;  %v548_v36 = vadd.f32 %v547_v27, %v546_v3  ;;  %v1056_v48 = vrot.slane %v1879_v57, 1 }
  0x67   : > { %618 = vrot.lane.b32.xlu1 %v588_v9, %s1612_s21  ;;  %v802_v1 = vrot.slane %v801_v8, 2  ;;  %v260_v15 = vadd.f32 %v259_v45, %v258_v39  ;;  %v1057_v60 = vrot.slane %v1882_v62, 1  ;;  %v1058_v50 = vrot.slane %v1884_v33, 1 }
  0x68   : > { %598 = vrot.lane.b32.xlu0 %v533_v4, %s1609_s18  ;;  %v541_v61 = vadd.f32 %v540_v34, %v539_v56  ;;  %v2075_v37 = vadd.f32 %v2051_v38, %v738_v30  ;;  %v549_v12 = vrot.slane %v548_v36, 2  ;;  %v1059_v7 = vrot.slane %v1887_v23, 1 }
  0x69   : > { %v803_v16 = vadd.f32 %v802_v1, %v801_v8  ;;  %v261_v24 = vrot.slane %v260_v15, 2  ;;  %v1067_v55 = vsel %vm158_vm1, %v1053_v49, 0.0  ;;  %v2080_v22 = vsel %vm158_vm1, %v1054_v5, 0.0 }
  0x6a   : > { %v807_v3 = vadd.f32 %v2055_v20, %v2075_v37  ;;  %v550_v51 = vadd.f32 %v549_v12, %v548_v36  ;;  %v1069_v4 = vadd.f32 %v2080_v22, %v1067_v55  ;;  %v2086_v44 = vsel %vm158_vm1, %v1055_v31, 0.0 }
  0x6b   : > { %v804_v39 = vrot.slane %v803_v16, 1  ;;  %v262_v56 = vadd.f32 %v261_v24, %v260_v15  ;;  %v2089_v59 = vsel %vm158_vm1, %v1056_v48, 0.0  ;;  %v2092_v27 = vsel %vm158_vm1, %v1057_v60, 0.0 }
  0x6c   : > { %602 = vrot.lane.b32.xlu0 %v541_v61, %s1610_s19  ;;  %v808_v49 = vrot.slane %v807_v3, 4  ;;  %v551_v5 = vrot.slane %v550_v51, 1  ;;  %v1071_v9 = vadd.f32 %v2086_v44, %v1069_v4  ;;  %v2097_v8 = vsel %vm158_vm1, %v1058_v50, 0.0 }
  0x6d   : > { %v805_v45 = vadd.f32 %v804_v39, %v803_v16  ;;  %v263_v31 = vrot.slane %v262_v56, 1  ;;  %v2100_v34 = vsel %vm158_vm1, %v1059_v7, 0.0  ;;  %v2104_v30 = vsel %vm178_vm0, %v2017_v6, 0.0 }
  0x6e   : > { %v809_v36 = vadd.f32 %v808_v49, %v807_v3  ;;  %v552_v48 = vadd.f32 %v551_v5, %v550_v51  ;;  %v1073_v1 = vadd.f32 %v2089_v59, %v1071_v9  ;;  %v815_v15 = vadd.f32 %v2104_v30, %v1903_v17 }
  0x6f   : > { %874 = vrot.lane.b32.xlu1 %v805_v45, %s1611_s20  ;;  %v264_v60 = vadd.f32 %v263_v31, %v262_v56  ;;  %v1463_v50 = vunpack.c.h.bf16 %v1877_v54  ;;  %v1008_v61 = vsel %vm158_vm1, %v1868_v42, 0.0  ;;  %v1009_v12 = vsel %vm158_vm1, %v1872_v52, 0.0 }
  0x70   : > { %v810_v7 = vrot.slane %v809_v36, 2  ;;  %606 = vrot.lane.b32.xlu0 %v552_v48, %s1613_s22  ;;  %v1075_v16 = vadd.f32 %v2092_v27, %v1073_v1  ;;  %v816_v24 = vrot.slane %v815_v15, 4  ;;  %v1010_v55 = vadd.f32 %v1009_v12, %v1008_v61 }
  0x71   : > { %v1011_v17 = vsel %vm158_vm1, %v1874_v53, 0.0  ;;  %v1013_v54 = vsel %vm158_vm1, %v1879_v57, 0.0  ;;  %v1015_v42 = vsel %vm158_vm1, %v1882_v62, 0.0  ;;  %v2125_v52 = vsel %vm158_vm1, %v1884_v33, 0.0 }
  0x72   : > { %v811_v3 = vadd.f32 %v810_v7, %v809_v36  ;;  %v1077_v51 = vadd.f32 %v2097_v8, %v1075_v16  ;;  %v817_v4 = vadd.f32 %v816_v24, %v815_v15  ;;  %v1012_v39 = vadd.f32 %v1011_v17, %v1010_v55 }
  0x73   : > { %v2130_v56 = vsel %vm158_vm1, %v1887_v23, 0.0  ;;  %v2133_v53 = vsel %vm158_vm1, %v1463_v50, 0.0  ;;  %v823_v57 = vrot.slane %v2017_v6, 1  ;;  %v2137_v62 = vsel %vm178_vm0, %v1463_v50, 0.0 }
  0x74   : > { %v812_v49 = vrot.slane %v811_v3, 1  ;;  %v1079_v33 = vadd.f32 %v2100_v34, %v1077_v51  ;;  %v818_v5 = vrot.slane %v817_v4, 2  ;;  %v1014_v9 = vadd.f32 %v1013_v54, %v1012_v39 }
  0x75   : > { %v2141_v45 = vsel %vm158_vm1, %v823_v57, 0.0  ;;  %v1095_v23 = vadd.f32 %v2137_v62, %v1946_v35  ;;  %v833_v31 = vadd.f32 %v2030_v46, %v2024_v19  ;;  %v1103_v36 = vrot.slane %v1463_v50, 1 }
  0x76   : > { %v813_v48 = vadd.f32 %v812_v49, %v811_v3  ;;  %v1080_v6 = vrot.slane %v1079_v33, 4  ;;  %v819_v1 = vadd.f32 %v818_v5, %v817_v4  ;;  %v1016_v15 = vadd.f32 %v1015_v42, %v1014_v9 }
  0x77   : > { %v826_v61 = vadd.f32 %v2141_v45, %v2047_v40  ;;  %v1096_v7 = vrot.slane %v1095_v23, 4  ;;  %v834_v16 = vadd.f32 %v833_v31, %v2035_v14  ;;  %v2151_v24 = vsel %vm158_vm1, %v1103_v36, 0.0 }
  0x78   : > { %878 = vrot.lane.b32.xlu1 %v813_v48, %s1609_s18  ;;  %v1081_v35 = vadd.f32 %v1080_v6, %v1079_v33  ;;  %v820_v55 = vrot.slane %v819_v1, 1  ;;  %v1018_v19 = vadd.f32 %v2125_v52, %v1016_v15  ;;  %v1106_v46 = vadd.f32 %v2151_v24, %v1079_v33 }
  0x79   : > { %v827_v50 = vrot.slane %v826_v61, 4  ;;  %v1097_v3 = vadd.f32 %v1096_v7, %v1095_v23  ;;  %v835_v51 = vadd.f32 %v834_v16, %v2039_v41  ;;  %v845_v40 = vadd.f32 %v1843_v63, %v1836_v58 }
  0x7a   : > { %v1082_v4 = vrot.slane %v1081_v35, 2  ;;  %v2160_v14 = vadd.f32 %v2130_v56, %v1018_v19  ;;  %v1107_v39 = vrot.slane %v1106_v46, 4  ;;  %v821_v57 = vadd.f32 %v820_v55, %v819_v1 }
  0x7b   : > { %v828_v49 = vadd.f32 %v827_v50, %v826_v61  ;;  %v836_v5 = vadd.f32 %v835_v51, %v2044_v25  ;;  %v846_v9 = vadd.f32 %v845_v40, %v1847_v0  ;;  %v1098_v23 = vrot.slane %v1097_v3, 2  ;;  %v2373_v61 = vld [vmem:[#allocation3_spill] sm:$0xff] }
  0x7c   : > { %318 = vrot.lane.b32.xlu1 %v264_v60, %s1613_s22  ;;  %v1083_v33 = vadd.f32 %v1082_v4, %v1081_v35  ;;  %v1087_v41 = vadd.f32 %v2133_v53, %v2160_v14  ;;  %v1113_v31 = vadd.f32 %v1011_v17, %v1009_v12  ;;  %v1108_v1 = vadd.f32 %v1107_v39, %v1106_v46  ;;  %v2375_v4 = vld [vmem:[#allocation5_spill] sm:$0xff] }
  0x7d   : > { %v829_v58 = vrot.slane %v828_v49, 2  ;;  %v837_v63 = vadd.f32 %v836_v5, %v2051_v38  ;;  %v847_v36 = vadd.f32 %v846_v9, %v1851_v47  ;;  %v1099_v35 = vadd.f32 %v1098_v23, %v1097_v3  ;;  %v2374_v38 = vld [vmem:[#allocation4_spill] sm:$0xff]  ;;  %v2376_v3 = vld [vmem:[#allocation6_spill] sm:$0xff] }
  0x7e   : > { %v1084_v48 = vrot.slane %v1083_v33, 1  ;;  %v1088_v6 = vrot.slane %v1087_v41, 4  ;;  %v1114_v15 = vadd.f32 %v1113_v31, %v1013_v54  ;;  %v1109_v46 = vrot.slane %v1108_v1, 2 }
  0x7f   : > { %v830_v25 = vadd.f32 %v829_v58, %v828_v49  ;;  %v838_v0 = vadd.f32 %v837_v63, %v2055_v20  ;;  %v848_v60 = vadd.f32 %v847_v36, %v2373_v61  ;;  %v857_v20 = vadd.f32 %v1996_v26, %v1992_v10 }
  0x80   : > { %v1085_v7 = vadd.f32 %v1084_v48, %v1083_v33  ;;  %882 = vrot.lane.b32.xlu1 %v821_v57, %s1610_s19  ;;  %v1089_v16 = vadd.f32 %v1088_v6, %v1087_v41  ;;  %v1115_v12 = vadd.f32 %v1114_v15, %v1015_v42  ;;  %v1125_v42 = vadd.f32 %v2376_v3, %v2375_v4  ;;  %v351_v3 = vld [vmem:[%s2360_s1 + $0x18] sm:$0xff] }
  0x81   : > { %v831_v17 = vrot.slane %v830_v25, 1  ;;  %v839_v55 = vrot.slane %v838_v0, 4  ;;  %v849_v19 = vadd.f32 %v848_v60, %v2374_v38  ;;  %v1100_v57 = vrot.slane %v1099_v35, 1 }
  0x82   : > { %1154 = vrot.lane.b32.xlu0 %v1085_v7, %s1611_s20  ;;  %v1090_v47 = vrot.slane %v1089_v16, 2  ;;  %v1116_v54 = vadd.f32 %v1115_v12, %v2125_v52  ;;  %v858_v5 = vadd.f32 %v857_v20, %v1999_v11  ;;  %v1126_v33 = vadd.f32 %v1125_v42, %v1907_v43  ;;  %v1362_v42 = vld [vmem:[%s2360_s1 + $0x38] sm:$0xff] }
  0x83   : > { %v832_v50 = vadd.f32 %v831_v17, %v830_v25  ;;  %v840_v51 = vadd.f32 %v839_v55, %v838_v0  ;;  %v850_v40 = vadd.f32 %v849_v19, %v2104_v30  ;;  %v1137_v10 = vadd.f32 %v2086_v44, %v2080_v22 }
  0x84   : > { %v1091_v39 = vadd.f32 %v1090_v47, %v1089_v16  ;;  %v1117_v49 = vadd.f32 %v1116_v54, %v2130_v56  ;;  %v1110_v30 = vadd.f32 %v1109_v46, %v1108_v1  ;;  %v859_v23 = vadd.f32 %v858_v5, %v2004_v2  ;;  %v1360_v46 = vld [vmem:[%s2360_s1 + $0x28] sm:$0xff]  ;;  %v1361_v54 = vld [vmem:[%s2360_s1 + $0x30] sm:$0xff] }
  0x85   : > { %886 = vrot.lane.b32.xlu1 %v832_v50, %s1613_s22  ;;  %v841_v9 = vrot.slane %v840_v51, 2  ;;  %v851_v52 = vrot.slane %v850_v40, 4  ;;  %v1127_v56 = vadd.f32 %v1126_v33, %v1911_v18  ;;  %v1138_v11 = vadd.f32 %v1137_v10, %v2089_v59  ;;  %v350_v50 = vld [vmem:[%s2360_s1 + $0x10] sm:$0xff] }
  0x86   : > { %v1092_v26 = vrot.slane %v1091_v39, 1  ;;  %v1118_v41 = vadd.f32 %v1117_v49, %v2133_v53  ;;  %v860_v48 = vadd.f32 %v859_v23, %v2007_v28  ;;  %v1101_v53 = vadd.f32 %v1100_v57, %v1099_v35 }
  0x87   : > { %v842_v31 = vadd.f32 %v841_v9, %v840_v51  ;;  %v852_v58 = vadd.f32 %v851_v52, %v850_v40  ;;  %v1128_v22 = vadd.f32 %v1127_v56, %v1917_v21  ;;  %v1139_v44 = vadd.f32 %v1138_v11, %v2092_v27  ;;  %v1364_v56 = vld [vmem:[%s2360_s1 + $0x48] sm:$0xf] }
  0x88   : > { %v1093_v63 = vadd.f32 %v1092_v26, %v1091_v39  ;;  %v1119_v36 = vrot.slane %v1118_v41, 4  ;;  %v1111_v2 = vrot.slane %v1110_v30, 1  ;;  %v861_v15 = vadd.f32 %v860_v48, %v2012_v29  ;;  %v1363_v39 = vld [vmem:[%s2360_s1 + $0x40] sm:$0xff] }
  0x89   : > { %v843_v43 = vrot.slane %v842_v31, 1  ;;  %v853_v6 = vrot.slane %v852_v58, 2  ;;  %v1129_v59 = vadd.f32 %v1128_v22, %v1921_v32  ;;  %v1140_v0 = vadd.f32 %v1139_v44, %v2097_v8 }
  0x8a   : > { %1158 = vrot.lane.b32.xlu0 %v1093_v63, %s1609_s18  ;;  %v1120_v1 = vadd.f32 %v1119_v36, %v1118_v41  ;;  %v862_v61 = vadd.f32 %v861_v15, %v2141_v45  ;;  %v1112_v7 = vadd.f32 %v1111_v2, %v1110_v30  ;;  %v1614_v4 = vmov 0.0|0.0  }
  0x8b   : > { %v844_v18 = vadd.f32 %v843_v43, %v842_v31  ;;  %v854_v25 = vadd.f32 %v853_v6, %v852_v58  ;;  %v1130_v27 = vadd.f32 %v1129_v59, %v2137_v62  ;;  %v1141_v60 = vadd.f32 %v1140_v0, %v2100_v34  ;;  %v348_v34 = vld [vmem:[%s2360_s1] sm:$0xff]  ;;  %1555 = vmatprep.subr.bf16.mxu0 %v1614_v4 }
  0x8c   : > { %v1121_v28 = vrot.slane %v1120_v1, 2  ;;  %v863_v16 = vrot.slane %v862_v61, 4  ;;  %1561 = vmatprep.subr.bf16.mxu1 %v1614_v4  ;;  %v1562_v5 = vpack.c.bf16 %v1361_v54, %v1360_v46  ;;  %v1559_v10 = vpack.c.bf16 %v351_v3, %v350_v50  ;;  %v352_v58 = vld [vmem:[%s2360_s1 + $0x20] sm:$0xf]  ;;  %v1392_v50 = vld [vmem:[%s2360_s1 + $0x88] sm:$0xff] }
  0x8d   : > { %890 = vrot.lane.b32.xlu1 %v844_v18, %s1607_s16  ;;  %v855_v21 = vrot.slane %v854_v25, 1  ;;  %v1131_v12 = vrot.slane %v1130_v27, 4  ;;  %v1142_v32 = vadd.f32 %v1141_v60, %v2151_v24  ;;  %v349_v24 = vld [vmem:[%s2360_s1 + $0x8] sm:$0xff]  ;;  %v1565_v26 = vpack.c.bf16 %v1363_v39, %v1362_v42  ;;  %v2377_v18 = vld [vmem:[#allocation2_spill] sm:$0xff] }
  0x8e   : > { %1162 = vrot.lane.b32.xlu0 %v1101_v53, %s1610_s19  ;;  %v1122_v29 = vadd.f32 %v1121_v28, %v1120_v1  ;;  %v864_v17 = vadd.f32 %v863_v16, %v862_v61  ;;  %v1556_v49 = vpack.c.bf16 %v349_v24, %v348_v34  ;;  %1563 = vmatpush3.bf16.msra.mxu1 %v1562_v5  ;;  %v1616_v31 = vmov 0.0   ;;  %v1375_v5 = vld [vmem:[%s2360_s1 + $0x50] sm:$0xff] }
  0x8f   : > { %v856_v35 = vadd.f32 %v855_v21, %v854_v25  ;;  %v1132_v45 = vadd.f32 %v1131_v12, %v1130_v27  ;;  %v1143_v55 = vrot.slane %v1142_v32, 4  ;;  %1564 = vmatprep.subr.bf16.mxu1 %v1614_v4  ;;  %1513 = vmatprep.mubr.msk.f32.mxu0 %vm1615_vm2, %v1616_v31  ;;  %v461_v44 = vrot.slane %v1803_v13, 4 }
  0x90   : > { %v1123_v8 = vrot.slane %v1122_v29, 1  ;;  %v865_v38 = vrot.slane %v864_v17, 2  ;;  %1557 = vmatpush3.bf16.msra.mxu0 %v1556_v49  ;;  %1526 = vmatprep.mubr.msk.f32.mxu1 %vm1615_vm2, %v1616_v31  ;;  %v172_v25 = vrot.slane %v2377_v18, 4 }
  0x91   : > { %894 = vrot.lane.b32.xlu1 %v856_v35, %s1608_s17  ;;  %v1133_v19 = vrot.slane %v1132_v45, 2  ;;  %v1144_v47 = vadd.f32 %v1143_v55, %v1142_v32  ;;  %1558 = vmatprep.subr.bf16.mxu0 %v1614_v4  ;;  %v462_v2 = vadd.f32 %v461_v44, %v1803_v13  ;;  %v1390_v55 = vld [vmem:[%s2360_s1 + $0x78] sm:$0xff] }
  0x92   : > { %1166 = vrot.lane.b32.xlu0 %v1112_v7, %s1613_s22  ;;  %v1124_v62 = vadd.f32 %v1123_v8, %v1122_v29  ;;  %v866_v20 = vadd.f32 %v865_v38, %v864_v17  ;;  %1566 = vmatpush3.bf16.msra.mxu1 %v1565_v26  ;;  %v173_v61 = vadd.f32 %v172_v25, %v2377_v18 }
  0x93   : > { %v1134_v51 = vadd.f32 %v1133_v19, %v1132_v45  ;;  %v1145_v40 = vrot.slane %v1144_v47, 2  ;;  %1524 = vmatprep.subr.mxu1 %v1616_v31  ;;  %v463_v15 = vrot.slane %v462_v2, 2 }
  0x94   : > { %v867_v57 = vrot.slane %v866_v20, 1  ;;  %1560 = vmatpush3.bf16.msra.mxu0 %v1559_v10  ;;  %v174_v60 = vrot.slane %v173_v61, 2 }
  0x95   : > { %v1135_v9 = vrot.slane %v1134_v51, 1  ;;  %v1146_v52 = vadd.f32 %v1145_v40, %v1144_v47  ;;  %1511 = vmatprep.subr.mxu0 %v1616_v31  ;;  %v464_v28 = vadd.f32 %v463_v15, %v462_v2 }
  0x96   : > { %1170 = vrot.lane.b32.xlu0 %v1124_v62, %s1607_s16  ;;  %v868_v33 = vadd.f32 %v867_v57, %v866_v20  ;;  %1525 = vmatpush3.msk.msra.mxu1 %vm357_vm3, %v1364_v56  ;;  %v175_v35 = vadd.f32 %v174_v60, %v173_v61  ;;  %v1391_v62 = vld [vmem:[%s2360_s1 + $0x80] sm:$0xff] }
  0x97   : > { %v1136_v30 = vadd.f32 %v1135_v9, %v1134_v51  ;;  %v1147_v41 = vrot.slane %v1146_v52, 1  ;;  %1573 = vmatprep.subr.bf16.mxu1 %v1614_v4  ;;  %v465_v27 = vrot.slane %v464_v28, 1  ;;  %v1574_v54 = vpack.c.bf16 %v1391_v62, %v1390_v55  ;;  %v1393_v51 = vld [vmem:[%s2360_s1 + $0x90] sm:$0xff]  ;;  %v1376_v9 = vld [vmem:[%s2360_s1 + $0x58] sm:$0xff] }
  0x98   : > { %898 = vrot.lane.b32.xlu1 %v868_v33, %s1612_s21  ;;  %1512 = vmatpush3.msk.msra.mxu0 %vm357_vm3, %v352_v58  ;;  %v176_v8 = vrot.slane %v175_v35, 1  ;;  %v1577_v39 = vpack.c.bf16 %v1393_v51, %v1392_v50  ;;  %v741_v33 = vrot.slane %v2075_v37, 4  ;;  %v1568_v58 = vpack.c.bf16 %v1376_v9, %v1375_v5 }
  0x99   : > { %v1148_v23 = vadd.f32 %v1147_v41, %v1146_v52  ;;  %1567 = vmatprep.subr.bf16.mxu0 %v1614_v4  ;;  %v466_v16 = vadd.f32 %v465_v27, %v464_v28  ;;  %v1394_v52 = vld [vmem:[%s2360_s1 + $0x98] sm:$0xf]  ;;  %v1021_v41 = vrot.slane %v2160_v14, 4 }
  0x9a   : > { %1174 = vrot.lane.b32.xlu0 %v1136_v30, %s1608_s17  ;;  %v177_v19 = vadd.f32 %v176_v8, %v175_v35 }
  0x9c   : > { %1178 = vrot.lane.b32.xlu1 %v1148_v23, %s1612_s21 }
  0xa0   : > { %v591_v36 = vpop.permute.xlu1 %590 }
  0xa1   : > { %v621_v13 = vsel %vm178_vm0, %v466_v16, %v591_v36  ;;  %v742_v36 = vadd.f32 %v741_v33, %v2075_v37  ;;  %v1379_v37 = vld [vmem:[%s2360_s1 + $0x70] sm:$0xf] }
  0xa4   : > { %v303_v11 = vpop.permute.xlu0 %302 }
  0xa5   : > { %v333_v3 = vsel %vm178_vm0, %v177_v19, %v303_v11  ;;  %v1377_v11 = vld [vmem:[%s2360_s1 + $0x60] sm:$0xff] }
  0xa7   : > { %v2253_v43 = vpop.permute.xlu1 %322 }
  0xad   : > { %v611_v63 = vpop.permute.xlu0 %610 }
  0xaf   : > { %v2257_v22 = vpop.permute.xlu1 %326 }
  0xb3   : > { %v615_v48 = vpop.permute.xlu0 %614 }
  0xb4   : > { %v311_v1 = vpop.permute.xlu1 %310 }
  0xbc   : > { %v2255_v6 = vpop.permute.xlu0 %870 }
  0xbe   : > { %v315_v0 = vpop.permute.xlu1 %314 }
  0xc5   : > { %v2260_v53 = vpop.permute.xlu0 %1150 }
  0xcd   : > { %v307_v59 = vpop.permute.xlu0 %306 }
  0xce   : > { %v335_v42 = vsel %vm334_vm4, %v333_v3, %v307_v59 }
  0xcf   : > { %v337_v49 = vsel %vm336_vm5, %v335_v42, %v311_v1 }
  0xd0   : > { %v331_v7 = vpop.permute.xlu1 %330  ;;  %v339_v26 = vsel %vm338_vm7, %v337_v49, %v315_v0 }
  0xd6   : > { %v595_v21 = vpop.permute.xlu0 %594 }
  0xd7   : > { %v622_v17 = vsel %vm334_vm4, %v621_v13, %v595_v21 }
  0xd9   : > { %v619_v12 = vpop.permute.xlu1 %618 }
  0xda   : > { %v599_v29 = vpop.permute.xlu0 %598 }
  0xdb   : > { %v623_v45 = vsel %vm336_vm5, %v622_v17, %v599_v29 }
  0xde   : > { %v603_v32 = vpop.permute.xlu0 %602 }
  0xdf   : > { %v624_v38 = vsel %vm338_vm7, %v623_v45, %v603_v32 }
  0xe1   : > { %v2276_v24 = vpop.permute.xlu1 %874 }
  0xe2   : > { %v607_v34 = vpop.permute.xlu0 %606 }
  0xe3   : > { %v625_v47 = vsel %vm340_vm6, %v624_v38, %v607_v34 }
  0xe4   : > { %v626_v46 = vsel %vm342_vm8, %v625_v47, %v611_v63  ;;  %v1378_v63 = vld [vmem:[%s2360_s1 + $0x68] sm:$0xff] }
  0xe5   : > { %v627_v20 = vsel %vm344_vm9, %v626_v46, %v615_v48  ;;  %v1571_v2 = vpack.c.bf16 %v1378_v63, %v1377_v11 }
  0xe6   : > { %v628_v40 = vsel %vm346_vm10, %v627_v20, %v619_v12 }
  0xe7   : > { %1527 = vmatmul.mubr.msk.f32.vlgmr.msra.gmra.mrb[0].mxu1 %vm353_vm11, %v628_v40 }
  0xe8   : > { %1575 = vmatpush3.bf16.msra.mxu1 %v1574_v54  ;;  %1552 = vmatprep.mubr.msk.f32.mxu1 %vm1615_vm2, %v1616_v31 }
  0xe9   : > { %1576 = vmatprep.subr.bf16.mxu1 %v1614_v4 }
  0xea   : > { %v879_v57 = vpop.permute.xlu1 %878 }
  0xec   : > { %1578 = vmatpush3.bf16.msra.mxu1 %v1577_v39 }
  0xed   : > { %1550 = vmatprep.subr.mxu1 %v1616_v31 }
  0xee   : > { %v319_v10 = vpop.permute.xlu1 %318 }
  0xef   : > { %v341_v30 = vsel %vm340_vm6, %v339_v26, %v319_v10 }
  0xf0   : > { %v343_v23 = vsel %vm342_vm8, %v341_v30, %v2253_v43  ;;  %1551 = vmatpush3.msk.msra.mxu1 %vm357_vm3, %v1394_v52  ;;  %v1022_v43 = vadd.f32 %v1021_v41, %v2160_v14 }
  0xf1   : > { %v345_v56 = vsel %vm344_vm9, %v343_v23, %v2257_v22  ;;  %v743_v22 = vrot.slane %v742_v36, 2 }
  0xf2   : > { %v347_v48 = vsel %vm346_vm10, %v345_v56, %v331_v7  ;;  %v883_v44 = vpop.permute.xlu1 %882  ;;  %v1023_v15 = vrot.slane %v1022_v43, 2 }
  0xf3   : > { %1514 = vmatmul.mubr.msk.f32.vlgmr.msra.gmra.mrb[0].mxu0 %vm353_vm11, %v347_v48  ;;  %v744_v18 = vadd.f32 %v743_v22, %v742_v36 }
  0xf4   : > { %1569 = vmatpush3.bf16.msra.mxu0 %v1568_v58  ;;  %1539 = vmatprep.mubr.msk.f32.mxu0 %vm1615_vm2, %v1616_v31  ;;  %v1155_v1 = vpop.permute.xlu0 %1154  ;;  %v1024_v25 = vadd.f32 %v1023_v15, %v1022_v43 }
  0xf5   : > { %1570 = vmatprep.subr.bf16.mxu0 %v1614_v4  ;;  %v745_v0 = vrot.slane %v744_v18, 1 }
  0xf6   : > { %v1025_v28 = vrot.slane %v1024_v25, 1 }
  0xf7   : > { %v887_v14 = vpop.permute.xlu1 %886  ;;  %v746_v21 = vadd.f32 %v745_v0, %v744_v18 }
  0xf8   : > { %1572 = vmatpush3.bf16.msra.mxu0 %v1571_v2  ;;  %v1026_v27 = vadd.f32 %v1025_v28, %v1024_v25 }
  0xf9   : > { %1537 = vmatprep.subr.mxu0 %v1616_v31  ;;  %v901_v31 = vsel %vm178_vm0, %v746_v21, %v2255_v6 }
  0xfa   : > { %v902_v29 = vsel %vm334_vm4, %v901_v31, %v2276_v24  ;;  %v1181_v16 = vsel %vm178_vm0, %v1026_v27, %v2260_v53 }
  0xfb   : > { %v903_v35 = vsel %vm336_vm5, %v902_v29, %v879_v57  ;;  %v1182_v32 = vsel %vm334_vm4, %v1181_v16, %v1155_v1 }
  0xfc   : > { %v1159_v59 = vpop.permute.xlu0 %1158  ;;  %1538 = vmatpush3.msk.msra.mxu0 %vm357_vm3, %v1379_v37  ;;  %v904_v13 = vsel %vm338_vm7, %v903_v35, %v883_v44 }
  0xfd   : > { %v1183_v8 = vsel %vm336_vm5, %v1182_v32, %v1159_v59  ;;  %v905_v17 = vsel %vm340_vm6, %v904_v13, %v887_v14 }
  0xff   : > { %v891_v4 = vpop.permute.xlu1 %890 }
 0x100   : > { %v1163_v61 = vpop.permute.xlu0 %1162  ;;  %v906_v45 = vsel %vm342_vm8, %v905_v17, %v891_v4 }
 0x101   : > { %v1184_v6 = vsel %vm338_vm7, %v1183_v8, %v1163_v61 }
 0x103   : > { %v895_v7 = vpop.permute.xlu1 %894 }
 0x104   : > { %v1167_v60 = vpop.permute.xlu0 %1166  ;;  %v907_v62 = vsel %vm344_vm9, %v906_v45, %v895_v7 }
 0x105   : > { %v1185_v55 = vsel %vm340_vm6, %v1184_v6, %v1167_v60 }
 0x108   : > { %v1171_v12 = vpop.permute.xlu0 %1170 }
 0x109   : > { %v1186_v38 = vsel %vm342_vm8, %v1185_v55, %v1171_v12 }
 0x10a   : > { %v899_v53 = vpop.permute.xlu1 %898 }
 0x10b   : > { %v908_v34 = vsel %vm346_vm10, %v907_v62, %v899_v53 }
 0x10c   : > { %v1175_v19 = vpop.permute.xlu0 %1174  ;;  %1540 = vmatmul.mubr.msk.f32.vlgmr.msra.gmra.mrb[2].mxu0 %vm353_vm11, %v908_v34 }
 0x10d   : > { %v1187_v47 = vsel %vm344_vm9, %v1186_v38, %v1175_v19 }
 0x10e   : > { %v1179_v24 = vpop.permute.xlu1 %1178 }
 0x10f   : > { %v1188_v46 = vsel %vm346_vm10, %v1187_v47, %v1179_v24 }
 0x110   : > { %1553 = vmatmul.mubr.msk.f32.vlgmr.msra.gmra.mrb[2].mxu1 %vm353_vm11, %v1188_v46 }
 0x1ba   : > { %v707_v54 = vpop.f32.mrb[0].mxu1 }
 0x1bb   : > { %v1528_v20 = vpop.f32.mrb[1].mxu1  ;;  %v1272_v50 = vrot.slane %v707_v54, 7 }
 0x1c6   : > { %v427_v51 = vpop.f32.mrb[0].mxu0 }
 0x1c7   : > { %v1281_v40 = vsel %vm1280_vm12, %v427_v51, %v1272_v50  ;;  %v1515_v3 = vpop.f32.mrb[1].mxu0 }
 0x1df   : > { %v987_v42 = vpop.f32.mrb[2].mxu0 }
 0x1e0   : > { %v1275_v39 = vrot.slane %v987_v42, 6  ;;  %v1541_v57 = vpop.f32.mrb[3].mxu0 }
 0x1e2   : > { %v1283_v49 = vsel %vm1282_vm13, %v1281_v40, %v1275_v39 }
 0x1e3   : > { %v1267_v5 = vpop.f32.mrb[2].mxu1 }
 0x1e4   : > { %v1278_v9 = vrot.slane %v1267_v5, 5  ;;  %v1554_v52 = vpop.f32.mrb[3].mxu1 }
 0x1e6   : > { %v1285_v33 = vsel %vm1284_vm14, %v1283_v49, %v1278_v9 }
 0x1e7   : > { %v1286_v10 = vmul.f32 0.015625, %v1285_v33 }
 0x1e9   : > { %1288 = vst.msk [vmem:[%s141_s14] sm:$0xf] %vm1287_vm15, %v1286_v10 }
 0x1ea PF: > { %s12_s9 = sadd.s32 1, %s1604_s9  }
 0x1eb   : > { %p9_p4 = scmp.ge.s32.totalorder %s12_s9, 4  }
 0x1ed   :  { %11 = sbr.rel (!%p9_p4) target bundleno = 1 (0x1), region = 64 }

// kernel: _lambda_.3
= control target key start
LH: loop header
LB: loop body
LE: loop exit
PB: predicated region body
PF: predicated region fallthrough
CT: control target
= control target key end

     0   :  { %s2762_s12 = smov 0   ;;  %s4263_s0 = inlined_call_operand.vmem [shape: bf16[2,18,18,4], index: 0, kind: input, shape index: {}]   ;;  %s4264_s1 = inlined_call_operand.vmem [shape: bf16[2,36,4], index: 1, kind: input, shape index: {}]   ;;  %s4265_s2 = inlined_call_operand.vmem [shape: f32[1,4], index: 2, kind: input, shape index: {}]   ;;  %s4266_s3 = inlined_call_operand.vmem [shape: f32[2,256,4], index: 3, kind: output, shape index: {}]  }
   0x1 LB: > { %s1924_s13 = sadd.s32 4294967295, %s2732_s12   ;;  %p1928_p0 = scmp.ge.s32.totalorder %s2732_s12, 1  ;;  %s2732_s12 = sphi %s2762_s12, %s13_s12  }
   0x2   : > { %p147_p1 = scmp.lt.s32.totalorder %s2732_s12, 3 }
   0x4   : > { %p148_p2 = pnand %p1928_p0, %p147_p1 }
   0x6   : > { %151 = sbr.rel (%p148_p2) target bundleno = 622 (0x26e), region = 32 }
   0xd   : > { %p176_p3 = scmp.lt.s32.totalorder %s1924_s13, 1  ;;  %vm348_vm0 = vcmask 1046528   ;;  %s2734_s18 = smov 4   ;;  %vm429_vm1 = vcmask 1045504   ;;  %vm1660_vm2 = vcmask 1041408   ;;  %vm1304_vm3 = vcmask 31744  }
   0xe   : > { %s2735_s19 = smov 8   ;;  %s2736_s20 = smov 12   ;;  %vm1337_vm4 = vcmask 64512   ;;  %vm1370_vm5 = vcmask 97280   ;;  %vm1403_vm6 = vcmask 130048   ;;  %vm1436_vm7 = vcmask 162816  }
   0xf   : > { %s4499_s13 = smov (!%p176_p3, %s1924_s13), 1  ;;  %s2737_s21 = smov 16   ;;  %vm1469_vm8 = vcmask 195584   ;;  %vm1502_vm9 = vcmask 228352   ;;  %vm1535_vm10 = vcmask 261120   ;;  %vm1611_vm11 = vcmask 293888  }
  0x10   : > { %s2065_s14 = smul.u32 216, %s4499_s13  ;;  %s2738_s22 = smov 20  }
  0x11   : > { %s2066_s23 = smul.u32 20, %s4499_s13  ;;  %s2739_s27 = smov 24  }
  0x12   : > { %s2776_s17 = scalar_lea.vmem %s4263_s0, %s2065_s14  ;;  %s2740_s28 = smov 28  }
  0x13   : > { %v1992_v0 = vld [vmem:[%s2776_s17 + $0x18] sm:$0xff]   ;;  %v2780_v1 = vld [vmem:[%s2776_s17 + $0x20] sm:$0x1]  ;;  %v2791_v7 = vld [vmem:[%s2776_s17 + $0x8] sm:$0x1]  ;;  %s185_s26 = scalar_lea.vmem %s4264_s1, %s2066_s23  ;;  %s2741_s29 = smov 32  }
  0x14   : > { %v1957_v2 = vld [vmem:[%s2776_s17] sm:$0xff]   ;;  %v2783_v3 = vunpack.c.l.bf16 %v1992_v0  ;;  %v2785_v4 = vunpack.c.h.bf16 %v1992_v0  ;;  %v4273_v5 = vunpack.c.l.bf16 %v2780_v1  ;;  %v2795_v9 = vld [vmem:[%s2776_s17 + $0x2c] sm:$0x1]  ;;  %v4275_v11 = vunpack.c.l.bf16 %v2791_v7  ;;  %v2816_v23 = vld [vmem:[%s2776_s17 + $0x14] sm:$0x1]  ;;  %s1955_s30 = sshll.u32 %s4499_s13, 8 }
  0x15   : > { %v2788_v6 = vunpack.c.l.bf16 %v1957_v2  ;;  %v201_v8 = vld [vmem:[%s2776_s17 + $0x24] sm:$0xff]   ;;  %v2797_v10 = vunpack.c.h.bf16 %v1957_v2  ;;  %v195_v14 = vld [vmem:[%s2776_s17 + $0xc] sm:$0xff]   ;;  %v4274_v21 = vunpack.c.l.bf16 %v2795_v9  ;;  %v207_v28 = vld [vmem:[%s2776_s17 + $0x3c] sm:$0xff]   ;;  %v4276_v37 = vunpack.c.l.bf16 %v2816_v23  ;;  %s4162_s8 = scalar_lea.vmem %s4266_s3, %s1955_s30 }
  0x16   : > { %4351 = vst [vmem:[#allocation2_spill] sm:$0xff] %v2783_v3  ;;  %v2800_v12 = vunpack.c.l.bf16 %v201_v8  ;;  %v2802_v13 = vunpack.c.h.bf16 %v201_v8  ;;  %v359_v15 = vrot.slane %v2783_v3, 1  ;;  %v360_v16 = vrot.slane %v2785_v4, 1  ;;  %v2831_v33 = vld [vmem:[%s2776_s17 + $0x44] sm:$0x1]  ;;  %v1993_v38 = vld [vmem:[%s2776_s17 + $0x30] sm:$0xff]  }
  0x17   : > { %4352 = vst [vmem:[#allocation3_spill] sm:$0xff] %v2788_v6  ;;  %4353 = vst [vmem:[#allocation4_spill] sm:$0xff] %v2797_v10  ;;  %v362_v17 = vrot.slane %v4273_v5, 1  ;;  %v349_v18 = vrot.slane %v2788_v6, 1  ;;  %v350_v19 = vrot.slane %v2797_v10, 1  ;;  %v352_v20 = vrot.slane %v4275_v11, 1 }
  0x18   : > { %4354 = vst [vmem:[#allocation5_spill] sm:$0xff] %v2800_v12  ;;  %4355 = vst [vmem:[#allocation6_spill] sm:$0xff] %v2802_v13  ;;  %v364_v22 = vrot.slane %v2800_v12, 1  ;;  %v361_v24 = vsel %vm348_vm0, %v359_v15, %v360_v16  ;;  %v365_v26 = vrot.slane %v2802_v13, 1  ;;  %v2821_v27 = vunpack.c.l.bf16 %v195_v14  ;;  %v2847_v43 = vld [vmem:[%s2776_s17 + $0x38] sm:$0x1] }
  0x19   : > { %v363_v25 = vsel %vm348_vm0, %v360_v16, %v362_v17  ;;  %v351_v30 = vsel %vm348_vm0, %v349_v18, %v350_v19  ;;  %v353_v31 = vsel %vm348_vm0, %v350_v19, %v352_v20  ;;  %v367_v32 = vrot.slane %v4274_v21, 1  ;;  %v213_v52 = vld [vmem:[%s2776_s17 + $0x54] sm:$0xff]   ;;  %v2869_v57 = vld [vmem:[%s2776_s17 + $0x5c] sm:$0x1]  ;;  %v1994_v58 = vld [vmem:[%s2776_s17 + $0x48] sm:$0xff]  }
  0x1a   : > { %4356 = vst [vmem:[#allocation7_spill] sm:$0xff] %v2821_v27  ;;  %v2824_v29 = vpack.i.bf16 %v363_v25, %v361_v24  ;;  %v2083_v34 = vpack.i.bf16 %v353_v31, %v351_v30  ;;  %v366_v35 = vsel %vm348_vm0, %v364_v22, %v365_v26  ;;  %v2834_v36 = vunpack.c.h.bf16 %v195_v14  ;;  %v2887_v14 = vld [vmem:[%s2776_s17 + $0x50] sm:$0x1] }
  0x1b   : > { %v368_v39 = vsel %vm348_vm0, %v365_v26, %v367_v32  ;;  %v354_v40 = vrot.slane %v2821_v27, 1  ;;  %v2842_v41 = vunpack.c.l.bf16 %v207_v28  ;;  %v2844_v42 = vunpack.c.h.bf16 %v207_v28  ;;  %v219_v19 = vld [vmem:[%s2776_s17 + $0x6c] sm:$0xff]   ;;  %v2908_v26 = vld [vmem:[%s2776_s17 + $0x74] sm:$0x1]  ;;  %v1995_v28 = vld [vmem:[%s2776_s17 + $0x60] sm:$0xff]  }
  0x1c   : > { %4357 = vst [vmem:[#allocation8_spill] sm:$0xff] %v2824_v29  ;;  %4358 = vst [vmem:[#allocation9_spill] sm:$0xff] %v2834_v36  ;;  %2094 = vrot.lane.b32.xlu1 %v2824_v29, %s2734_s18  ;;  %2084 = vrot.lane.b32.xlu0 %v2083_v34, %s2734_s18  ;;  %v2850_v44 = vpack.i.bf16 %v368_v39, %v366_v35  ;;  %v355_v45 = vrot.slane %v2834_v36, 1  ;;  %v357_v46 = vrot.slane %v4276_v37, 1  ;;  %v4272_v47 = vunpack.c.l.bf16 %v2831_v33 }
  0x1d   : > { %v374_v48 = vrot.slane %v2842_v41, 1  ;;  %v375_v49 = vrot.slane %v2844_v42, 1  ;;  %v2858_v50 = vunpack.c.l.bf16 %v1993_v38  ;;  %v2860_v51 = vunpack.c.h.bf16 %v1993_v38 }
  0x1e   : > { %4359 = vst [vmem:[#allocation10_spill] sm:$0xff] %v2850_v44  ;;  %v356_v53 = vsel %vm348_vm0, %v354_v40, %v355_v45  ;;  %v358_v54 = vsel %vm348_vm0, %v355_v45, %v357_v46  ;;  %v377_v55 = vrot.slane %v4272_v47, 1  ;;  %v4271_v56 = vunpack.c.l.bf16 %v2847_v43  ;;  %v2928_v45 = vld [vmem:[%s2776_s17 + $0x68] sm:$0x1]  ;;  %v1997_v47 = vld [vmem:[%s2776_s17 + $0x90] sm:$0xff]  }
  0x1f   : > { %v2874_v59 = vpack.i.bf16 %v358_v54, %v356_v53  ;;  %v376_v60 = vsel %vm348_vm0, %v374_v48, %v375_v49  ;;  %v369_v61 = vrot.slane %v2858_v50, 1  ;;  %v370_v62 = vrot.slane %v2860_v51, 1  ;;  %v225_v53 = vld [vmem:[%s2776_s17 + $0x84] sm:$0xff]  }
  0x20   : > { %2099 = vrot.lane.b32.xlu1 %v2850_v44, %s2734_s18  ;;  %v378_v63 = vsel %vm348_vm0, %v375_v49, %v377_v55  ;;  %v372_v0 = vrot.slane %v4271_v56, 1  ;;  %v2882_v2 = vunpack.c.l.bf16 %v213_v52  ;;  %v2884_v8 = vunpack.c.h.bf16 %v213_v52  ;;  %v2992_v56 = vld [vmem:[%s2776_s17 + $0xa4] sm:$0x1]  ;;  %v1998_v44 = vld [vmem:[%s2776_s17 + $0xa8] sm:$0xff]  }
  0x21   : > { %4360 = vst [vmem:[#allocation11_spill] sm:$0xff] %v2874_v59  ;;  %2089 = vrot.lane.b32.xlu0 %v2874_v59, %s2734_s18  ;;  %v2891_v15 = vpack.i.bf16 %v378_v63, %v376_v60  ;;  %v2894_v16 = vsel %vm348_vm0, %v369_v61, %v370_v62  ;;  %v4270_v17 = vunpack.c.l.bf16 %v2869_v57  ;;  %v2897_v18 = vunpack.c.l.bf16 %v1994_v58 }
  0x22   : > { %4362 = vst [vmem:[#allocation13_spill] sm:$0xff] %v2894_v16  ;;  %v2901_v20 = vsel %vm348_vm0, %v370_v62, %v372_v0  ;;  %v384_v22 = vrot.slane %v2882_v2, 1  ;;  %v385_v24 = vrot.slane %v2884_v8, 1  ;;  %v2905_v25 = vunpack.c.h.bf16 %v1994_v58 }
  0x23   : > { %4361 = vst [vmem:[#allocation12_spill] sm:$0xff] %v2891_v15  ;;  %4363 = vst [vmem:[#allocation14_spill] sm:$0xff] %v2901_v20  ;;  %v2915_v30 = vpack.i.bf16 %v2901_v20, %v2894_v16  ;;  %v387_v31 = vrot.slane %v4270_v17, 1  ;;  %v4269_v32 = vunpack.c.l.bf16 %v2887_v14  ;;  %v379_v34 = vrot.slane %v2897_v18, 1 }
  0x24   : > { %2109 = vrot.lane.b32.xlu1 %v2891_v15, %s2734_s18  ;;  %v386_v35 = vsel %vm348_vm0, %v384_v22, %v385_v24  ;;  %v380_v38 = vrot.slane %v2905_v25, 1  ;;  %v2923_v39 = vunpack.c.l.bf16 %v219_v19  ;;  %v2925_v40 = vunpack.c.h.bf16 %v219_v19  ;;  %v2951_v19 = vld [vmem:[%s2776_s17 + $0x8c] sm:$0x1]  ;;  %v1996_v22 = vld [vmem:[%s2776_s17 + $0x78] sm:$0xff]  }
  0x25   : > { %4364 = vst [vmem:[#allocation15_spill] sm:$0xff] %v2915_v30  ;;  %2104 = vrot.lane.b32.xlu0 %v2915_v30, %s2734_s18  ;;  %v388_v46 = vsel %vm348_vm0, %v385_v24, %v387_v31  ;;  %v382_v48 = vrot.slane %v4269_v32, 1  ;;  %v4267_v49 = vunpack.c.l.bf16 %v2908_v26  ;;  %v2936_v52 = vunpack.c.l.bf16 %v1995_v28 }
  0x26   : > { %4365 = vst [vmem:[#allocation16_spill] sm:$0xff] %v2923_v39  ;;  %4366 = vst [vmem:[#allocation17_spill] sm:$0xff] %v2925_v40  ;;  %v2939_v54 = vpack.i.bf16 %v388_v46, %v386_v35  ;;  %v381_v55 = vsel %vm348_vm0, %v379_v34, %v380_v38  ;;  %v394_v58 = vrot.slane %v2923_v39, 1  ;;  %v395_v60 = vrot.slane %v2925_v40, 1 }
  0x27   : > { %4367 = vst [vmem:[#allocation18_spill] sm:$0xff] %v2936_v52  ;;  %v383_v61 = vsel %vm348_vm0, %v380_v38, %v382_v48  ;;  %v397_v62 = vrot.slane %v4267_v49, 1  ;;  %v2947_v63 = vunpack.c.h.bf16 %v1995_v28  ;;  %v4268_v0 = vunpack.c.l.bf16 %v2928_v45  ;;  %v231_v49 = vld [vmem:[%s2776_s17 + $0x9c] sm:$0xff]  }
  0x28   : > { %4368 = vst [vmem:[#allocation19_spill] sm:$0xff] %v2939_v54  ;;  %2119 = vrot.lane.b32.xlu1 %v2939_v54, %s2734_s18  ;;  %v2956_v24 = vpack.i.bf16 %v383_v61, %v381_v55  ;;  %v2959_v31 = vsel %vm348_vm0, %v394_v58, %v395_v60  ;;  %v389_v34 = vrot.slane %v2936_v52, 1  ;;  %v2962_v35 = vunpack.c.l.bf16 %v225_v53  ;;  %v2973_v55 = vld [vmem:[%s2776_s17 + $0x80] sm:$0x1] }
  0x29   : > { %4369 = vst [vmem:[#allocation20_spill] sm:$0xff] %v2947_v63  ;;  %4371 = vst [vmem:[#allocation22_spill] sm:$0xff] %v2959_v31  ;;  %v2965_v28 = vsel %vm348_vm0, %v395_v60, %v397_v62  ;;  %v390_v38 = vrot.slane %v2947_v63, 1  ;;  %v392_v46 = vrot.slane %v4268_v0, 1  ;;  %v2970_v48 = vunpack.c.h.bf16 %v225_v53 }
  0x2a   : > { %4370 = vst [vmem:[#allocation21_spill] sm:$0xff] %v2956_v24  ;;  %4372 = vst [vmem:[#allocation23_spill] sm:$0xff] %v2962_v35  ;;  %2114 = vrot.lane.b32.xlu0 %v2956_v24, %s2734_s18  ;;  %v2979_v58 = vpack.i.bf16 %v2965_v28, %v2959_v31  ;;  %v4278_v60 = vunpack.c.l.bf16 %v2951_v19  ;;  %v404_v61 = vrot.slane %v2962_v35, 1  ;;  %v2983_v62 = vunpack.c.l.bf16 %v1996_v22 }
  0x2b   : > { %4373 = vst [vmem:[#allocation24_spill] sm:$0xff] %v2965_v28  ;;  %4374 = vst [vmem:[#allocation25_spill] sm:$0xff] %v2970_v48  ;;  %v391_v53 = vsel %vm348_vm0, %v389_v34, %v390_v38  ;;  %v393_v0 = vsel %vm348_vm0, %v390_v38, %v392_v46  ;;  %v405_v32 = vrot.slane %v2970_v48, 1  ;;  %v2989_v17 = vunpack.c.h.bf16 %v1996_v22  ;;  %v3043_v28 = vld [vmem:[%s2776_s17 + $0xbc] sm:$0x1] }
  0x2c   : > { %4375 = vst [vmem:[#allocation26_spill] sm:$0xff] %v2979_v58  ;;  %4376 = vst [vmem:[#allocation27_spill] sm:$0xff] %v2983_v62  ;;  %2129 = vrot.lane.b32.xlu1 %v2979_v58, %s2734_s18  ;;  %v2997_v5 = vpack.i.bf16 %v393_v0, %v391_v53  ;;  %v407_v21 = vrot.slane %v4278_v60, 1  ;;  %v4285_v34 = vunpack.c.l.bf16 %v2973_v55  ;;  %v399_v38 = vrot.slane %v2983_v62, 1  ;;  %v3012_v58 = vld [vmem:[%s2776_s17 + $0x98] sm:$0x1] }
  0x2d   : > { %4377 = vst [vmem:[#allocation28_spill] sm:$0xff] %v2989_v17  ;;  %v3004_v46 = vsel %vm348_vm0, %v404_v61, %v405_v32  ;;  %v400_v22 = vrot.slane %v2989_v17, 1  ;;  %v3007_v11 = vunpack.c.l.bf16 %v231_v49  ;;  %v3009_v37 = vunpack.c.h.bf16 %v231_v49  ;;  %v237_v49 = vld [vmem:[%s2776_s17 + $0xb4] sm:$0xff]  }
  0x2e   : > { %4378 = vst [vmem:[#allocation29_spill] sm:$0xff] %v2997_v5  ;;  %4379 = vst [vmem:[#allocation30_spill] sm:$0xff] %v3004_v46  ;;  %2124 = vrot.lane.b32.xlu0 %v2997_v5, %s2734_s18  ;;  %v3017_v0 = vsel %vm348_vm0, %v405_v32, %v407_v21  ;;  %v402_v61 = vrot.slane %v4285_v34, 1  ;;  %v4293_v53 = vunpack.c.l.bf16 %v2992_v56  ;;  %v3022_v60 = vunpack.c.l.bf16 %v1997_v47 }
  0x2f   : > { %4380 = vst [vmem:[#allocation31_spill] sm:$0xff] %v3017_v0  ;;  %v3027_v54 = vpack.i.bf16 %v3017_v0, %v3004_v46  ;;  %v3030_v24 = vsel %vm348_vm0, %v399_v38, %v400_v22  ;;  %v414_v5 = vrot.slane %v3007_v11, 1  ;;  %v415_v21 = vrot.slane %v3009_v37, 1 }
  0x30   : > { %4382 = vst [vmem:[#allocation33_spill] sm:$0xff] %v3030_v24  ;;  %v3035_v32 = vsel %vm348_vm0, %v400_v22, %v402_v61  ;;  %v417_v34 = vrot.slane %v4293_v53, 1  ;;  %v3039_v15 = vunpack.c.h.bf16 %v1997_v47  ;;  %v4302_v30 = vunpack.c.l.bf16 %v3012_v58 }
  0x31   : > { %4381 = vst [vmem:[#allocation32_spill] sm:$0xff] %v3027_v54  ;;  %4383 = vst [vmem:[#allocation34_spill] sm:$0xff] %v3035_v32  ;;  %2139 = vrot.lane.b32.xlu1 %v3027_v54, %s2734_s18  ;;  %v3050_v38 = vpack.i.bf16 %v3035_v32, %v3030_v24  ;;  %v416_v22 = vsel %vm348_vm0, %v414_v5, %v415_v21  ;;  %v409_v61 = vrot.slane %v3022_v60, 1  ;;  %v3054_v59 = vunpack.c.l.bf16 %v237_v49  ;;  %v3063_v54 = vld [vmem:[%s2776_s17 + $0xb0] sm:$0x1] }
  0x32   : > { %v418_v47 = vsel %vm348_vm0, %v415_v21, %v417_v34  ;;  %v410_v53 = vrot.slane %v3039_v15, 1  ;;  %v412_v31 = vrot.slane %v4302_v30, 1  ;;  %v3060_v16 = vunpack.c.h.bf16 %v237_v49 }
  0x33   : > { %4384 = vst [vmem:[#allocation35_spill] sm:$0xff] %v3050_v38  ;;  %2134 = vrot.lane.b32.xlu0 %v3050_v38, %s2734_s18  ;;  %v3067_v24 = vpack.i.bf16 %v418_v47, %v416_v22  ;;  %v4306_v5 = vunpack.c.l.bf16 %v3043_v28  ;;  %v424_v29 = vrot.slane %v3054_v59, 1  ;;  %v3071_v20 = vunpack.c.l.bf16 %v1998_v44 }
  0x34   : > { %v411_v34 = vsel %vm348_vm0, %v409_v61, %v410_v53  ;;  %v413_v21 = vsel %vm348_vm0, %v410_v53, %v412_v31  ;;  %v425_v49 = vrot.slane %v3060_v16, 1  ;;  %v3076_v30 = vunpack.c.h.bf16 %v1998_v44 }
  0x35   : > { %4385 = vst [vmem:[#allocation36_spill] sm:$0xff] %v3067_v24  ;;  %2149 = vrot.lane.b32.xlu1 %v3067_v24, %s2734_s18  ;;  %v3080_v38 = vpack.i.bf16 %v413_v21, %v411_v34  ;;  %v427_v22 = vrot.slane %v4306_v5, 1  ;;  %v4319_v47 = vunpack.c.l.bf16 %v3063_v54  ;;  %v419_v0 = vrot.slane %v3071_v20, 1 }
  0x36   : > { %v426_v61 = vsel %vm348_vm0, %v424_v29, %v425_v49  ;;  %v420_v31 = vrot.slane %v3076_v30, 1  ;;  %v435_v53 = vrot.slane %v2821_v27, 2  ;;  %v436_v44 = vrot.slane %v2834_v36, 2 }
  0x37   : > { %4386 = vst [vmem:[#allocation37_spill] sm:$0xff] %v3080_v38  ;;  %2144 = vrot.lane.b32.xlu0 %v3080_v38, %s2734_s18  ;;  %v428_v34 = vsel %vm348_vm0, %v425_v49, %v427_v22  ;;  %v422_v21 = vrot.slane %v4319_v47, 1  ;;  %v4387_v5 = vunpack.c.l.bf16 %v2816_v23  ;;  %v430_v46 = vrot.slane %v2788_v6, 2  ;;  %v4417_v6 = vld [vmem:[#allocation13_spill] sm:$0xff] }
  0x38   : > { %v3098_v29 = vpack.i.bf16 %v428_v34, %v426_v61  ;;  %v421_v32 = vsel %vm348_vm0, %v419_v0, %v420_v31  ;;  %v437_v27 = vsel %vm429_vm1, %v435_v53, %v436_v44  ;;  %v431_v36 = vrot.slane %v2797_v10, 2  ;;  %v4418_v10 = vld [vmem:[#allocation22_spill] sm:$0xff] }
  0x39   : > { %v438_v24 = vrot.slane %v4387_v5, 2  ;;  %v423_v38 = vsel %vm348_vm0, %v420_v31, %v422_v21  ;;  %v4388_v22 = vunpack.c.l.bf16 %v2791_v7  ;;  %v445_v23 = vrot.slane %v2800_v12, 2 }
  0x3a   : > { %2159 = vrot.lane.b32.xlu1 %v3098_v29, %s2734_s18  ;;  %v3110_v5 = vpack.i.bf16 %v423_v38, %v421_v32  ;;  %v432_v0 = vsel %vm429_vm1, %v430_v46, %v431_v36  ;;  %v446_v53 = vrot.slane %v2802_v13, 2  ;;  %v440_v7 = vrot.slane %v2783_v3, 2 }
  0x3b   : > { %v439_v49 = vsel %vm429_vm1, %v436_v44, %v438_v24  ;;  %v433_v47 = vrot.slane %v4388_v22, 2  ;;  %v4389_v24 = vunpack.c.l.bf16 %v2795_v9  ;;  %v441_v34 = vrot.slane %v2785_v4, 2 }
  0x3c   : > { %v3112_v61 = vpack.i.bf16 %v439_v49, %v437_v27  ;;  %2154 = vrot.lane.b32.xlu0 %v3110_v5, %s2734_s18  ;;  %v447_v27 = vsel %vm429_vm1, %v445_v23, %v446_v53  ;;  %v4390_v38 = vunpack.c.l.bf16 %v2780_v1  ;;  %v455_v21 = vrot.slane %v2842_v41, 2 }
  0x3d   : > { %v434_v31 = vsel %vm429_vm1, %v431_v36, %v433_v47  ;;  %v448_v44 = vrot.slane %v4389_v24, 2  ;;  %v442_v9 = vsel %vm429_vm1, %v440_v7, %v441_v34  ;;  %v456_v47 = vrot.slane %v2844_v42, 2 }
  0x3e   : > { %v2163_v32 = vpack.i.bf16 %v434_v31, %v432_v0  ;;  %v443_v46 = vrot.slane %v4390_v38, 2  ;;  %v4391_v49 = vunpack.c.l.bf16 %v2831_v33  ;;  %2169 = vrot.lane.b32.xlu1 %v3112_v61, %s2735_s19  ;;  %v450_v23 = vrot.slane %v2858_v50, 2 }
  0x3f   : > { %v449_v36 = vsel %vm429_vm1, %v446_v53, %v448_v44  ;;  %v451_v31 = vrot.slane %v2860_v51, 2  ;;  %v457_v53 = vsel %vm429_vm1, %v455_v21, %v456_v47  ;;  %v4392_v44 = vunpack.c.l.bf16 %v2847_v43 }
  0x40   : > { %v458_v22 = vrot.slane %v4391_v49, 2  ;;  %v3134_v0 = vpack.i.bf16 %v449_v36, %v447_v27  ;;  %v444_v1 = vsel %vm429_vm1, %v441_v34, %v443_v46  ;;  %2164 = vrot.lane.b32.xlu0 %v2163_v32, %s2735_s19  ;;  %v465_v38 = vrot.slane %v2882_v2, 2 }
  0x41   : > { %v453_v33 = vrot.slane %v4392_v44, 2  ;;  %v3144_v7 = vpack.i.bf16 %v444_v1, %v442_v9  ;;  %v452_v27 = vsel %vm429_vm1, %v450_v23, %v451_v31  ;;  %v466_v34 = vrot.slane %v2884_v8, 2 }
  0x42   : > { %v459_v24 = vsel %vm429_vm1, %v456_v47, %v458_v22  ;;  %v4393_v36 = vunpack.c.l.bf16 %v2869_v57  ;;  %v460_v47 = vrot.slane %v2897_v18, 2  ;;  %v461_v43 = vrot.slane %v2905_v25, 2  ;;  %2179 = vrot.lane.b32.xlu1 %v3134_v0, %s2735_s19 }
  0x43   : > { %v454_v46 = vsel %vm429_vm1, %v451_v31, %v453_v33  ;;  %v3156_v32 = vpack.i.bf16 %v459_v24, %v457_v53  ;;  %v467_v9 = vsel %vm429_vm1, %v465_v38, %v466_v34  ;;  %v4394_v49 = vunpack.c.l.bf16 %v2887_v14 }
  0x44   : > { %v468_v21 = vrot.slane %v4393_v36, 2  ;;  %v475_v1 = vrot.slane %v2923_v39, 2  ;;  %v476_v57 = vrot.slane %v2925_v40, 2  ;;  %v4395_v31 = vunpack.c.l.bf16 %v2908_v26  ;;  %2174 = vrot.lane.b32.xlu0 %v3144_v7, %s2735_s19 }
  0x45   : > { %v463_v22 = vrot.slane %v4394_v49, 2  ;;  %v3168_v33 = vpack.i.bf16 %v454_v46, %v452_v27  ;;  %v462_v24 = vsel %vm429_vm1, %v460_v47, %v461_v43  ;;  %v470_v38 = vrot.slane %v2936_v52, 2 }
  0x46   : > { %v469_v23 = vsel %vm429_vm1, %v466_v34, %v468_v21  ;;  %v478_v44 = vrot.slane %v4395_v31, 2  ;;  %v471_v34 = vrot.slane %v2947_v63, 2  ;;  %v4397_v36 = vunpack.c.l.bf16 %v2928_v45  ;;  %2189 = vrot.lane.b32.xlu1 %v3156_v32, %s2735_s19 }
  0x47   : > { %v3170_v53 = vpack.i.bf16 %v469_v23, %v467_v9  ;;  %v464_v14 = vsel %vm429_vm1, %v461_v43, %v463_v22  ;;  %v477_v26 = vsel %vm429_vm1, %v475_v1, %v476_v57  ;;  %v485_v46 = vrot.slane %v2962_v35, 2 }
  0x48   : > { %v473_v21 = vrot.slane %v4397_v36, 2  ;;  %v479_v27 = vsel %vm429_vm1, %v476_v57, %v478_v44  ;;  %v486_v47 = vrot.slane %v2970_v48, 2  ;;  %v4398_v43 = vunpack.c.l.bf16 %v2951_v19  ;;  %2184 = vrot.lane.b32.xlu0 %v3168_v33, %s2735_s19 }
  0x49   : > { %4396 = vst [vmem:[#allocation38_spill] sm:$0xff] %v3170_v53  ;;  %v480_v49 = vrot.slane %v2983_v62, 2  ;;  %v481_v22 = vrot.slane %v2989_v17, 2  ;;  %v3190_v45 = vpack.i.bf16 %v464_v14, %v462_v24  ;;  %v4399_v1 = vunpack.c.l.bf16 %v2973_v55 }
  0x4a   : > { %v488_v9 = vrot.slane %v4398_v43, 2  ;;  %v3194_v57 = vpack.i.bf16 %v479_v27, %v477_v26  ;;  %v472_v31 = vsel %vm429_vm1, %v470_v38, %v471_v34  ;;  %v474_v44 = vsel %vm429_vm1, %v471_v34, %v473_v21  ;;  %2199 = vrot.lane.b32.xlu1 %v3170_v53, %s2735_s19 }
  0x4b   : > { %v483_v23 = vrot.slane %v4399_v1, 2  ;;  %v487_v19 = vsel %vm429_vm1, %v485_v46, %v486_v47  ;;  %v495_v43 = vrot.slane %v3007_v11, 2  ;;  %v496_v24 = vrot.slane %v3009_v37, 2 }
  0x4c   : > { %4400 = vst [vmem:[#allocation39_spill] sm:$0xff] %v3194_v57  ;;  %v489_v36 = vsel %vm429_vm1, %v486_v47, %v488_v9  ;;  %v4401_v55 = vunpack.c.l.bf16 %v2992_v56  ;;  %v482_v26 = vsel %vm429_vm1, %v480_v49, %v481_v22  ;;  %v490_v34 = vrot.slane %v3022_v60, 2  ;;  %2194 = vrot.lane.b32.xlu0 %v3190_v45, %s2735_s19 }
  0x4d   : > { %v484_v38 = vsel %vm429_vm1, %v481_v22, %v483_v23  ;;  %v491_v21 = vrot.slane %v3039_v15, 2  ;;  %v3212_v27 = vpack.i.bf16 %v474_v44, %v472_v31  ;;  %v4403_v46 = vunpack.c.l.bf16 %v3012_v58 }
  0x4e   : > { %v498_v14 = vrot.slane %v4401_v55, 2  ;;  %2209 = vrot.lane.b32.xlu1 %v3194_v57, %s2735_s19  ;;  %v3218_v56 = vpack.i.bf16 %v489_v36, %v487_v19  ;;  %v3220_v9 = vpack.i.bf16 %v484_v38, %v482_v26  ;;  %v497_v49 = vsel %vm429_vm1, %v495_v43, %v496_v24 }
  0x4f   : > { %4402 = vst [vmem:[#allocation40_spill] sm:$0xff] %v3212_v27  ;;  %v493_v47 = vrot.slane %v4403_v46, 2  ;;  %v492_v1 = vsel %vm429_vm1, %v490_v34, %v491_v21  ;;  %v505_v23 = vrot.slane %v3054_v59, 2  ;;  %v506_v31 = vrot.slane %v3060_v16, 2  ;;  %v4407_v46 = vld [vmem:[#allocation30_spill] sm:$0xff] }
  0x50   : > { %v499_v22 = vsel %vm429_vm1, %v496_v24, %v498_v14  ;;  %v4404_v58 = vunpack.c.l.bf16 %v3043_v28  ;;  %2204 = vrot.lane.b32.xlu0 %v3212_v27, %s2735_s19  ;;  %v500_v36 = vrot.slane %v3071_v20, 2  ;;  %v501_v43 = vrot.slane %v3076_v30, 2 }
  0x51   : > { %v494_v19 = vsel %vm429_vm1, %v491_v21, %v493_v47  ;;  %v4405_v24 = vunpack.c.l.bf16 %v3063_v54  ;;  %v3238_v14 = vpack.i.bf16 %v499_v22, %v497_v49  ;;  %v507_v28 = vsel %vm429_vm1, %v505_v23, %v506_v31  ;;  %v4406_v54 = vld [vmem:[#allocation34_spill] sm:$0xff]  ;;  %v4408_v23 = vld [vmem:[#allocation31_spill] sm:$0xff] }
  0x52   : > { %v508_v44 = vrot.slane %v4404_v58, 2  ;;  %2219 = vrot.lane.b32.xlu1 %v3218_v56, %s2735_s19  ;;  %v3240_v26 = vpack.i.bf16 %v494_v19, %v492_v1  ;;  %v502_v34 = vsel %vm429_vm1, %v500_v36, %v501_v43  ;;  %v3258_v1 = vpack.i.bf16 %v2785_v4, %v2783_v3  ;;  %v4411_v19 = vld [vmem:[#allocation9_spill] sm:$0xff]  ;;  %v1999_v47 = vld [vmem:[%s2776_s17 + $0xc0] sm:$0xff]  }
  0x53   : > { %v503_v55 = vrot.slane %v4405_v24, 2  ;;  %v3278_v24 = vpack.i.bf16 %v2802_v13, %v2800_v12  ;;  %v3318_v58 = vpack.i.bf16 %v3039_v15, %v3022_v60  ;;  %v1990_v13 = vunpack.c.l.bf16 %v1999_v47 }
  0x54   : > { %v509_v38 = vsel %vm429_vm1, %v506_v31, %v508_v44  ;;  %2214 = vrot.lane.b32.xlu0 %v3220_v9, %s2735_s19  ;;  %v4409_v31 = vld [vmem:[#allocation14_spill] sm:$0xff]  ;;  %v4410_v44 = vld [vmem:[#allocation7_spill] sm:$0xff]  ;;  %v3334_v27 = vpack.i.bf16 %v3009_v37, %v3007_v11  ;;  %v2338_v3 = vpack.i.bf16 %v4418_v10, %v4417_v6  ;;  %v4423_v6 = vld [vmem:[#allocation33_spill] sm:$0xff] }
  0x55   : > { %v504_v21 = vsel %vm429_vm1, %v501_v43, %v503_v55  ;;  %v3252_v49 = vpack.i.bf16 %v509_v38, %v507_v28  ;;  %v2243_v36 = vpack.i.bf16 %v4411_v19, %v4410_v44  ;;  %v3272_v43 = vpack.i.bf16 %v2860_v51, %v2858_v50  ;;  %v4416_v19 = vld [vmem:[#allocation8_spill] sm:$0xff] }
  0x56   : > { %2229 = vrot.lane.b32.xlu1 %v3238_v14, %s2735_s19  ;;  %v3254_v22 = vpack.i.bf16 %v504_v21, %v502_v34  ;;  %v3285_v55 = vpack.i.bf16 %v2905_v25, %v2897_v18  ;;  %v3291_v28 = vpack.i.bf16 %v2844_v42, %v2842_v41  ;;  %v3297_v38 = vpack.i.bf16 %v2947_v63, %v2936_v52  ;;  %v242_v52 = vld [vmem:[%s2776_s17 + $0xc8] sm:$0x1] }
  0x57   : > { %v3303_v34 = vpack.i.bf16 %v2884_v8, %v2882_v2  ;;  %v2288_v21 = vpack.i.bf16 %v2989_v17, %v2983_v62  ;;  %v2293_v62 = vpack.i.bf16 %v2970_v48, %v2962_v35  ;;  %v3327_v17 = vpack.i.bf16 %v3076_v30, %v3071_v20 }
  0x58   : > { %2224 = vrot.lane.b32.xlu0 %v3240_v26, %s2735_s19  ;;  %4412 = vst [vmem:[#allocation34_spill] sm:$0xff] %v3297_v38  ;;  %v513_v48 = vrot.slane %v1990_v13, 1  ;;  %v518_v53 = vrot.slane %v1990_v13, 2 }
  0x5a   : > { %2239 = vrot.lane.b32.xlu1 %v3252_v49, %s2735_s19 }
  0x5c   : > { %2234 = vrot.lane.b32.xlu0 %v3254_v22, %s2735_s19 }
  0x5e   : > { %2249 = vrot.lane.b32.xlu1 %v3258_v1, %s2736_s20 }
  0x60   : > { %2244 = vrot.lane.b32.xlu0 %v2243_v36, %s2736_s20  ;;  %v3313_v36 = vpack.i.bf16 %v2925_v40, %v2923_v39 }
  0x62   : > { %2259 = vrot.lane.b32.xlu1 %v3272_v43, %s2736_s20  ;;  %4413 = vst [vmem:[#allocation30_spill] sm:$0xff] %v3313_v36 }
  0x64   : > { %2254 = vrot.lane.b32.xlu0 %v3278_v24, %s2736_s20 }
  0x66   : > { %2269 = vrot.lane.b32.xlu1 %v3285_v55, %s2736_s20 }
  0x68   : > { %2264 = vrot.lane.b32.xlu0 %v3291_v28, %s2736_s20 }
  0x6a   : > { %2279 = vrot.lane.b32.xlu1 %v3297_v38, %s2736_s20  ;;  %v1991_v38 = vunpack.c.h.bf16 %v1999_v47  ;;  %v3345_v47 = vpack.i.bf16 %v3060_v16, %v3054_v59 }
  0x6c   : > { %2274 = vrot.lane.b32.xlu0 %v3303_v34, %s2736_s20  ;;  %v3339_v35 = vpack.i.bf16 %v1991_v38, %v1990_v13  ;;  %v514_v63 = vrot.slane %v1991_v38, 1  ;;  %v519_v12 = vrot.slane %v1991_v38, 2  ;;  %v4424_v13 = vpack.i.bf16 %v4407_v46, %v4406_v54  ;;  %v2724_v38 = vld [vmem:[%s185_s26 + $0x8] sm:$0xff]  }
  0x6e   : > { %2289 = vrot.lane.b32.xlu1 %v2288_v21, %s2736_s20  ;;  %4414 = vst [vmem:[#allocation31_spill] sm:$0xff] %v3339_v35  ;;  %v515_v40 = vsel %vm348_vm0, %v513_v48, %v514_v63 }
  0x70   : > { %2284 = vrot.lane.b32.xlu0 %v3313_v36, %s2736_s20  ;;  %v296_v36 = vunpack.c.l.bf16 %v242_v52 }
  0x72   : > { %2299 = vrot.lane.b32.xlu1 %v3318_v58, %s2736_s20  ;;  %v516_v39 = vrot.slane %v296_v36, 1  ;;  %v521_v48 = vrot.slane %v296_v36, 2 }
  0x74   : > { %2294 = vrot.lane.b32.xlu0 %v2293_v62, %s2736_s20  ;;  %v517_v44 = vsel %vm348_vm0, %v514_v63, %v516_v39  ;;  %v4419_v39 = vld [vmem:[#allocation11_spill] sm:$0xff]  ;;  %v522_v63 = vsel %vm429_vm1, %v519_v12, %v521_v48 }
  0x75   : > { %v3351_v52 = vpack.i.bf16 %v517_v44, %v515_v40  ;;  %v520_v40 = vsel %vm429_vm1, %v518_v53, %v519_v12 }
  0x76   : > { %2309 = vrot.lane.b32.xlu1 %v3327_v17, %s2736_s20  ;;  %v3364_v44 = vpack.i.bf16 %v522_v63, %v520_v40 }
  0x77   : > { %4415 = vst [vmem:[#allocation14_spill] sm:$0xff] %v3351_v52  ;;  %v4422_v52 = vld [vmem:[#allocation24_spill] sm:$0xff] }
  0x78   : > { %2304 = vrot.lane.b32.xlu0 %v3334_v27, %s2736_s20  ;;  %4420 = vst [vmem:[#allocation8_spill] sm:$0xff] %v3364_v44  ;;  %v2343_v10 = vpack.i.bf16 %v4423_v6, %v4422_v52  ;;  %v2725_v52 = vld [vmem:[%s185_s26 + $0x10] ss:$0 sps:$4 sm:$0x33]  }
  0x79   : > { %v1662_v48 = vsel %vm1660_vm2, %v2725_v52, 0 }
  0x7a   : > { %2319 = vrot.lane.b32.xlu1 %v3339_v35, %s2736_s20  ;;  %v4421_v35 = vld [vmem:[#allocation10_spill] sm:$0xff] }
  0x7c   : > { %2314 = vrot.lane.b32.xlu0 %v3345_v47, %s2736_s20 }
  0x7e   : > { %2329 = vrot.lane.b32.xlu1 %v4416_v19, %s2737_s21 }
  0x80   : > { %2324 = vrot.lane.b32.xlu0 %v4419_v39, %s2737_s21 }
  0x82   : > { %2339 = vrot.lane.b32.xlu1 %v2338_v3, %s2737_s21 }
  0x84   : > { %2334 = vrot.lane.b32.xlu0 %v4421_v35, %s2737_s21 }
  0x86   : > { %2349 = vrot.lane.b32.xlu1 %v4424_v13, %s2737_s21 }
  0x88   : > { %2344 = vrot.lane.b32.xlu0 %v2343_v10, %s2737_s21  ;;  %v4429_v10 = vld [vmem:[#allocation37_spill] sm:$0xff] }
  0x8a   : > { %2359 = vrot.lane.b32.xlu1 %v3194_v57, %s2738_s22 }
  0x8c   : > { %2354 = vrot.lane.b32.xlu0 %v3112_v61, %s2738_s22  ;;  %v2723_v61 = vld [vmem:[%s185_s26] sm:$0xff]  }
  0x8d   : > { %2019 = vmatprep.subr.bf16.mxu0 %v2723_v61  ;;  %2057 = vmatprep.subr.bf16.mxu1 %v2723_v61 }
  0x8e   : > { %v3379_v3 = vpop.permute.xlu1 %2094  ;;  %2369 = vrot.lane.b32.xlu1 %v3220_v9, %s2738_s22  ;;  %v3383_v12 = vpop.permute.xlu0 %2084  ;;  %2020 = vmatpush3.bf16.msra.mxu0 %v2723_v61 }
  0x8f   : > { %2060 = vmatpush3.bf16.msra.mxu1 %v2723_v61  ;;  %2021 = vmatprep.subr.bf16.mxu0 %v2724_v38 }
  0x90   : > { %2364 = vrot.lane.b32.xlu0 %v3144_v7, %s2738_s22  ;;  %2058 = vmatprep.subr.bf16.mxu1 %v2724_v38 }
  0x92   : > { %v3388_v53 = vpop.permute.xlu1 %2099  ;;  %2379 = vrot.lane.b32.xlu1 %v2288_v21, %s2739_s27  ;;  %2022 = vmatpush3.bf16.msra.mxu0 %v2724_v38 }
  0x93   : > { %v3394_v54 = vpop.permute.xlu0 %2089  ;;  %2061 = vmatpush3.bf16.msra.mxu1 %v2724_v38  ;;  %2063 = vmatprep.subr.msk.bf16.mxu0 %vm1660_vm2, %v2725_v52 }
  0x94   : > { %2374 = vrot.lane.b32.xlu0 %v3258_v1, %s2739_s27  ;;  %v4425_v1 = vld [vmem:[#allocation35_spill] sm:$0xff]  ;;  %2064 = vmatprep.subr.msk.bf16.mxu1 %vm1660_vm2, %v2725_v52 }
  0x96   : > { %v3398_v46 = vpop.permute.xlu1 %2109  ;;  %2389 = vrot.lane.b32.xlu1 %v2293_v62, %s2739_s27  ;;  %2024 = vmatpush3.bf16.msra.mxu0 %v1662_v48 }
  0x97   : > { %v3401_v36 = vpop.permute.xlu0 %2104  ;;  %2062 = vmatpush3.bf16.msra.mxu1 %v1662_v48 }
  0x98   : > { %2384 = vrot.lane.b32.xlu0 %v3278_v24, %s2739_s27  ;;  %v4426_v24 = vld [vmem:[#allocation32_spill] sm:$0xff] }
  0x9a   : > { %2399 = vrot.lane.b32.xlu1 %v4425_v1, %s2740_s28  ;;  %v3407_v21 = vpop.permute.xlu1 %2119 }
  0x9c   : > { %2394 = vrot.lane.b32.xlu0 %v4416_v19, %s2740_s28  ;;  %v3411_v62 = vpop.permute.xlu0 %2114 }
  0x9e   : > { %2409 = vrot.lane.b32.xlu1 %v4426_v24, %s2740_s28  ;;  %v3415_v39 = vpop.permute.xlu1 %2129  ;;  %v4436_v24 = vld [vmem:[#allocation36_spill] sm:$0xff] }
  0xa0   : > { %2404 = vrot.lane.b32.xlu0 %v4421_v35, %s2740_s28  ;;  %v3419_v40 = vpop.permute.xlu0 %2124 }
  0xa2   : > { %2419 = vrot.lane.b32.xlu1 %v3220_v9, %s2741_s29  ;;  %v4430_v9 = vpack.i.bf16 %v4409_v31, %v4408_v23 }
  0xa3   : > { %v3423_v19 = vpop.permute.xlu1 %2139 }
  0xa4   : > { %4427 = vst [vmem:[#allocation13_spill] sm:$0xff] %v3423_v19  ;;  %2414 = vrot.lane.b32.xlu0 %v3144_v7, %s2741_s29 }
  0xa5   : > { %v3427_v63 = vpop.permute.xlu0 %2134 }
  0xa6   : > { %4428 = vst [vmem:[#allocation22_spill] sm:$0xff] %v3427_v63  ;;  %2429 = vrot.lane.b32.xlu1 %v3218_v56, %s2741_s29 }
  0xa7   : > { %v3431_v6 = vpop.permute.xlu1 %2149 }
  0xa8   : > { %2424 = vrot.lane.b32.xlu0 %v3134_v0, %s2741_s29 }
  0xa9   : > { %v3435_v35 = vpop.permute.xlu0 %2144 }
  0xaa   : > { %2439 = vrot.lane.b32.xlu1 %v4429_v10, %s2737_s21 }
  0xac   : > { %2434 = vrot.lane.b32.xlu0 %v4430_v9, %s2737_s21  ;;  %v2160_v7 = vpop.permute.xlu1 %2159 }
  0xad   : > { %v2161_v63 = vunpack.i.l.bf16 %v2160_v7 }
  0xae   : > { %v2155_v13 = vpop.permute.xlu0 %2154  ;;  %2449 = vrot.lane.b32.xlu1 %v3218_v56, %s2738_s22 }
  0xaf   : > { %v2157_v57 = vunpack.i.h.bf16 %v2155_v13  ;;  %v2156_v44 = vunpack.i.l.bf16 %v2155_v13 }
  0xb0   : > { %2444 = vrot.lane.b32.xlu0 %v3134_v0, %s2738_s22  ;;  %v3447_v61 = vpop.permute.xlu1 %2169 }
  0xb1   : > { %4431 = vst [vmem:[#allocation11_spill] sm:$0xff] %v3447_v61 }
  0xb2   : > { %v3449_v38 = vpop.permute.xlu0 %2164  ;;  %2459 = vrot.lane.b32.xlu1 %v3240_v26, %s2738_s22 }
  0xb3   : > { %4432 = vst [vmem:[#allocation10_spill] sm:$0xff] %v3449_v38 }
  0xb4   : > { %2454 = vrot.lane.b32.xlu0 %v3168_v33, %s2738_s22  ;;  %v3455_v23 = vpop.permute.xlu1 %2179 }
  0xb6   : > { %v3457_v31 = vpop.permute.xlu0 %2174  ;;  %2469 = vrot.lane.b32.xlu1 %v3318_v58, %s2739_s27  ;;  %v4433_v58 = vld [vmem:[#allocation15_spill] sm:$0xff] }
  0xb8   : > { %2464 = vrot.lane.b32.xlu0 %v3272_v43, %s2739_s27  ;;  %v3463_v0 = vpop.permute.xlu1 %2189 }
  0xba   : > { %v3465_v56 = vpop.permute.xlu0 %2184  ;;  %2479 = vrot.lane.b32.xlu1 %v3334_v27, %s2739_s27  ;;  %v4437_v27 = vld [vmem:[#allocation12_spill] sm:$0xff] }
  0xbc   : > { %2474 = vrot.lane.b32.xlu0 %v3291_v28, %s2739_s27  ;;  %v3471_v1 = vpop.permute.xlu1 %2199 }
  0xbe   : > { %v3473_v52 = vpop.permute.xlu0 %2194  ;;  %2489 = vrot.lane.b32.xlu1 %v4429_v10, %s2740_s28 }
  0xc0   : > { %2484 = vrot.lane.b32.xlu0 %v4433_v58, %s2740_s28  ;;  %v3479_v43 = vpop.permute.xlu1 %2209  ;;  %v2162_v58 = vunpack.i.h.bf16 %v2160_v7  ;;  %v1335_v7 = vsel %vm1304_vm3, %v3054_v59, %v2161_v63 }
  0xc1   : > { %4434 = vst [vmem:[#allocation24_spill] sm:$0xff] %v3479_v43 }
  0xc2   : > { %v3481_v48 = vpop.permute.xlu0 %2204  ;;  %2499 = vrot.lane.b32.xlu1 %v4436_v24, %s2740_s28 }
  0xc3   : > { %4435 = vst [vmem:[#allocation33_spill] sm:$0xff] %v3481_v48 }
  0xc4   : > { %2494 = vrot.lane.b32.xlu0 %v4437_v27, %s2740_s28  ;;  %v3487_v28 = vpop.permute.xlu1 %2219 }
  0xc5   : > { %4438 = vst [vmem:[#allocation35_spill] sm:$0xff] %v3487_v28 }
  0xc6   : > { %v3489_v9 = vpop.permute.xlu0 %2214  ;;  %2509 = vrot.lane.b32.xlu1 %v3240_v26, %s2741_s29 }
  0xc7   : > { %4439 = vst [vmem:[#allocation32_spill] sm:$0xff] %v3489_v9 }
  0xc8   : > { %2504 = vrot.lane.b32.xlu0 %v3168_v33, %s2741_s29  ;;  %v3495_v10 = vpop.permute.xlu1 %2229  ;;  %v1336_v33 = vsel %vm1304_vm3, %v3060_v16, %v2162_v58  ;;  %v1333_v16 = vsel %vm1304_vm3, %v3071_v20, %v2156_v44  ;;  %v2111_v20 = vunpack.i.l.bf16 %v3398_v46  ;;  %v2106_v44 = vunpack.i.l.bf16 %v3401_v36 }
  0xc9   : > { %v2192_v58 = vunpack.i.h.bf16 %v3463_v0 }
  0xca   : > { %v3497_v19 = vpop.permute.xlu0 %2224  ;;  %2519 = vrot.lane.b32.xlu1 %v3238_v14, %s2741_s29 }
  0xcc   : > { %2514 = vrot.lane.b32.xlu0 %v3156_v32, %s2741_s29  ;;  %v2240_v9 = vpop.permute.xlu1 %2239 }
  0xcd   : > { %v2242_v26 = vunpack.i.h.bf16 %v2240_v9  ;;  %v2241_v28 = vunpack.i.l.bf16 %v2240_v9  ;;  %v1334_v9 = vsel %vm1304_vm3, %v3076_v30, %v2157_v57  ;;  %v2112_v30 = vunpack.i.h.bf16 %v3398_v46 }
  0xce   : > { %v2235_v48 = vpop.permute.xlu0 %2234  ;;  %2529 = vrot.lane.b32.xlu1 %v4436_v24, %s2737_s21  ;;  %v2107_v57 = vunpack.i.h.bf16 %v3401_v36  ;;  %v1315_v36 = vsel %vm1304_vm3, %v2842_v41, %v2111_v20 }
  0xcf   : > { %v3510_v13 = vsel %vm1337_vm4, %v1336_v33, %v2242_v26  ;;  %v3513_v43 = vsel %vm1337_vm4, %v1335_v7, %v2241_v28  ;;  %v2237_v38 = vunpack.i.h.bf16 %v2235_v48  ;;  %v2236_v61 = vunpack.i.l.bf16 %v2235_v48 }
  0xd0   : > { %2524 = vrot.lane.b32.xlu0 %v4437_v27, %s2737_s21  ;;  %v3521_v59 = vpop.permute.xlu1 %2249  ;;  %v2122_v48 = vunpack.i.h.bf16 %v3407_v21  ;;  %v2191_v26 = vunpack.i.l.bf16 %v3463_v0  ;;  %v1316_v46 = vsel %vm1304_vm3, %v2844_v42, %v2112_v30  ;;  %v1313_v7 = vsel %vm1304_vm3, %v2858_v50, %v2106_v44 }
  0xd1   : > { %v3524_v63 = vsel %vm1337_vm4, %v1333_v16, %v2236_v61  ;;  %v3527_v24 = vsel %vm1337_vm4, %v1334_v9, %v2237_v38  ;;  %v2121_v61 = vunpack.i.l.bf16 %v3407_v21  ;;  %v4440_v38 = vld [vmem:[#allocation21_spill] sm:$0xff]  ;;  %v1314_v21 = vsel %vm1304_vm3, %v2860_v51, %v2107_v57 }
  0xd2   : > { %v3529_v28 = vpop.permute.xlu0 %2244  ;;  %2539 = vrot.lane.b32.xlu1 %v3110_v5, %s2737_s21  ;;  %v1320_v0 = vsel %vm1304_vm3, %v2884_v8, %v2122_v48  ;;  %v2186_v16 = vunpack.i.l.bf16 %v3465_v56  ;;  %v2117_v42 = vunpack.i.h.bf16 %v3411_v62  ;;  %v2116_v51 = vunpack.i.l.bf16 %v3411_v62 }
  0xd3   : > { %v1319_v9 = vsel %vm1304_vm3, %v2882_v2, %v2121_v61  ;;  %v1349_v20 = vsel %vm1337_vm4, %v1316_v46, %v2192_v58  ;;  %v1348_v8 = vsel %vm1337_vm4, %v1315_v36, %v2191_v26  ;;  %v2202_v2 = vunpack.i.h.bf16 %v3471_v1 }
  0xd4   : > { %2534 = vrot.lane.b32.xlu0 %v4440_v38, %s2737_s21  ;;  %v3541_v27 = vpop.permute.xlu1 %2259  ;;  %v2201_v57 = vunpack.i.l.bf16 %v3471_v1  ;;  %v1346_v61 = vsel %vm1337_vm4, %v1313_v7, %v2186_v16  ;;  %v2197_v26 = vunpack.i.h.bf16 %v3473_v52  ;;  %v2196_v1 = vunpack.i.l.bf16 %v3473_v52 }
  0xd5   : > { %v1318_v7 = vsel %vm1304_vm3, %v2905_v25, %v2117_v42  ;;  %v1353_v52 = vsel %vm1337_vm4, %v1320_v0, %v2202_v2  ;;  %v2151_v2 = vunpack.i.l.bf16 %v3431_v6 }
  0xd6   : > { %v3545_v33 = vpop.permute.xlu0 %2254  ;;  %2549 = vrot.lane.b32.xlu1 %v3238_v14, %s2738_s22  ;;  %v2187_v14 = vunpack.i.h.bf16 %v3465_v56 }
  0xd8   : > { %2544 = vrot.lane.b32.xlu0 %v3156_v32, %s2738_s22  ;;  %v2270_v41 = vpop.permute.xlu1 %2269  ;;  %v1347_v58 = vsel %vm1337_vm4, %v1314_v21, %v2187_v14  ;;  %v1317_v21 = vsel %vm1304_vm3, %v2897_v18, %v2116_v51  ;;  %v1352_v14 = vsel %vm1337_vm4, %v1319_v9, %v2201_v57  ;;  %v1351_v18 = vsel %vm1337_vm4, %v1318_v7, %v2197_v26 }
  0xd9   : > { %v2272_v30 = vunpack.i.h.bf16 %v2270_v41  ;;  %v2271_v50 = vunpack.i.l.bf16 %v2270_v41  ;;  %v1350_v25 = vsel %vm1337_vm4, %v1317_v21, %v2196_v1  ;;  %v2147_v57 = vunpack.i.h.bf16 %v3435_v35 }
  0xda   : > { %v2265_v44 = vpop.permute.xlu0 %2264  ;;  %2559 = vrot.lane.b32.xlu1 %v3254_v22, %s2738_s22 }
  0xdb   : > { %v3574_v32 = vsel %vm1370_vm5, %v1348_v8, %v2271_v50  ;;  %v3577_v56 = vsel %vm1370_vm5, %v1349_v20, %v2272_v30  ;;  %v2267_v62 = vunpack.i.h.bf16 %v2265_v44  ;;  %v2266_v48 = vunpack.i.l.bf16 %v2265_v44 }
  0xdc   : > { %4441 = vst [vmem:[#allocation37_spill] sm:$0xff] %v3574_v32  ;;  %4442 = vst [vmem:[#allocation15_spill] sm:$0xff] %v3577_v56  ;;  %2554 = vrot.lane.b32.xlu0 %v3190_v45, %s2738_s22  ;;  %v2280_v46 = vpop.permute.xlu1 %2279 }
  0xdd   : > { %v3586_v36 = vsel %vm1370_vm5, %v1346_v61, %v2266_v48  ;;  %v3589_v41 = vsel %vm1370_vm5, %v1347_v58, %v2267_v62  ;;  %v2282_v30 = vunpack.i.h.bf16 %v2280_v46  ;;  %v2281_v50 = vunpack.i.l.bf16 %v2280_v46 }
  0xde   : > { %v2275_v16 = vpop.permute.xlu0 %2274  ;;  %2569 = vrot.lane.b32.xlu1 %v3327_v17, %s2739_s27  ;;  %v2146_v48 = vunpack.i.l.bf16 %v3435_v35  ;;  %v2232_v61 = vunpack.i.h.bf16 %v3495_v10  ;;  %v2231_v58 = vunpack.i.l.bf16 %v3495_v10  ;;  %v1331_v10 = vsel %vm1304_vm3, %v3007_v11, %v2151_v2 }
  0xdf   : > { %v3600_v20 = vsel %vm1370_vm5, %v1352_v14, %v2281_v50  ;;  %v3603_v8 = vsel %vm1370_vm5, %v1353_v52, %v2282_v30  ;;  %v2277_v44 = vunpack.i.h.bf16 %v2275_v16  ;;  %v2276_v62 = vunpack.i.l.bf16 %v2275_v16  ;;  %v3659_v52 = vld [vmem:[%s2776_s17 + $0xd4] sm:$0x1]  ;;  %v4447_v16 = vld [vmem:[#allocation19_spill] sm:$0xff] }
  0xe0   : > { %4443 = vst [vmem:[#allocation36_spill] sm:$0xff] %v3600_v20  ;;  %4444 = vst [vmem:[#allocation12_spill] sm:$0xff] %v3603_v8  ;;  %2564 = vrot.lane.b32.xlu0 %v3285_v55, %s2739_s27  ;;  %v3609_v0 = vpop.permute.xlu1 %2289  ;;  %v2152_v55 = vunpack.i.h.bf16 %v3431_v6  ;;  %v4465_v8 = vld [vmem:[#allocation17_spill] sm:$0xff] }
  0xe1   : > { %v3612_v9 = vsel %vm1370_vm5, %v1350_v25, %v2276_v62  ;;  %v3615_v17 = vsel %vm1370_vm5, %v1351_v18, %v2277_v44 }
  0xe2   : > { %4445 = vst [vmem:[#allocation21_spill] sm:$0xff] %v3612_v9  ;;  %4446 = vst [vmem:[#allocation41_spill] sm:$0xff] %v3615_v17  ;;  %v3617_v42 = vpop.permute.xlu0 %2284  ;;  %2579 = vrot.lane.b32.xlu1 %v3345_v47, %s2739_s27  ;;  %v2226_v47 = vunpack.i.l.bf16 %v3497_v19  ;;  %v1332_v35 = vsel %vm1304_vm3, %v3009_v37, %v2152_v55  ;;  %v4467_v17 = vld [vmem:[#allocation20_spill] sm:$0xff] }
  0xe3   : > { %v1365_v30 = vsel %vm1337_vm4, %v1332_v35, %v2232_v61  ;;  %v299_v61 = vunpack.c.l.bf16 %v3659_v52  ;;  %v2097_v35 = vunpack.i.h.bf16 %v3379_v3  ;;  %v2257_v52 = vunpack.i.h.bf16 %v3545_v33 }
  0xe4   : > { %2574 = vrot.lane.b32.xlu0 %v3303_v34, %s2739_s27  ;;  %v3623_v51 = vpop.permute.xlu1 %2299  ;;  %v2227_v34 = vunpack.i.h.bf16 %v3497_v19  ;;  %v1329_v19 = vsel %vm1304_vm3, %v3022_v60, %v2146_v48 }
  0xe5   : > { %v1362_v60 = vsel %vm1337_vm4, %v1329_v19, %v2226_v47  ;;  %v2177_v19 = vunpack.i.h.bf16 %v3457_v31 }
  0xe6   : > { %v3631_v26 = vpop.permute.xlu0 %2294  ;;  %2589 = vrot.lane.b32.xlu1 %v3110_v5, %s2740_s28  ;;  %v1330_v5 = vsel %vm1304_vm3, %v3039_v15, %v2147_v57  ;;  %v243_v15 = vld [vmem:[%s2776_s17 + $0xcc] sm:$0xff]  }
  0xe7   : > { %v1363_v14 = vsel %vm1337_vm4, %v1330_v5, %v2227_v34  ;;  %v3673_v57 = vunpack.c.l.bf16 %v243_v15  ;;  %v3675_v48 = vunpack.c.h.bf16 %v243_v15 }
  0xe8   : > { %2584 = vrot.lane.b32.xlu0 %v4440_v38, %s2740_s28  ;;  %v2310_v6 = vpop.permute.xlu1 %2309  ;;  %v1364_v38 = vsel %vm1337_vm4, %v1331_v10, %v2231_v58  ;;  %v2101_v10 = vunpack.i.l.bf16 %v3388_v53 }
  0xe9   : > { %v2312_v1 = vunpack.i.h.bf16 %v2310_v6  ;;  %v2311_v46 = vunpack.i.l.bf16 %v2310_v6 }
  0xea   : > { %v2305_v50 = vpop.permute.xlu0 %2304  ;;  %2599 = vrot.lane.b32.xlu1 %v3098_v29, %s2740_s28 }
  0xeb   : > { %v3652_v37 = vsel %vm1370_vm5, %v1364_v38, %v2311_v46  ;;  %v3655_v11 = vsel %vm1370_vm5, %v1365_v30, %v2312_v1  ;;  %v2307_v7 = vunpack.i.h.bf16 %v2305_v50  ;;  %v2306_v21 = vunpack.i.l.bf16 %v2305_v50 }
  0xec   : > { %2594 = vrot.lane.b32.xlu0 %v4447_v16, %s2740_s28  ;;  %v2320_v44 = vpop.permute.xlu1 %2319  ;;  %v2181_v46 = vunpack.i.l.bf16 %v3455_v23  ;;  %v529_v38 = vrot.slane %v299_v61, 1  ;;  %v2087_v50 = vunpack.i.h.bf16 %v3383_v12 }
  0xed   : > { %v3666_v62 = vsel %vm1370_vm5, %v1362_v60, %v2306_v21  ;;  %v3669_v25 = vsel %vm1370_vm5, %v1363_v14, %v2307_v7  ;;  %v2322_v18 = vunpack.i.h.bf16 %v2320_v44  ;;  %v2321_v55 = vunpack.i.l.bf16 %v2320_v44  ;;  %v4452_v21 = vld [vmem:[#allocation5_spill] sm:$0xff]  ;;  %v4453_v14 = vld [vmem:[#allocation38_spill] sm:$0xff] }
  0xee   : > { %v2315_v2 = vpop.permute.xlu0 %2314  ;;  %2609 = vrot.lane.b32.xlu1 %v3254_v22, %s2741_s29  ;;  %v2096_v22 = vunpack.i.l.bf16 %v3379_v3  ;;  %v527_v3 = vrot.slane %v3675_v48, 1  ;;  %v2176_v7 = vunpack.i.l.bf16 %v3457_v31  ;;  %v1311_v15 = vsel %vm1304_vm3, %v4452_v21, %v2101_v10 }
  0xef   : > { %v3680_v58 = vsel %vm1370_vm5, %v3513_v43, %v2321_v55  ;;  %v3684_v34 = vsel %vm1370_vm5, %v3510_v13, %v2322_v18  ;;  %v2317_v47 = vunpack.i.h.bf16 %v2315_v2  ;;  %v2316_v6 = vunpack.i.l.bf16 %v2315_v2  ;;  %v4454_v18 = vld [vmem:[#allocation2_spill] sm:$0xff] }
  0xf0   : > { %4448 = vst [vmem:[#allocation19_spill] sm:$0xff] %v3680_v58  ;;  %4449 = vst [vmem:[#allocation42_spill] sm:$0xff] %v3684_v34  ;;  %2604 = vrot.lane.b32.xlu0 %v3190_v45, %s2741_s29  ;;  %v3691_v1 = vpop.permute.xlu1 %2329  ;;  %v526_v43 = vrot.slane %v3673_v57, 1  ;;  %v2261_v45 = vunpack.i.l.bf16 %v3541_v27  ;;  %v2256_v60 = vunpack.i.l.bf16 %v3545_v33  ;;  %v1344_v31 = vsel %vm1337_vm4, %v1311_v15, %v2181_v46  ;;  %v4466_v34 = vld [vmem:[#allocation16_spill] sm:$0xff] }
  0xf1   : > { %v3697_v13 = vsel %vm1370_vm5, %v3524_v63, %v2316_v6  ;;  %v3701_v5 = vsel %vm1370_vm5, %v3527_v24, %v2317_v47  ;;  %v2086_v63 = vunpack.i.l.bf16 %v3383_v12  ;;  %v1310_v24 = vsel %vm1304_vm3, %v2785_v4, %v2097_v35 }
  0xf2   : > { %4450 = vst [vmem:[#allocation43_spill] sm:$0xff] %v3697_v13  ;;  %4451 = vst [vmem:[#allocation44_spill] sm:$0xff] %v3701_v5  ;;  %v3706_v30 = vpop.permute.xlu0 %2324  ;;  %2619 = vrot.lane.b32.xlu1 %v3252_v49, %s2741_s29  ;;  %v1309_v12 = vsel %vm1304_vm3, %v4454_v18, %v2096_v22  ;;  %v3728_v4 = vsel %vm348_vm0, %v526_v43, %v527_v3  ;;  %v2092_v2 = vunpack.i.h.bf16 %v3394_v54  ;;  %v2091_v21 = vunpack.i.l.bf16 %v3394_v54  ;;  %v4468_v5 = vld [vmem:[#allocation18_spill] sm:$0xff] }
  0xf3   : > { %v1343_v47 = vsel %vm1337_vm4, %v1310_v24, %v2177_v19  ;;  %v1377_v33 = vsel %vm1370_vm5, %v1344_v31, %v2261_v45  ;;  %v3736_v35 = vsel %vm348_vm0, %v527_v3, %v529_v38  ;;  %v1342_v22 = vsel %vm1337_vm4, %v1309_v12, %v2176_v7  ;;  %v4457_v12 = vld [vmem:[#allocation3_spill] sm:$0xff] }
  0xf4   : > { %2614 = vrot.lane.b32.xlu0 %v4453_v14, %s2741_s29  ;;  %v3721_v44 = vpop.permute.xlu1 %2339  ;;  %v1375_v19 = vsel %vm1370_vm5, %v1342_v22, %v2256_v60  ;;  %v1376_v45 = vsel %vm1370_vm5, %v1343_v47, %v2257_v52  ;;  %v531_v3 = vrot.slane %v3673_v57, 2  ;;  %v532_v24 = vrot.slane %v3675_v48, 2  ;;  %v4455_v52 = vld [vmem:[#allocation14_spill] sm:$0xff]  ;;  %v4456_v60 = vld [vmem:[#allocation4_spill] sm:$0xff] }
  0xf5   : > { %v2341_v55 = vunpack.i.l.bf16 %v3721_v44  ;;  %v534_v54 = vrot.slane %v299_v61, 2  ;;  %v1306_v18 = vsel %vm1304_vm3, %v4456_v60, %v2087_v50  ;;  %v1305_v31 = vsel %vm1304_vm3, %v4457_v12, %v2086_v63  ;;  %v4461_v60 = vld [vmem:[#allocation11_spill] sm:$0xff] }
  0xf6   : > { %v2335_v6 = vpop.permute.xlu0 %2334  ;;  %2629 = vrot.lane.b32.xlu1 %v3098_v29, %s2737_s21  ;;  %v2131_v50 = vunpack.i.l.bf16 %v3415_v39  ;;  %v3780_v63 = vsel %vm429_vm1, %v531_v3, %v532_v24  ;;  %v2172_v12 = vunpack.i.h.bf16 %v4461_v60  ;;  %v2252_v13 = vunpack.i.h.bf16 %v3521_v59 }
  0xf7   : > { %v3740_v10 = vsel %vm1403_vm6, %v1377_v33, %v2341_v55  ;;  %v2337_v43 = vunpack.i.h.bf16 %v2335_v6  ;;  %v2336_v46 = vunpack.i.l.bf16 %v2335_v6  ;;  %v4458_v55 = vld [vmem:[#allocation9_spill] sm:$0xff]  ;;  %v4459_v33 = vld [vmem:[#allocation7_spill] sm:$0xff] }
  0xf8   : > { %2624 = vrot.lane.b32.xlu0 %v4447_v16, %s2737_s21  ;;  %v3747_v29 = vpop.permute.xlu1 %2349  ;;  %v1308_v47 = vsel %vm1304_vm3, %v4458_v55, %v2092_v2  ;;  %v1307_v61 = vsel %vm1304_vm3, %v4459_v33, %v2091_v21  ;;  %v4460_v6 = vld [vmem:[#allocation29_spill] sm:$0xff]  ;;  %v3783_v2 = vsel %vm429_vm1, %v532_v24, %v534_v54  ;;  %v2127_v21 = vunpack.i.h.bf16 %v3419_v40 }
  0xf9   : > { %v3751_v38 = vsel %vm1403_vm6, %v1375_v19, %v2336_v46  ;;  %v3754_v7 = vsel %vm1403_vm6, %v1376_v45, %v2337_v43  ;;  %v2132_v46 = vunpack.i.h.bf16 %v3415_v39  ;;  %v2126_v19 = vunpack.i.l.bf16 %v3419_v40  ;;  %v4462_v39 = vld [vmem:[#allocation10_spill] sm:$0xff]  ;;  %v4463_v43 = vld [vmem:[#allocation24_spill] sm:$0xff]  ;;  %v4464_v16 = vld [vmem:[#allocation33_spill] sm:$0xff] }
  0xfa   : > { %v3757_v15 = vpop.permute.xlu0 %2344  ;;  %2639 = vrot.lane.b32.xlu1 %v4455_v52, %s2737_s21  ;;  %v2171_v55 = vunpack.i.l.bf16 %v4461_v60  ;;  %v2167_v33 = vunpack.i.h.bf16 %v4462_v39  ;;  %v2166_v3 = vunpack.i.l.bf16 %v4462_v39  ;;  %v2212_v24 = vunpack.i.h.bf16 %v4463_v43 }
  0xfb   : > { %v2211_v54 = vunpack.i.l.bf16 %v4463_v43  ;;  %v2206_v20 = vunpack.i.l.bf16 %v4464_v16  ;;  %v1324_v60 = vsel %vm1304_vm3, %v4465_v8, %v2132_v46  ;;  %v1323_v39 = vsel %vm1304_vm3, %v4466_v34, %v2131_v50  ;;  %v4469_v8 = vld [vmem:[#allocation8_spill] sm:$0xff] }
  0xfc   : > { %2634 = vrot.lane.b32.xlu0 %v4460_v6, %s2737_s21  ;;  %v3773_v22 = vpop.permute.xlu1 %2359  ;;  %v2207_v58 = vunpack.i.h.bf16 %v4464_v16  ;;  %v2251_v43 = vunpack.i.l.bf16 %v3521_v59  ;;  %v1322_v9 = vsel %vm1304_vm3, %v4467_v17, %v2127_v21  ;;  %v1340_v34 = vsel %vm1337_vm4, %v1307_v61, %v2171_v55 }
  0xfd   : > { %v1341_v16 = vsel %vm1337_vm4, %v1308_v47, %v2172_v12  ;;  %v1338_v46 = vsel %vm1337_vm4, %v1305_v31, %v2166_v3  ;;  %v1339_v17 = vsel %vm1337_vm4, %v1306_v18, %v2167_v33  ;;  %v1356_v59 = vsel %vm1337_vm4, %v1323_v39, %v2211_v54  ;;  %v4471_v3 = vld [vmem:[#allocation31_spill] sm:$0xff] }
  0xfe   : > { %v3787_v45 = vpop.permute.xlu0 %2354  ;;  %2649 = vrot.lane.b32.xlu1 %v3252_v49, %s2738_s22  ;;  %v2246_v49 = vunpack.i.l.bf16 %v3529_v28  ;;  %v2247_v21 = vunpack.i.h.bf16 %v3529_v28  ;;  %v1355_v61 = vsel %vm1337_vm4, %v1322_v9, %v2207_v58  ;;  %v1373_v47 = vsel %vm1370_vm5, %v1340_v34, %v2251_v43 }
  0xff   : > { %v2292_v31 = vunpack.i.h.bf16 %v3609_v0  ;;  %v2291_v18 = vunpack.i.l.bf16 %v3609_v0  ;;  %v1374_v12 = vsel %vm1370_vm5, %v1341_v16, %v2252_v13  ;;  %v2286_v28 = vunpack.i.l.bf16 %v3617_v42 }
 0x100   : > { %2644 = vrot.lane.b32.xlu0 %v4453_v14, %s2738_s22  ;;  %v3800_v40 = vpop.permute.xlu1 %2369  ;;  %v1321_v14 = vsel %vm1304_vm3, %v4468_v5, %v2126_v19  ;;  %v1357_v5 = vsel %vm1337_vm4, %v1324_v60, %v2212_v24  ;;  %v4470_v19 = vld [vmem:[#allocation40_spill] sm:$0xff]  ;;  %v1371_v55 = vsel %vm1370_vm5, %v1338_v46, %v2246_v49  ;;  %v2332_v9 = vunpack.i.h.bf16 %v3691_v1  ;;  %v4472_v60 = vld [vmem:[#allocation34_spill] sm:$0xff] }
 0x101   : > { %v1354_v50 = vsel %vm1337_vm4, %v1321_v14, %v2206_v20  ;;  %v2287_v20 = vunpack.i.h.bf16 %v3617_v42  ;;  %v2331_v58 = vunpack.i.l.bf16 %v3691_v1  ;;  %v2327_v24 = vunpack.i.h.bf16 %v3706_v30 }
 0x102   : > { %v3816_v32 = vpop.permute.xlu0 %2364  ;;  %2659 = vrot.lane.b32.xlu1 %v4469_v8, %s2738_s22  ;;  %v2326_v0 = vunpack.i.l.bf16 %v3706_v30  ;;  %v1372_v13 = vsel %vm1370_vm5, %v1339_v17, %v2247_v21  ;;  %v2342_v54 = vunpack.i.h.bf16 %v3721_v44  ;;  %v2351_v49 = vunpack.i.l.bf16 %v3747_v29 }
 0x103   : > { %v2347_v42 = vunpack.i.h.bf16 %v3757_v15  ;;  %v1389_v43 = vsel %vm1370_vm5, %v1356_v59, %v2291_v18  ;;  %v1390_v1 = vsel %vm1370_vm5, %v1357_v5, %v2292_v31  ;;  %v2346_v14 = vunpack.i.l.bf16 %v3757_v15 }
 0x104   : > { %2654 = vrot.lane.b32.xlu0 %v4470_v19, %s2738_s22  ;;  %v3830_v56 = vpop.permute.xlu1 %2379  ;;  %v2361_v30 = vunpack.i.l.bf16 %v3773_v22  ;;  %v1387_v34 = vsel %vm1370_vm5, %v1354_v50, %v2286_v28  ;;  %v1388_v44 = vsel %vm1370_vm5, %v1355_v61, %v2287_v20  ;;  %v2362_v16 = vunpack.i.h.bf16 %v3773_v22 }
 0x105   : > { %v2356_v46 = vunpack.i.l.bf16 %v3787_v45  ;;  %v4473_v21 = vpack.i.bf16 %v3675_v48, %v3673_v57  ;;  %v1406_v5 = vsel %vm1403_vm6, %v1373_v47, %v2331_v58  ;;  %v1407_v15 = vsel %vm1403_vm6, %v1374_v12, %v2332_v9  ;;  %v4474_v57 = vld [vmem:[#allocation30_spill] sm:$0xff] }
 0x106   : > { %v3840_v33 = vpop.permute.xlu0 %2374  ;;  %2669 = vrot.lane.b32.xlu1 %v4471_v3, %s2739_s27  ;;  %v1404_v59 = vsel %vm1403_vm6, %v1371_v55, %v2326_v0  ;;  %v1405_v50 = vsel %vm1403_vm6, %v1372_v13, %v2327_v24  ;;  %v1420_v61 = vsel %vm1403_vm6, %v1387_v34, %v2342_v54  ;;  %v1423_v22 = vsel %vm1403_vm6, %v1390_v1, %v2351_v49 }
 0x107   : > { %v1422_v31 = vsel %vm1403_vm6, %v1389_v43, %v2347_v42  ;;  %v2357_v18 = vunpack.i.h.bf16 %v3787_v45  ;;  %v1421_v47 = vsel %vm1403_vm6, %v1388_v44, %v2346_v14  ;;  %v1453_v12 = vsel %vm1436_vm7, %v1420_v61, %v2361_v30 }
 0x108   : > { %2664 = vrot.lane.b32.xlu0 %v4472_v60, %s2739_s27  ;;  %v2390_v39 = vpop.permute.xlu1 %2389  ;;  %v2372_v55 = vunpack.i.h.bf16 %v3800_v40  ;;  %v2371_v20 = vunpack.i.l.bf16 %v3800_v40  ;;  %v1454_v28 = vsel %vm1436_vm7, %v1421_v47, %v2362_v16  ;;  %v1437_v3 = vsel %vm1436_vm7, %v1404_v59, %v2356_v46 }
 0x109   : > { %v2367_v9 = vunpack.i.h.bf16 %v3816_v32  ;;  %v2366_v45 = vunpack.i.l.bf16 %v3816_v32  ;;  %v2382_v24 = vunpack.i.h.bf16 %v3830_v56  ;;  %v2381_v0 = vunpack.i.l.bf16 %v3830_v56 }
 0x10a   : > { %v2385_v17 = vpop.permute.xlu0 %2384  ;;  %2679 = vrot.lane.b32.xlu1 %v4473_v21, %s2739_s27  ;;  %v2377_v13 = vunpack.i.h.bf16 %v3840_v33  ;;  %v2376_v40 = vunpack.i.l.bf16 %v3840_v33  ;;  %v1438_v54 = vsel %vm1436_vm7, %v1405_v50, %v2357_v18  ;;  %v2392_v49 = vunpack.i.h.bf16 %v2390_v39  ;;  %v4476_v50 = vld [vmem:[#allocation26_spill] sm:$0xff] }
 0x10b   : > { %v2391_v42 = vunpack.i.l.bf16 %v2390_v39  ;;  %v2386_v60 = vunpack.i.l.bf16 %v2385_v17  ;;  %v1456_v43 = vsel %vm1436_vm7, %v1423_v22, %v2372_v55  ;;  %v2387_v1 = vunpack.i.h.bf16 %v2385_v17 }
 0x10c   : > { %2674 = vrot.lane.b32.xlu0 %v4474_v57, %s2739_s27  ;;  %v2400_v48 = vpop.permute.xlu1 %2399  ;;  %v1439_v14 = vsel %vm1436_vm7, %v1406_v5, %v2366_v45  ;;  %v1440_v33 = vsel %vm1436_vm7, %v1407_v15, %v2367_v9  ;;  %v4475_v39 = vpack.i.bf16 %v3736_v35, %v3728_v4  ;;  %v1487_v16 = vsel %vm1469_vm8, %v1454_v28, %v2382_v24 }
 0x10d   : > { %v2401_v56 = vunpack.i.l.bf16 %v2400_v48  ;;  %v2402_v30 = vunpack.i.h.bf16 %v2400_v48  ;;  %v1470_v46 = vsel %vm1469_vm8, %v1437_v3, %v2376_v40  ;;  %v1471_v17 = vsel %vm1469_vm8, %v1438_v54, %v2377_v13 }
 0x10e   : > { %v2395_v58 = vpop.permute.xlu0 %2394  ;;  %2689 = vrot.lane.b32.xlu1 %v4455_v52, %s2740_s28  ;;  %v1455_v52 = vsel %vm1436_vm7, %v1422_v31, %v2371_v20  ;;  %v1489_v5 = vsel %vm1469_vm8, %v1456_v43, %v2392_v49  ;;  %v1472_v15 = vsel %vm1469_vm8, %v1439_v14, %v2386_v60  ;;  %v1473_v35 = vsel %vm1469_vm8, %v1440_v33, %v2387_v1 }
 0x10f   : > { %v2396_v34 = vunpack.i.l.bf16 %v2395_v58  ;;  %v1488_v21 = vsel %vm1469_vm8, %v1455_v52, %v2391_v42  ;;  %v2397_v59 = vunpack.i.h.bf16 %v2395_v58 }
 0x110   : > { %2684 = vrot.lane.b32.xlu0 %v4460_v6, %s2740_s28  ;;  %v2410_v32 = vpop.permute.xlu1 %2409  ;;  %v1486_v6 = vsel %vm1469_vm8, %v1453_v12, %v2381_v0  ;;  %v1520_v12 = vsel %vm1502_vm9, %v1487_v16, %v2402_v30 }
 0x111   : > { %v1519_v31 = vsel %vm1502_vm9, %v1486_v6, %v2401_v56  ;;  %v2412_v18 = vunpack.i.h.bf16 %v2410_v32  ;;  %v2411_v57 = vunpack.i.l.bf16 %v2410_v32  ;;  %v1503_v47 = vsel %vm1502_vm9, %v1470_v46, %v2396_v34  ;;  %v4478_v34 = vld [vmem:[#allocation39_spill] sm:$0xff] }
 0x112   : > { %v2405_v44 = vpop.permute.xlu0 %2404  ;;  %2699 = vrot.lane.b32.xlu1 %v4475_v39, %s2740_s28  ;;  %v1504_v24 = vsel %vm1502_vm9, %v1471_v17, %v2397_v59  ;;  %v4477_v32 = vpack.i.bf16 %v3783_v2, %v3780_v63  ;;  %v2102_v17 = vunpack.i.h.bf16 %v3388_v53 }
 0x113   : > { %v2407_v9 = vunpack.i.h.bf16 %v2405_v44  ;;  %v2406_v45 = vunpack.i.l.bf16 %v2405_v44  ;;  %v1521_v49 = vsel %vm1502_vm9, %v1488_v21, %v2411_v57  ;;  %v1522_v42 = vsel %vm1502_vm9, %v1489_v5, %v2412_v18  ;;  %v4479_v21 = vld [vmem:[#allocation13_spill] sm:$0xff] }
 0x114   : > { %2694 = vrot.lane.b32.xlu0 %v4476_v50, %s2740_s28  ;;  %v2420_v4 = vpop.permute.xlu1 %2419  ;;  %v2142_v5 = vunpack.i.h.bf16 %v4479_v21  ;;  %v2141_v59 = vunpack.i.l.bf16 %v4479_v21  ;;  %v4480_v50 = vld [vmem:[#allocation22_spill] sm:$0xff]  ;;  %v4482_v57 = vld [vmem:[#allocation25_spill] sm:$0xff] }
 0x115   : > { %v2422_v61 = vunpack.i.h.bf16 %v2420_v4  ;;  %v2421_v22 = vunpack.i.l.bf16 %v2420_v4  ;;  %v1505_v14 = vsel %vm1502_vm9, %v1472_v15, %v2406_v45  ;;  %v1506_v33 = vsel %vm1502_vm9, %v1473_v35, %v2407_v9  ;;  %v4486_v9 = vld [vmem:[#allocation32_spill] sm:$0xff] }
 0x116   : > { %v2415_v48 = vpop.permute.xlu0 %2414  ;;  %2709 = vrot.lane.b32.xlu1 %v4469_v8, %s2741_s29  ;;  %v2137_v4 = vunpack.i.h.bf16 %v4480_v50  ;;  %v2136_v35 = vunpack.i.l.bf16 %v4480_v50  ;;  %v1328_v53 = vsel %vm1304_vm3, %v4482_v57, %v2142_v5  ;;  %v2217_v45 = vunpack.i.h.bf16 %v4486_v9 }
 0x117   : > { %v2417_v55 = vunpack.i.h.bf16 %v2415_v48  ;;  %v2416_v20 = vunpack.i.l.bf16 %v2415_v48  ;;  %v1552_v28 = vsel %vm1535_vm10, %v1519_v31, %v2421_v22  ;;  %v1553_v3 = vsel %vm1535_vm10, %v1520_v12, %v2422_v61  ;;  %v4481_v31 = vld [vmem:[#allocation6_spill] sm:$0xff]  ;;  %v4483_v48 = vld [vmem:[#allocation35_spill] sm:$0xff] }
 0x118   : > { %2704 = vrot.lane.b32.xlu0 %v4470_v19, %s2741_s29  ;;  %v2430_v58 = vpop.permute.xlu1 %2429  ;;  %v1576_v0 = vpack.c.bf16 %v1553_v3, %v1552_v28  ;;  %v2182_v61 = vunpack.i.h.bf16 %v3455_v23  ;;  %v1312_v18 = vsel %vm1304_vm3, %v4481_v31, %v2102_v17  ;;  %v2221_v12 = vunpack.i.l.bf16 %v4483_v48  ;;  %v4485_v3 = vld [vmem:[#allocation28_spill] sm:$0xff] }
 0x119   : > { %v2432_v8 = vunpack.i.h.bf16 %v2430_v58  ;;  %v2431_v13 = vunpack.i.l.bf16 %v2430_v58  ;;  %v1536_v40 = vsel %vm1535_vm10, %v1503_v47, %v2416_v20  ;;  %v1537_v54 = vsel %vm1535_vm10, %v1504_v24, %v2417_v55  ;;  %v4484_v20 = vld [vmem:[#allocation23_spill] sm:$0xff] }
 0x11a   : > { %v2425_v60 = vpop.permute.xlu0 %2424  ;;  %2719 = vrot.lane.b32.xlu1 %v4477_v32, %s2741_s29  ;;  %v1568_v19 = vpack.c.bf16 %v1537_v54, %v1536_v40  ;;  %2041 = vmatprep.mubr.msk.bf16.mxu1 %vm1611_vm11, %v1576_v0  ;;  %v2222_v47 = vunpack.i.h.bf16 %v4483_v48  ;;  %v1327_v28 = vsel %vm1304_vm3, %v4484_v20, %v2141_v59  ;;  %v1326_v23 = vsel %vm1304_vm3, %v4485_v3, %v2137_v4  ;;  %v4487_v24 = vld [vmem:[#allocation27_spill] sm:$0xff] }
 0x11b   : > { %v1554_v52 = vsel %vm1535_vm10, %v1521_v49, %v2431_v13  ;;  %v1555_v43 = vsel %vm1535_vm10, %v1522_v42, %v2432_v8  ;;  %v2427_v1 = vunpack.i.h.bf16 %v2425_v60  ;;  %v2426_v56 = vunpack.i.l.bf16 %v2425_v60 }
 0x11c   : > { %v1577_v30 = vpack.c.bf16 %v1555_v43, %v1554_v52  ;;  %2714 = vrot.lane.b32.xlu0 %v4478_v34, %s2741_s29  ;;  %2025 = vmatprep.mubr.msk.bf16.mxu0 %vm1611_vm11, %v1568_v19  ;;  %v2440_v63 = vpop.permute.xlu1 %2439  ;;  %v2216_v58 = vunpack.i.l.bf16 %v4486_v9  ;;  %v1325_v0 = vsel %vm1304_vm3, %v4487_v24, %v2136_v35  ;;  %v1345_v8 = vsel %vm1337_vm4, %v1312_v18, %v2182_v61 }
 0x11d   : > { %v1538_v2 = vsel %vm1535_vm10, %v1505_v14, %v2426_v56  ;;  %v1539_v44 = vsel %vm1535_vm10, %v1506_v33, %v2427_v1  ;;  %v2262_v13 = vunpack.i.h.bf16 %v3541_v27  ;;  %v2296_v40 = vunpack.i.l.bf16 %v3631_v26 }
 0x11e   : > { %v1569_v39 = vpack.c.bf16 %v1539_v44, %v1538_v2  ;;  %v2435_v6 = vpop.permute.xlu0 %2434  ;;  %2042 = vmatmul.mubr.msk.bf16.vlgmr.msra.gmra.mrb[0].mxu1 %vm1611_vm11, %v1577_v30  ;;  %v2302_v49 = vunpack.i.h.bf16 %v3623_v51  ;;  %v2301_v42 = vunpack.i.l.bf16 %v3623_v51  ;;  %v2297_v60 = vunpack.i.h.bf16 %v3631_v26 }
 0x11f   : > { %v2352_v32 = vunpack.i.h.bf16 %v3747_v29  ;;  %v1361_v19 = vsel %vm1337_vm4, %v1328_v53, %v2222_v47  ;;  %v1360_v52 = vsel %vm1337_vm4, %v1327_v28, %v2221_v12  ;;  %v2442_v43 = vunpack.i.h.bf16 %v2440_v63 }
 0x120   : > { %2026 = vmatmul.mubr.msk.bf16.vlgmr.msra.gmra.mrb[0].mxu0 %vm1611_vm11, %v1569_v39  ;;  %v2450_v16 = vpop.permute.xlu1 %2449  ;;  %v2441_v1 = vunpack.i.l.bf16 %v2440_v63  ;;  %v1358_v27 = vsel %vm1337_vm4, %v1325_v0, %v2216_v58  ;;  %v1359_v14 = vsel %vm1337_vm4, %v1326_v23, %v2217_v45  ;;  %v2437_v33 = vunpack.i.h.bf16 %v2435_v6 }
 0x121   : > { %v2436_v30 = vunpack.i.l.bf16 %v2435_v6  ;;  %v1378_v34 = vsel %vm1370_vm5, %v1345_v8, %v2262_v13  ;;  %v1391_v51 = vsel %vm1370_vm5, %v1358_v27, %v2296_v40  ;;  %v2452_v26 = vunpack.i.h.bf16 %v2450_v16 }
 0x122   : > { %v3941_v46 = vpop.permute.xlu0 %2444  ;;  %v2451_v2 = vunpack.i.l.bf16 %v2450_v16  ;;  %v1393_v44 = vsel %vm1370_vm5, %v1360_v52, %v2301_v42  ;;  %v1394_v39 = vsel %vm1370_vm5, %v1361_v19, %v2302_v49  ;;  %v1392_v63 = vsel %vm1370_vm5, %v1359_v14, %v2297_v60 }
 0x123   : > { %v1424_v17 = vsel %vm1403_vm6, %v1391_v51, %v2352_v32  ;;  %v1426_v21 = vsel %vm1403_vm6, %v1393_v44, %v2441_v1  ;;  %v1427_v6 = vsel %vm1403_vm6, %v1394_v39, %v2442_v43  ;;  %v2447_v5 = vunpack.i.h.bf16 %v3941_v46 }
 0x124   : > { %v3945_v15 = vpop.permute.xlu1 %2459  ;;  %v2446_v59 = vunpack.i.l.bf16 %v3941_v46  ;;  %v1411_v16 = vsel %vm1403_vm6, %v1378_v34, %v2437_v33  ;;  %v1425_v4 = vsel %vm1403_vm6, %v1392_v63, %v2436_v30  ;;  %v1457_v31 = vsel %vm1436_vm7, %v1424_v17, %v2451_v2 }
 0x125   : > { %v2462_v35 = vunpack.i.h.bf16 %v3945_v15  ;;  %v2461_v61 = vunpack.i.l.bf16 %v3945_v15  ;;  %v1458_v18 = vsel %vm1436_vm7, %v1425_v4, %v2452_v26  ;;  %v1442_v15 = vsel %vm1436_vm7, %v3754_v7, %v2447_v5 }
 0x126   : > { %v3951_v22 = vpop.permute.xlu0 %2454  ;;  %v1441_v28 = vsel %vm1436_vm7, %v3751_v38, %v2446_v59 }
 0x127   : > { %v2457_v57 = vunpack.i.h.bf16 %v3951_v22  ;;  %v2456_v53 = vunpack.i.l.bf16 %v3951_v22  ;;  %v1459_v45 = vsel %vm1436_vm7, %v1426_v21, %v2461_v61  ;;  %v1460_v22 = vsel %vm1436_vm7, %v1427_v6, %v2462_v35 }
 0x128   : > { %v3959_v55 = vpop.permute.xlu1 %2469 }
 0x129   : > { %v2472_v46 = vunpack.i.h.bf16 %v3959_v55  ;;  %v2471_v47 = vunpack.i.l.bf16 %v3959_v55  ;;  %v1443_v55 = vsel %vm1436_vm7, %v3740_v10, %v2456_v53  ;;  %v1444_v0 = vsel %vm1436_vm7, %v1411_v16, %v2457_v57 }
 0x12a   : > { %v2465_v54 = vpop.permute.xlu0 %2464 }
 0x12b   : > { %v2467_v12 = vunpack.i.h.bf16 %v2465_v54  ;;  %v2466_v20 = vunpack.i.l.bf16 %v2465_v54  ;;  %v1490_v7 = vsel %vm1469_vm8, %v1457_v31, %v2471_v47  ;;  %v1491_v40 = vsel %vm1469_vm8, %v1458_v18, %v2472_v46 }
 0x12c   : > { %v2480_v56 = vpop.permute.xlu1 %2479 }
 0x12d   : > { %v2482_v3 = vunpack.i.h.bf16 %v2480_v56  ;;  %v2481_v23 = vunpack.i.l.bf16 %v2480_v56  ;;  %v1474_v54 = vsel %vm1469_vm8, %v1441_v28, %v2466_v20  ;;  %v1475_v49 = vsel %vm1469_vm8, %v1442_v15, %v2467_v12 }
 0x12e   : > { %v3982_v29 = vpop.permute.xlu0 %2474 }
 0x12f   : > { %v2476_v58 = vunpack.i.l.bf16 %v3982_v29  ;;  %v1492_v42 = vsel %vm1469_vm8, %v1459_v45, %v2481_v23  ;;  %v1493_v60 = vsel %vm1469_vm8, %v1460_v22, %v2482_v3  ;;  %v2477_v32 = vunpack.i.h.bf16 %v3982_v29 }
 0x130   : > { %v2490_v50 = vpop.permute.xlu1 %2489 }
 0x131   : > { %v2491_v24 = vunpack.i.l.bf16 %v2490_v50  ;;  %v2492_v8 = vunpack.i.h.bf16 %v2490_v50  ;;  %v1476_v52 = vsel %vm1469_vm8, %v1443_v55, %v2476_v58  ;;  %v1477_v16 = vsel %vm1469_vm8, %v1444_v0, %v2477_v32 }
 0x132   : > { %v2485_v48 = vpop.permute.xlu0 %2484 }
 0x133   : > { %v2486_v38 = vunpack.i.l.bf16 %v2485_v48  ;;  %v2487_v10 = vunpack.i.h.bf16 %v2485_v48  ;;  %v1523_v43 = vsel %vm1502_vm9, %v1490_v7, %v2491_v24  ;;  %v1524_v27 = vsel %vm1502_vm9, %v1491_v40, %v2492_v8 }
 0x134   : > { %v2500_v9 = vpop.permute.xlu1 %2499 }
 0x135   : > { %v1507_v14 = vsel %vm1502_vm9, %v1474_v54, %v2486_v38  ;;  %v2502_v33 = vunpack.i.h.bf16 %v2500_v9  ;;  %v2501_v30 = vunpack.i.l.bf16 %v2500_v9  ;;  %v1508_v44 = vsel %vm1502_vm9, %v1475_v49, %v2487_v10 }
 0x136   : > { %v2495_v13 = vpop.permute.xlu0 %2494 }
 0x137   : > { %v2497_v39 = vunpack.i.h.bf16 %v2495_v13  ;;  %v2496_v63 = vunpack.i.l.bf16 %v2495_v13  ;;  %v1525_v4 = vsel %vm1502_vm9, %v1492_v42, %v2501_v30  ;;  %v1526_v35 = vsel %vm1502_vm9, %v1493_v60, %v2502_v33 }
 0x138   : > { %v2510_v19 = vpop.permute.xlu1 %2509 }
 0x139   : > { %v2512_v1 = vunpack.i.h.bf16 %v2510_v19  ;;  %v2511_v56 = vunpack.i.l.bf16 %v2510_v19  ;;  %v1509_v46 = vsel %vm1502_vm9, %v1476_v52, %v2496_v63  ;;  %v1510_v47 = vsel %vm1502_vm9, %v1477_v16, %v2497_v39 }
 0x13a   : > { %v2505_v34 = vpop.permute.xlu0 %2504 }
 0x13b   : > { %v1556_v51 = vsel %vm1535_vm10, %v1523_v43, %v2511_v56  ;;  %v1557_v26 = vsel %vm1535_vm10, %v1524_v27, %v2512_v1  ;;  %v2507_v2 = vunpack.i.h.bf16 %v2505_v34  ;;  %v2506_v29 = vunpack.i.l.bf16 %v2505_v34 }
 0x13c   : > { %v1578_v17 = vpack.c.bf16 %v1557_v26, %v1556_v51  ;;  %v2520_v21 = vpop.permute.xlu1 %2519  ;;  %v4488_v26 = vld [vmem:[#allocation15_spill] sm:$0xff] }
 0x13d   : > { %v1540_v6 = vsel %vm1535_vm10, %v1507_v14, %v2506_v29  ;;  %v1541_v5 = vsel %vm1535_vm10, %v1508_v44, %v2507_v2  ;;  %v2522_v59 = vunpack.i.h.bf16 %v2520_v21  ;;  %v2521_v50 = vunpack.i.l.bf16 %v2520_v21  ;;  %v4489_v2 = vld [vmem:[#allocation37_spill] sm:$0xff] }
 0x13e   : > { %v1570_v61 = vpack.c.bf16 %v1541_v5, %v1540_v6  ;;  %v2515_v31 = vpop.permute.xlu0 %2514  ;;  %2045 = vmatprep.mubr.msk.bf16.mxu1 %vm1611_vm11, %v1578_v17 }
 0x13f   : > { %v1558_v18 = vsel %vm1535_vm10, %v1525_v4, %v2521_v50  ;;  %v1559_v57 = vsel %vm1535_vm10, %v1526_v35, %v2522_v59  ;;  %v2517_v53 = vunpack.i.h.bf16 %v2515_v31  ;;  %v2516_v48 = vunpack.i.l.bf16 %v2515_v31 }
 0x140   : > { %v1579_v12 = vpack.c.bf16 %v1559_v57, %v1558_v18  ;;  %2029 = vmatprep.mubr.msk.bf16.mxu0 %vm1611_vm11, %v1570_v61  ;;  %v2530_v20 = vpop.permute.xlu1 %2529 }
 0x141   : > { %v1542_v28 = vsel %vm1535_vm10, %v1509_v46, %v2516_v48  ;;  %v1543_v15 = vsel %vm1535_vm10, %v1510_v47, %v2517_v53  ;;  %v2532_v38 = vunpack.i.h.bf16 %v2530_v20  ;;  %v2531_v13 = vunpack.i.l.bf16 %v2530_v20 }
 0x142   : > { %v1571_v3 = vpack.c.bf16 %v1543_v15, %v1542_v28  ;;  %v2525_v23 = vpop.permute.xlu0 %2524  ;;  %2046 = vmatmul.mubr.msk.bf16.gmra.mrb[4].mxu1 %vm1611_vm11, %v1579_v12 }
 0x143   : > { %v2527_v7 = vunpack.i.h.bf16 %v2525_v23  ;;  %v2526_v40 = vunpack.i.l.bf16 %v2525_v23  ;;  %v1428_v43 = vsel %vm1403_vm6, %v3666_v62, %v2531_v13  ;;  %v1429_v1 = vsel %vm1403_vm6, %v3669_v25, %v2532_v38 }
 0x144   : > { %2030 = vmatmul.mubr.msk.bf16.gmra.mrb[4].mxu0 %vm1611_vm11, %v1571_v3  ;;  %v2540_v9 = vpop.permute.xlu1 %2539 }
 0x145   : > { %v2542_v54 = vunpack.i.h.bf16 %v2540_v9  ;;  %v2541_v49 = vunpack.i.l.bf16 %v2540_v9  ;;  %v1412_v56 = vsel %vm1403_vm6, %v3586_v36, %v2526_v40  ;;  %v1413_v27 = vsel %vm1403_vm6, %v3589_v41, %v2527_v7 }
 0x146   : > { %v2535_v45 = vpop.permute.xlu0 %2534 }
 0x147   : > { %v2537_v60 = vunpack.i.h.bf16 %v2535_v45  ;;  %v2536_v32 = vunpack.i.l.bf16 %v2535_v45  ;;  %v1430_v14 = vsel %vm1403_vm6, %v3652_v37, %v2541_v49  ;;  %v1431_v33 = vsel %vm1403_vm6, %v3655_v11, %v2542_v54 }
 0x148   : > { %v2550_v22 = vpop.permute.xlu1 %2549 }
 0x149   : > { %v2552_v10 = vunpack.i.h.bf16 %v2550_v22  ;;  %v2551_v19 = vunpack.i.l.bf16 %v2550_v22  ;;  %v1415_v62 = vsel %vm1403_vm6, %v4488_v26, %v2537_v60  ;;  %v1414_v25 = vsel %vm1403_vm6, %v4489_v2, %v2536_v32 }
 0x14a   : > { %v2545_v58 = vpop.permute.xlu0 %2544 }
 0x14b   : > { %v2547_v30 = vunpack.i.h.bf16 %v2545_v58  ;;  %v2546_v34 = vunpack.i.l.bf16 %v2545_v58  ;;  %v1461_v44 = vsel %vm1436_vm7, %v1428_v43, %v2551_v19  ;;  %v1462_v41 = vsel %vm1436_vm7, %v1429_v1, %v2552_v10 }
 0x14c   : > { %v2560_v24 = vpop.permute.xlu1 %2559 }
 0x14d   : > { %v2562_v29 = vunpack.i.h.bf16 %v2560_v24  ;;  %v2561_v36 = vunpack.i.l.bf16 %v2560_v24  ;;  %v1445_v5 = vsel %vm1436_vm7, %v1412_v56, %v2546_v34  ;;  %v1446_v59 = vsel %vm1436_vm7, %v1413_v27, %v2547_v30 }
 0x14e   : > { %v2555_v55 = vpop.permute.xlu0 %2554 }
 0x14f   : > { %v2557_v39 = vunpack.i.h.bf16 %v2555_v55  ;;  %v2556_v37 = vunpack.i.l.bf16 %v2555_v55  ;;  %v1463_v35 = vsel %vm1436_vm7, %v1430_v14, %v2561_v36  ;;  %v1464_v61 = vsel %vm1436_vm7, %v1431_v33, %v2562_v29 }
 0x150   : > { %v2570_v0 = vpop.permute.xlu1 %2569 }
 0x151   : > { %v2572_v17 = vunpack.i.h.bf16 %v2570_v0  ;;  %v2571_v11 = vunpack.i.l.bf16 %v2570_v0  ;;  %v1447_v57 = vsel %vm1436_vm7, %v1414_v25, %v2556_v37  ;;  %v1448_v53 = vsel %vm1436_vm7, %v1415_v62, %v2557_v39 }
 0x152   : > { %v2565_v8 = vpop.permute.xlu0 %2564 }
 0x153   : > { %v2567_v21 = vunpack.i.h.bf16 %v2565_v8  ;;  %v2566_v6 = vunpack.i.l.bf16 %v2565_v8  ;;  %v1494_v12 = vsel %vm1469_vm8, %v1461_v44, %v2571_v11  ;;  %v1495_v20 = vsel %vm1469_vm8, %v1462_v41, %v2572_v17 }
 0x154   : > { %v2580_v42 = vpop.permute.xlu1 %2579 }
 0x155   : > { %v2582_v50 = vunpack.i.h.bf16 %v2580_v42  ;;  %v2581_v16 = vunpack.i.l.bf16 %v2580_v42  ;;  %v1478_v28 = vsel %vm1469_vm8, %v1445_v5, %v2566_v6  ;;  %v1479_v15 = vsel %vm1469_vm8, %v1446_v59, %v2567_v21 }
 0x156   : > { %v4041_v52 = vpop.permute.xlu0 %2574 }
 0x157   : > { %v2576_v31 = vunpack.i.l.bf16 %v4041_v52  ;;  %v1496_v3 = vsel %vm1469_vm8, %v1463_v35, %v2581_v16  ;;  %v1497_v23 = vsel %vm1469_vm8, %v1464_v61, %v2582_v50  ;;  %v2577_v9 = vunpack.i.h.bf16 %v4041_v52 }
 0x158   : > { %v2590_v51 = vpop.permute.xlu1 %2589 }
 0x159   : > { %v2591_v18 = vunpack.i.l.bf16 %v2590_v51  ;;  %v2592_v48 = vunpack.i.h.bf16 %v2590_v51  ;;  %v1480_v58 = vsel %vm1469_vm8, %v1447_v57, %v2576_v31  ;;  %v1481_v33 = vsel %vm1469_vm8, %v1448_v53, %v2577_v9  ;;  %v4491_v9 = vld [vmem:[#allocation44_spill] sm:$0xff] }
 0x15a   : > { %v2585_v63 = vpop.permute.xlu0 %2584 }
 0x15b   : > { %v2586_v46 = vunpack.i.l.bf16 %v2585_v63  ;;  %v2587_v45 = vunpack.i.h.bf16 %v2585_v63  ;;  %v1527_v24 = vsel %vm1502_vm9, %v1494_v12, %v2591_v18  ;;  %v1528_v8 = vsel %vm1502_vm9, %v1495_v20, %v2592_v48 }
 0x15c   : > { %v2600_v4 = vpop.permute.xlu1 %2599 }
 0x15d   : > { %v1511_v38 = vsel %vm1502_vm9, %v1478_v28, %v2586_v46  ;;  %v2602_v13 = vunpack.i.h.bf16 %v2600_v4  ;;  %v2601_v7 = vunpack.i.l.bf16 %v2600_v4  ;;  %v1512_v32 = vsel %vm1502_vm9, %v1479_v15, %v2587_v45 }
 0x15e   : > { %v2595_v47 = vpop.permute.xlu0 %2594 }
 0x15f   : > { %v2597_v10 = vunpack.i.h.bf16 %v2595_v47  ;;  %v2596_v19 = vunpack.i.l.bf16 %v2595_v47  ;;  %v1529_v30 = vsel %vm1502_vm9, %v1496_v3, %v2601_v7  ;;  %v1530_v34 = vsel %vm1502_vm9, %v1497_v23, %v2602_v13  ;;  %v4490_v3 = vld [vmem:[#allocation43_spill] sm:$0xff] }
 0x160   : > { %v2610_v22 = vpop.permute.xlu1 %2609 }
 0x161   : > { %v2612_v55 = vunpack.i.h.bf16 %v2610_v22  ;;  %v2611_v0 = vunpack.i.l.bf16 %v2610_v22  ;;  %v1513_v36 = vsel %vm1502_vm9, %v1480_v58, %v2596_v19  ;;  %v1514_v44 = vsel %vm1502_vm9, %v1481_v33, %v2597_v10  ;;  %v4492_v22 = vld [vmem:[#allocation21_spill] sm:$0xff] }
 0x162   : > { %v2605_v40 = vpop.permute.xlu0 %2604 }
 0x163   : > { %v1560_v54 = vsel %vm1535_vm10, %v1527_v24, %v2611_v0  ;;  %v1561_v49 = vsel %vm1535_vm10, %v1528_v8, %v2612_v55  ;;  %v2607_v42 = vunpack.i.h.bf16 %v2605_v40  ;;  %v2606_v60 = vunpack.i.l.bf16 %v2605_v40  ;;  %v4493_v24 = vld [vmem:[#allocation41_spill] sm:$0xff]  ;;  %v4494_v0 = vld [vmem:[#allocation19_spill] sm:$0xff] }
 0x164   : > { %v1580_v52 = vpack.c.bf16 %v1561_v49, %v1560_v54  ;;  %v2620_v43 = vpop.permute.xlu1 %2619  ;;  %v4496_v49 = vld [vmem:[#allocation12_spill] sm:$0xff] }
 0x165   : > { %v1544_v1 = vsel %vm1535_vm10, %v1511_v38, %v2606_v60  ;;  %v1545_v56 = vsel %vm1535_vm10, %v1512_v32, %v2607_v42  ;;  %v2622_v27 = vunpack.i.h.bf16 %v2620_v43  ;;  %v2621_v14 = vunpack.i.l.bf16 %v2620_v43  ;;  %v4495_v38 = vld [vmem:[#allocation42_spill] sm:$0xff]  ;;  %v4497_v60 = vld [vmem:[#allocation36_spill] sm:$0xff] }
 0x166   : > { %v1572_v51 = vpack.c.bf16 %v1545_v56, %v1544_v1  ;;  %v2615_v26 = vpop.permute.xlu0 %2614  ;;  %2049 = vmatprep.mubr.msk.bf16.mxu1 %vm1611_vm11, %v1580_v52 }
 0x167   : > { %v1562_v62 = vsel %vm1535_vm10, %v1529_v30, %v2621_v14  ;;  %v1563_v2 = vsel %vm1535_vm10, %v1530_v34, %v2622_v27  ;;  %v2617_v25 = vunpack.i.h.bf16 %v2615_v26  ;;  %v2616_v29 = vunpack.i.l.bf16 %v2615_v26 }
 0x168   : > { %v1581_v41 = vpack.c.bf16 %v1563_v2, %v1562_v62  ;;  %2033 = vmatprep.mubr.msk.bf16.mxu0 %vm1611_vm11, %v1572_v51  ;;  %v2630_v39 = vpop.permute.xlu1 %2629 }
 0x169   : > { %v1546_v37 = vsel %vm1535_vm10, %v1513_v36, %v2616_v29  ;;  %v1547_v63 = vsel %vm1535_vm10, %v1514_v44, %v2617_v25  ;;  %v2632_v61 = vunpack.i.h.bf16 %v2630_v39  ;;  %v2631_v31 = vunpack.i.l.bf16 %v2630_v39 }
 0x16a   : > { %v1573_v17 = vpack.c.bf16 %v1547_v63, %v1546_v37  ;;  %v2625_v11 = vpop.permute.xlu0 %2624  ;;  %2050 = vmatmul.mubr.msk.bf16.gmra.mrb[8].mxu1 %vm1611_vm11, %v1581_v41 }
 0x16b   : > { %v2627_v18 = vunpack.i.h.bf16 %v2625_v11  ;;  %v2626_v57 = vunpack.i.l.bf16 %v2625_v11  ;;  %v1432_v23 = vsel %vm1403_vm6, %v4490_v3, %v2631_v31  ;;  %v1433_v45 = vsel %vm1403_vm6, %v4491_v9, %v2632_v61 }
 0x16c   : > { %2034 = vmatmul.mubr.msk.bf16.gmra.mrb[8].mxu0 %vm1611_vm11, %v1573_v17  ;;  %v2640_v21 = vpop.permute.xlu1 %2639 }
 0x16d   : > { %v2642_v53 = vunpack.i.h.bf16 %v2640_v21  ;;  %v2641_v48 = vunpack.i.l.bf16 %v2640_v21  ;;  %v1416_v58 = vsel %vm1403_vm6, %v4492_v22, %v2626_v57  ;;  %v1417_v55 = vsel %vm1403_vm6, %v4493_v24, %v2627_v18 }
 0x16e   : > { %v2635_v6 = vpop.permute.xlu0 %2634 }
 0x16f   : > { %v2637_v47 = vunpack.i.h.bf16 %v2635_v6  ;;  %v2636_v12 = vunpack.i.l.bf16 %v2635_v6  ;;  %v1434_v8 = vsel %vm1403_vm6, %v4494_v0, %v2641_v48  ;;  %v1435_v13 = vsel %vm1403_vm6, %v4495_v38, %v2642_v53 }
 0x170   : > { %v2650_v5 = vpop.permute.xlu1 %2649 }
 0x171   : > { %v2652_v20 = vunpack.i.h.bf16 %v2650_v5  ;;  %v2651_v28 = vunpack.i.l.bf16 %v2650_v5  ;;  %v1419_v42 = vsel %vm1403_vm6, %v4496_v49, %v2637_v47  ;;  %v1418_v32 = vsel %vm1403_vm6, %v4497_v60, %v2636_v12 }
 0x172   : > { %v2645_v59 = vpop.permute.xlu0 %2644 }
 0x173   : > { %v2647_v7 = vunpack.i.h.bf16 %v2645_v59  ;;  %v2646_v40 = vunpack.i.l.bf16 %v2645_v59  ;;  %v1465_v52 = vsel %vm1436_vm7, %v1432_v23, %v2651_v28  ;;  %v1466_v43 = vsel %vm1436_vm7, %v1433_v45, %v2652_v20 }
 0x174   : > { %v2660_v50 = vpop.permute.xlu1 %2659 }
 0x175   : > { %v2662_v10 = vunpack.i.h.bf16 %v2660_v50  ;;  %v2661_v19 = vunpack.i.l.bf16 %v2660_v50  ;;  %v1449_v51 = vsel %vm1436_vm7, %v1416_v58, %v2646_v40  ;;  %v1450_v26 = vsel %vm1436_vm7, %v1417_v55, %v2647_v7 }
 0x176   : > { %v2655_v16 = vpop.permute.xlu0 %2654 }
 0x177   : > { %v2657_v1 = vunpack.i.h.bf16 %v2655_v16  ;;  %v2656_v56 = vunpack.i.l.bf16 %v2655_v16  ;;  %v1467_v29 = vsel %vm1436_vm7, %v1434_v8, %v2661_v19  ;;  %v1468_v36 = vsel %vm1436_vm7, %v1435_v13, %v2662_v10 }
 0x178   : > { %v2670_v4 = vpop.permute.xlu1 %2669 }
 0x179   : > { %v2672_v14 = vunpack.i.h.bf16 %v2670_v4  ;;  %v2671_v33 = vunpack.i.l.bf16 %v2670_v4  ;;  %v1451_v39 = vsel %vm1436_vm7, %v1418_v32, %v2656_v56  ;;  %v1452_v37 = vsel %vm1436_vm7, %v1419_v42, %v2657_v1 }
 0x17a   : > { %v2665_v35 = vpop.permute.xlu0 %2664 }
 0x17b   : > { %v2667_v30 = vunpack.i.h.bf16 %v2665_v35  ;;  %v2666_v34 = vunpack.i.l.bf16 %v2665_v35  ;;  %v1498_v21 = vsel %vm1469_vm8, %v1465_v52, %v2671_v33  ;;  %v1499_v6 = vsel %vm1469_vm8, %v1466_v43, %v2672_v14  ;;  %v4157_v14 = vld [vmem:[%s4265_s2] ss:$0 sm:$0xff] }
 0x17c   : > { %v2680_v46 = vpop.permute.xlu1 %2679 }
 0x17d   : > { %v2682_v62 = vunpack.i.h.bf16 %v2680_v46  ;;  %v2681_v2 = vunpack.i.l.bf16 %v2680_v46  ;;  %v1482_v5 = vsel %vm1469_vm8, %v1449_v51, %v2666_v34  ;;  %v1483_v59 = vsel %vm1469_vm8, %v1450_v26, %v2667_v30 }
 0x17e   : > { %v4097_v15 = vpop.permute.xlu0 %2674 }
 0x17f   : > { %v2676_v44 = vunpack.i.l.bf16 %v4097_v15  ;;  %v1500_v50 = vsel %vm1469_vm8, %v1467_v29, %v2681_v2  ;;  %v1501_v16 = vsel %vm1469_vm8, %v1468_v36, %v2682_v62  ;;  %v2677_v4 = vunpack.i.h.bf16 %v4097_v15 }
 0x180   : > { %v2690_v54 = vpop.permute.xlu1 %2689 }
 0x181   : > { %v2691_v41 = vunpack.i.l.bf16 %v2690_v54  ;;  %v2692_v63 = vunpack.i.h.bf16 %v2690_v54  ;;  %v1484_v31 = vsel %vm1469_vm8, %v1451_v39, %v2676_v44  ;;  %v1485_v13 = vsel %vm1469_vm8, %v1452_v37, %v2677_v4 }
 0x182   : > { %v2685_v27 = vpop.permute.xlu0 %2684 }
 0x183   : > { %v2686_v17 = vunpack.i.l.bf16 %v2685_v27  ;;  %v2687_v35 = vunpack.i.h.bf16 %v2685_v27  ;;  %v1531_v18 = vsel %vm1502_vm9, %v1498_v21, %v2691_v41  ;;  %v1532_v48 = vsel %vm1502_vm9, %v1499_v6, %v2692_v63 }
 0x184   : > { %v2700_v25 = vpop.permute.xlu1 %2699 }
 0x185   : > { %v1515_v46 = vsel %vm1502_vm9, %v1482_v5, %v2686_v17  ;;  %v2702_v47 = vunpack.i.h.bf16 %v2700_v25  ;;  %v2701_v12 = vunpack.i.l.bf16 %v2700_v25  ;;  %v1516_v9 = vsel %vm1502_vm9, %v1483_v59, %v2687_v35 }
 0x186   : > { %v2695_v11 = vpop.permute.xlu0 %2694 }
 0x187   : > { %v2697_v45 = vunpack.i.h.bf16 %v2695_v11  ;;  %v2696_v22 = vunpack.i.l.bf16 %v2695_v11  ;;  %v1533_v7 = vsel %vm1502_vm9, %v1500_v50, %v2701_v12  ;;  %v1534_v40 = vsel %vm1502_vm9, %v1501_v16, %v2702_v47 }
 0x188   : > { %v2710_v61 = vpop.permute.xlu1 %2709 }
 0x189   : > { %v2712_v57 = vunpack.i.h.bf16 %v2710_v61  ;;  %v2711_v53 = vunpack.i.l.bf16 %v2710_v61  ;;  %v1517_v19 = vsel %vm1502_vm9, %v1484_v31, %v2696_v22  ;;  %v1518_v52 = vsel %vm1502_vm9, %v1485_v13, %v2697_v45 }
 0x18a   : > { %v2705_v20 = vpop.permute.xlu0 %2704 }
 0x18b   : > { %v1564_v28 = vsel %vm1535_vm10, %v1531_v18, %v2711_v53  ;;  %v1565_v3 = vsel %vm1535_vm10, %v1532_v48, %v2712_v57  ;;  %v2707_v15 = vunpack.i.h.bf16 %v2705_v20  ;;  %v2706_v23 = vunpack.i.l.bf16 %v2705_v20 }
 0x18c   : > { %v1582_v58 = vpack.c.bf16 %v1565_v3, %v1564_v28  ;;  %v2720_v24 = vpop.permute.xlu1 %2719 }
 0x18d   : > { %v1548_v55 = vsel %vm1535_vm10, %v1515_v46, %v2706_v23  ;;  %v1549_v0 = vsel %vm1535_vm10, %v1516_v9, %v2707_v15  ;;  %v2722_v8 = vunpack.i.h.bf16 %v2720_v24  ;;  %v2721_v38 = vunpack.i.l.bf16 %v2720_v24 }
 0x18e   : > { %v1574_v54 = vpack.c.bf16 %v1549_v0, %v1548_v55  ;;  %v2715_v49 = vpop.permute.xlu0 %2714  ;;  %2053 = vmatprep.mubr.msk.bf16.mxu1 %vm1611_vm11, %v1582_v58 }
 0x18f   : > { %v1566_v42 = vsel %vm1535_vm10, %v1533_v7, %v2721_v38  ;;  %v1567_v60 = vsel %vm1535_vm10, %v1534_v40, %v2722_v8  ;;  %v2717_v32 = vunpack.i.h.bf16 %v2715_v49  ;;  %v2716_v10 = vunpack.i.l.bf16 %v2715_v49 }
 0x190   : > { %v1583_v43 = vpack.c.bf16 %v1567_v60, %v1566_v42  ;;  %2037 = vmatprep.mubr.msk.bf16.mxu0 %vm1611_vm11, %v1574_v54 }
 0x191   : > { %v1550_v1 = vsel %vm1535_vm10, %v1517_v19, %v2716_v10  ;;  %v1551_v56 = vsel %vm1535_vm10, %v1518_v52, %v2717_v32 }
 0x192   : > { %v1575_v27 = vpack.c.bf16 %v1551_v56, %v1550_v1  ;;  %2054 = vmatmul.mubr.msk.bf16.gmra.mrb[12].mxu1 %vm1611_vm11, %v1583_v43 }
 0x194   : > { %2038 = vmatmul.mubr.msk.bf16.gmra.mrb[12].mxu0 %vm1611_vm11, %v1575_v27 }
 0x1f1   : > { %v2043_v33 = vpop.f32.mrb[0].mxu1 }
 0x1f2   : > { %v1771_v30 = vadd.f32 %v2043_v33, %v4157_v14  ;;  %v1762_v34 = vpop.f32.mrb[1].mxu1 }
 0x1f3   : > { %v2027_v51 = vpop.f32.mrb[0].mxu0  ;;  %v1763_v26 = vadd.f32 %v4157_v14, %v1762_v34  ;;  %v2044_v62 = vpop.f32.mrb[2].mxu1 }
 0x1f4   : > { %v1707_v2 = vadd.f32 %v2027_v51, %v4157_v14  ;;  %1843 = vst.msk [vmem:[%s4162_s8 + $0x90] sm:$0xff] %vm1304_vm3, %v1771_v30  ;;  %v1698_v25 = vpop.f32.mrb[1].mxu0  ;;  %v1774_v29 = vadd.f32 %v2044_v62, %v4157_v14  ;;  %v1765_v36 = vpop.f32.mrb[3].mxu1 }
 0x1f5   : > { %v1699_v44 = vadd.f32 %v4157_v14, %v1698_v25  ;;  %1841 = vst.msk [vmem:[%s4162_s8 + $0x80] sm:$0xff] %vm1304_vm3, %v1763_v26  ;;  %v2028_v41 = vpop.f32.mrb[2].mxu0  ;;  %v1766_v39 = vadd.f32 %v4157_v14, %v1765_v36 }
 0x1f6   : > { %1827 = vst.msk [vmem:[%s4162_s8 + $0x10] sm:$0xff] %vm1304_vm3, %v1707_v2  ;;  %v1710_v37 = vadd.f32 %v2028_v41, %v4157_v14  ;;  %1844 = vst.msk [vmem:[%s4162_s8 + $0x98] sm:$0xff] %vm1304_vm3, %v1774_v29  ;;  %v1701_v63 = vpop.f32.mrb[3].mxu0 }
 0x1f7   : > { %1825 = vst.msk [vmem:[%s4162_s8] sm:$0xff] %vm1304_vm3, %v1699_v44  ;;  %v1702_v17 = vadd.f32 %v4157_v14, %v1701_v63  ;;  %1842 = vst.msk [vmem:[%s4162_s8 + $0x88] sm:$0xff] %vm1304_vm3, %v1766_v39 }
 0x1f8   : > { %1828 = vst.msk [vmem:[%s4162_s8 + $0x18] sm:$0xff] %vm1304_vm3, %v1710_v37 }
 0x1f9   : > { %1826 = vst.msk [vmem:[%s4162_s8 + $0x8] sm:$0xff] %vm1304_vm3, %v1702_v17 }
 0x215   : > { %v2047_v11 = vpop.f32.mrb[4].mxu1 }
 0x216   : > { %v1787_v21 = vadd.f32 %v2047_v11, %v4157_v14  ;;  %v1778_v6 = vpop.f32.mrb[5].mxu1 }
 0x217   : > { %v2031_v5 = vpop.f32.mrb[4].mxu0  ;;  %v1779_v59 = vadd.f32 %v4157_v14, %v1778_v6  ;;  %v2048_v50 = vpop.f32.mrb[6].mxu1 }
 0x218   : > { %v1723_v16 = vadd.f32 %v2031_v5, %v4157_v14  ;;  %1847 = vst.msk [vmem:[%s4162_s8 + $0xb0] sm:$0xff] %vm1304_vm3, %v1787_v21  ;;  %v1714_v4 = vpop.f32.mrb[5].mxu0  ;;  %v1790_v35 = vadd.f32 %v2048_v50, %v4157_v14  ;;  %v1781_v61 = vpop.f32.mrb[7].mxu1 }
 0x219   : > { %v1715_v31 = vadd.f32 %v4157_v14, %v1714_v4  ;;  %1845 = vst.msk [vmem:[%s4162_s8 + $0xa0] sm:$0xff] %vm1304_vm3, %v1779_v59  ;;  %v2032_v18 = vpop.f32.mrb[6].mxu0  ;;  %v1782_v57 = vadd.f32 %v4157_v14, %v1781_v61 }
 0x21a   : > { %1831 = vst.msk [vmem:[%s4162_s8 + $0x30] sm:$0xff] %vm1304_vm3, %v1723_v16  ;;  %v1726_v53 = vadd.f32 %v2032_v18, %v4157_v14  ;;  %1848 = vst.msk [vmem:[%s4162_s8 + $0xb8] sm:$0xff] %vm1304_vm3, %v1790_v35  ;;  %v1717_v48 = vpop.f32.mrb[7].mxu0 }
 0x21b   : > { %1829 = vst.msk [vmem:[%s4162_s8 + $0x20] sm:$0xff] %vm1304_vm3, %v1715_v31  ;;  %v1718_v46 = vadd.f32 %v4157_v14, %v1717_v48  ;;  %1846 = vst.msk [vmem:[%s4162_s8 + $0xa8] sm:$0xff] %vm1304_vm3, %v1782_v57 }
 0x21c   : > { %1832 = vst.msk [vmem:[%s4162_s8 + $0x38] sm:$0xff] %vm1304_vm3, %v1726_v53 }
 0x21d   : > { %1830 = vst.msk [vmem:[%s4162_s8 + $0x28] sm:$0xff] %vm1304_vm3, %v1718_v46 }
 0x23d   : > { %v2051_v47 = vpop.f32.mrb[8].mxu1 }
 0x23e   : > { %v1803_v12 = vadd.f32 %v2051_v47, %v4157_v14  ;;  %v1794_v20 = vpop.f32.mrb[9].mxu1 }
 0x23f   : > { %v2035_v28 = vpop.f32.mrb[8].mxu0  ;;  %v1795_v3 = vadd.f32 %v4157_v14, %v1794_v20  ;;  %v2052_v15 = vpop.f32.mrb[10].mxu1 }
 0x240   : > { %v1739_v23 = vadd.f32 %v2035_v28, %v4157_v14  ;;  %1851 = vst.msk [vmem:[%s4162_s8 + $0xd0] sm:$0xff] %vm1304_vm3, %v1803_v12  ;;  %v1730_v9 = vpop.f32.mrb[9].mxu0  ;;  %v1806_v45 = vadd.f32 %v2052_v15, %v4157_v14  ;;  %v1797_v22 = vpop.f32.mrb[11].mxu1 }
 0x241   : > { %v1731_v58 = vadd.f32 %v4157_v14, %v1730_v9  ;;  %1849 = vst.msk [vmem:[%s4162_s8 + $0xc0] sm:$0xff] %vm1304_vm3, %v1795_v3  ;;  %v2036_v24 = vpop.f32.mrb[10].mxu0  ;;  %v1798_v55 = vadd.f32 %v4157_v14, %v1797_v22 }
 0x242   : > { %1835 = vst.msk [vmem:[%s4162_s8 + $0x50] sm:$0xff] %vm1304_vm3, %v1739_v23  ;;  %v1742_v0 = vadd.f32 %v2036_v24, %v4157_v14  ;;  %1852 = vst.msk [vmem:[%s4162_s8 + $0xd8] sm:$0xff] %vm1304_vm3, %v1806_v45  ;;  %v1733_v8 = vpop.f32.mrb[11].mxu0 }
 0x243   : > { %1833 = vst.msk [vmem:[%s4162_s8 + $0x40] sm:$0xff] %vm1304_vm3, %v1731_v58  ;;  %v1734_v38 = vadd.f32 %v4157_v14, %v1733_v8  ;;  %1850 = vst.msk [vmem:[%s4162_s8 + $0xc8] sm:$0xff] %vm1304_vm3, %v1798_v55 }
 0x244   : > { %1836 = vst.msk [vmem:[%s4162_s8 + $0x58] sm:$0xff] %vm1304_vm3, %v1742_v0 }
 0x245   : > { %1834 = vst.msk [vmem:[%s4162_s8 + $0x48] sm:$0xff] %vm1304_vm3, %v1734_v38 }
 0x265   : > { %v2055_v13 = vpop.f32.mrb[12].mxu1 }
 0x266   : > { %v1819_v7 = vadd.f32 %v2055_v13, %v4157_v14  ;;  %v1810_v40 = vpop.f32.mrb[13].mxu1 }
 0x267   : > { %v2039_v54 = vpop.f32.mrb[12].mxu0  ;;  %v1811_v49 = vadd.f32 %v4157_v14, %v1810_v40  ;;  %v2056_v42 = vpop.f32.mrb[14].mxu1 }
 0x268   : > { %v1755_v60 = vadd.f32 %v2039_v54, %v4157_v14  ;;  %1855 = vst.msk [vmem:[%s4162_s8 + $0xf0] sm:$0xff] %vm1304_vm3, %v1819_v7  ;;  %v1746_v32 = vpop.f32.mrb[13].mxu0  ;;  %v1822_v10 = vadd.f32 %v2056_v42, %v4157_v14  ;;  %v1813_v19 = vpop.f32.mrb[15].mxu1 }
 0x269   : > { %v1747_v52 = vadd.f32 %v4157_v14, %v1746_v32  ;;  %1853 = vst.msk [vmem:[%s4162_s8 + $0xe0] sm:$0xff] %vm1304_vm3, %v1811_v49  ;;  %v2040_v43 = vpop.f32.mrb[14].mxu0  ;;  %v1814_v1 = vadd.f32 %v4157_v14, %v1813_v19 }
 0x26a   : > { %1839 = vst.msk [vmem:[%s4162_s8 + $0x70] sm:$0xff] %vm1304_vm3, %v1755_v60  ;;  %v1758_v56 = vadd.f32 %v2040_v43, %v4157_v14  ;;  %1856 = vst.msk [vmem:[%s4162_s8 + $0xf8] sm:$0xff] %vm1304_vm3, %v1822_v10  ;;  %v1749_v27 = vpop.f32.mrb[15].mxu0 }
 0x26b   : > { %1837 = vst.msk [vmem:[%s4162_s8 + $0x60] sm:$0xff] %vm1304_vm3, %v1747_v52  ;;  %v1750_v33 = vadd.f32 %v4157_v14, %v1749_v27  ;;  %1854 = vst.msk [vmem:[%s4162_s8 + $0xe8] sm:$0xff] %vm1304_vm3, %v1814_v1 }
 0x26c   : > { %1840 = vst.msk [vmem:[%s4162_s8 + $0x78] sm:$0xff] %vm1304_vm3, %v1758_v56 }
 0x26d   : > { %1838 = vst.msk [vmem:[%s4162_s8 + $0x68] sm:$0xff] %vm1304_vm3, %v1750_v33 }
 0x26e PF: > { %s13_s12 = sadd.s32 1, %s2732_s12  }
 0x26f   : > { %p10_p4 = scmp.ge.s32.totalorder %s13_s12, 4  }
 0x271   :  { %12 = sbr.rel (!%p10_p4) target bundleno = 1 (0x1), region = 65 }

</bundles_post_ra>
